<compile_context>
chip_gen: v5e
topology: v5e:2x2
jax: 0.10.0
libtpu: 0.0.40
codegen_flags: <defaults>
</compile_context>

<pallas_src>
import jax
import jax.numpy as jnp
from jax import lax
from jax.experimental import pallas as pl
from jax.experimental.pallas import tpu as pltpu


# ------------------------------ Pallas kernel -------------------------------

def _net_kernel(x_ref, t1_ref, b1_ref, t2_ref, b2_ref, w1_ref, b3_ref,
                w2_ref, b4_ref, o_ref, xp_ref, fc_ref):
    bt = x_ref.shape[0]

    # ---- conv1 (1->10, k=5, VALID) as 5 Toeplitz matmuls on the MXU --------
    # rows = (b, oh) [bt*24], contraction = image width (28),
    # cols = ow*10 + co [240]  (lane-dense N)
    acc1 = jnp.dot(x_ref[:, 0:24, :].reshape(bt * 24, 28), t1_ref[0],
                   preferred_element_type=jnp.float32)
    for dy in range(1, 5):
        xs = x_ref[:, dy:dy + 24, :].reshape(bt * 24, 28)
        acc1 = acc1 + jnp.dot(xs, t1_ref[dy], preferred_element_type=jnp.float32)
    y1 = (acc1 + b1_ref[...]).reshape(bt, 24, 240)

    # ---- fused 2x2 maxpool + ReLU ------------------------------------------
    # width pooling: column j pairs with j+10 (ow, ow+1); columns stay
    # "uncompacted" (j = 20*ow' + c) -- unused columns hit zero rows of t2.
    mw = jnp.maximum(y1[:, :, 0:230], y1[:, :, 10:240])            # (bt, 24, 230)
    mh = jnp.maximum(mw[:, 0:23, :], mw[:, 1:24, :])               # (bt, 23, 230)
    for k in range(12):                                            # keep even rows
        xp_ref[:, k:k + 1, :] = jnp.maximum(mh[:, 2 * k:2 * k + 1, :], 0.0)

    # ---- conv2 (10->20, k=5, VALID) ----------------------------------------
    # TODO(synk): Dropout2d is identity here (eval-mode semantics).
    # rows = (b, oh2) [bt*8], contraction = uncompacted (w, ci) [230],
    # cols = ow2*20 + co [160]
    acc2 = jnp.dot(xp_ref[:, 0:8, :].reshape(bt * 8, 230), t2_ref[0],
                   preferred_element_type=jnp.float32)
    for dy in range(1, 5):
        xs2 = xp_ref[:, dy:dy + 8, :].reshape(bt * 8, 230)
        acc2 = acc2 + jnp.dot(xs2, t2_ref[dy], preferred_element_type=jnp.float32)
    y2 = (acc2 + b2_ref[...]).reshape(bt, 8, 160)

    # ---- fused 2x2 maxpool + ReLU ------------------------------------------
    mw2 = jnp.maximum(y2[:, :, 0:140], y2[:, :, 20:160])           # (bt, 8, 140)
    mh2 = jnp.maximum(mw2[:, 0:7, :], mw2[:, 1:8, :])              # (bt, 7, 140)
    for k in range(4):
        fc_ref[:, k:k + 1, :] = jnp.maximum(mh2[:, 2 * k:2 * k + 1, :], 0.0)

    # ---- fc1 (320->50, out padded to 128) + ReLU ---------------------------
    # flatten is folded into w1's row layout (one 140-wide chunk per h'').
    h = jnp.dot(fc_ref[:, 0, :], w1_ref[0], preferred_element_type=jnp.float32)
    for k in range(1, 4):
        h = h + jnp.dot(fc_ref[:, k, :], w1_ref[k],
                        preferred_element_type=jnp.float32)
    h = jnp.maximum(h + b3_ref[...], 0.0)                          # (bt, 128)
    # TODO(synk): F.dropout is identity here (eval-mode semantics).

    # ---- fc2 (50->10, padded to 128) + log_softmax over lanes --------------
    logits = jnp.dot(h, w2_ref[...], preferred_element_type=jnp.float32)
    logits = logits + b4_ref[...]          # padded classes carry a -1e30 bias
    m = jnp.max(logits, axis=-1, keepdims=True)
    s = logits - m
    lse = jnp.log(jnp.sum(jnp.exp(s), axis=-1, keepdims=True))
    o_ref[...] = (s - lse).astype(o_ref.dtype)


# --------------------------- one-time weight prep ---------------------------

def _conv_toeplitz(w, w_in, in_stride):
    """Per-kernel-row Toeplitz matrices for a VALID, stride-1 conv.

    w: (Cout, Cin, K, K) torch-layout weights. Input rows are laid out as
    j = in_stride * w_pos + ci. Returns T: (K, L, OW*Cout) with
    L = in_stride*(w_in-1) + Cin and
    T[dy, in_stride*w + ci, ow*Cout + co] = w[co, ci, dy, w - ow] (0 <= w-ow < K).
    """
    cout, cin, k, _ = w.shape
    ow_n = w_in - k + 1
    l = in_stride * (w_in - 1) + cin
    wt = jnp.transpose(w, (2, 3, 1, 0))                            # (K, K, Cin, Cout)
    kw = jnp.arange(w_in)[:, None] - jnp.arange(ow_n)[None, :]     # (w_in, OW)
    valid = ((kw >= 0) & (kw < k)).astype(w.dtype)
    g = wt[:, jnp.clip(kw, 0, k - 1)]                              # (K, w_in, OW, Cin, Cout)
    g = g * valid[None, :, :, None, None]
    g = jnp.transpose(g, (0, 1, 3, 2, 4))                          # (K, w_in, Cin, OW, Cout)
    if in_stride != cin:
        g = jnp.pad(g, ((0, 0), (0, 0), (0, in_stride - cin), (0, 0), (0, 0)))
    return g.reshape(k, w_in * in_stride, ow_n * cout)[:, :l, :]


def prepare_params(params):
    """Repack torch-layout params into kernel-ready operands (done once)."""
    f32 = jnp.float32
    t1 = _conv_toeplitz(params["conv1_w"].astype(f32), w_in=28, in_stride=1)   # (5, 28, 240)
    b1 = jnp.tile(params["conv1_b"].astype(f32), 24).reshape(1, 240)
    t2 = _conv_toeplitz(params["conv2_w"].astype(f32), w_in=12, in_stride=20)  # (5, 230, 160)
    b2 = jnp.tile(params["conv2_b"].astype(f32), 8).reshape(1, 160)

    # fc1: rows reordered so the kernel's (h, uncompacted (w, c)) feature
    # layout matches torch's channel-major .view(-1, 320); out-dim 50 -> 128.
    fc1_w = params["fc1_w"].astype(f32)                   # (50, 320), torch idx c*16+h*4+w
    hh = jnp.arange(4)[:, None, None]
    ww = jnp.arange(4)[None, :, None]
    cc = jnp.arange(20)[None, None, :]
    src = fc1_w[:, (cc * 16 + hh * 4 + ww)]               # (50, 4, 4, 20)
    src = jnp.transpose(src, (1, 2, 3, 0))                # (4h, 4w, 20c, 50)
    src = jnp.pad(src, ((0, 0), (0, 0), (0, 20), (0, 0))) # c-slots padded to stride 40
    w1 = jnp.pad(src.reshape(4, 160, 50)[:, :140, :], ((0, 0), (0, 0), (0, 78)))  # (4, 140, 128)
    b3 = jnp.pad(params["fc1_b"].astype(f32), (0, 78)).reshape(1, 128)

    # fc2: (10, 50) -> (128, 128); padded class logits get a -1e30 bias so the
    # in-kernel log_softmax over 128 lanes ignores them.
    w2 = jnp.zeros((128, 128), f32).at[:50, :10].set(params["fc2_w"].astype(f32).T)
    b4 = jnp.full((1, 128), -1e30, f32).at[0, :10].set(params["fc2_b"].astype(f32))
    return {"t1": t1, "b1": b1, "t2": t2, "b2": b2,
            "w1": w1, "b3": b3, "w2": w2, "b4": b4}


# -------------------------------- forward -----------------------------------

def net_forward(x, prep, *, batch_tile=64):
    """x: (B, 1, 28, 28) -> log-probs (B, 10). Single fused pallas_call."""
    b = x.shape[0]
    x = x.reshape(b, 28, 28).astype(jnp.float32)
    bt = batch_tile if b >= batch_tile else b
    bpad = pl.cdiv(b, bt) * bt
    if bpad != b:
        x = jnp.pad(x, ((0, bpad - b), (0, 0), (0, 0)))

    out = pl.pallas_call(
        _net_kernel,
        out_shape=jax.ShapeDtypeStruct((bpad, 128), jnp.float32),
        grid_spec=pltpu.PrefetchScalarGridSpec(
            num_scalar_prefetch=0,
            grid=(bpad // bt,),
            in_specs=[
                pl.BlockSpec((bt, 28, 28), lambda i: (i, 0, 0)),     # input tile
                pl.BlockSpec((5, 28, 240), lambda i: (0, 0, 0)),     # conv1 Toeplitz
                pl.BlockSpec((1, 240), lambda i: (0, 0)),            # conv1 bias (tiled)
                pl.BlockSpec((5, 230, 160), lambda i: (0, 0, 0)),    # conv2 Toeplitz
                pl.BlockSpec((1, 160), lambda i: (0, 0)),            # conv2 bias (tiled)
                pl.BlockSpec((4, 140, 128), lambda i: (0, 0, 0)),    # fc1 (chunked, padded)
                pl.BlockSpec((1, 128), lambda i: (0, 0)),            # fc1 bias (padded)
                pl.BlockSpec((128, 128), lambda i: (0, 0)),          # fc2 (padded)
                pl.BlockSpec((1, 128), lambda i: (0, 0)),            # fc2 bias (padded)
            ],
            out_specs=pl.BlockSpec((bt, 128), lambda i: (i, 0)),
            scratch_shapes=[
                pltpu.VMEM((bt, 12, 230), jnp.float32),   # pooled conv1 map
                pltpu.VMEM((bt, 4, 140), jnp.float32),    # pooled conv2 map (fc input)
            ],
        ),
        compiler_params=pltpu.CompilerParams(
            dimension_semantics=("parallel",),
            vmem_limit_bytes=32 * 1024 * 1024,
        ),
    )(x, prep["t1"], prep["b1"], prep["t2"], prep["b2"],
      prep["w1"], prep["b3"], prep["w2"], prep["b4"])
    return out[:b, :10]


# ------------------------------ reference / init ----------------------------

def net_reference(x, params):
    """Pure-JAX (XLA) reference with identical eval-mode semantics."""
    def conv(v, w, bb):
        y = lax.conv_general_dilated(v, w, (1, 1), "VALID",
                                     dimension_numbers=("NCHW", "OIHW", "NCHW"))
        return y + bb.reshape(1, -1, 1, 1)

    def pool_relu(v):
        n, c, h, w = v.shape
        v = v.reshape(n, c, h // 2, 2, w // 2, 2).max(axis=(3, 5))
        return jnp.maximum(v, 0.0)

    v = pool_relu(conv(x, params["conv1_w"], params["conv1_b"]))
    v = pool_relu(conv(v, params["conv2_w"], params["conv2_b"]))
    v = v.reshape(v.shape[0], 320)
    v = jnp.maximum(v @ params["fc1_w"].T + params["fc1_b"], 0.0)
    v = v @ params["fc2_w"].T + params["fc2_b"]
    return jax.nn.log_softmax(v, axis=-1)


def init_params(key):
    ks = jax.random.split(key, 8)

    def u(k, shape, fan_in):
        bound = 1.0 / jnp.sqrt(jnp.float32(fan_in))
        return jax.random.uniform(k, shape, jnp.float32, -bound, bound)

    return {
        "conv1_w": u(ks[0], (10, 1, 5, 5), 1 * 5 * 5),
        "conv1_b": u(ks[1], (10,), 1 * 5 * 5),
        "conv2_w": u(ks[2], (20, 10, 5, 5), 10 * 5 * 5),
        "conv2_b": u(ks[3], (20,), 10 * 5 * 5),
        "fc1_w":  u(ks[4], (50, 320), 320),   # torch Linear stores (out, in)
        "fc1_b":  u(ks[5], (50,), 320),
        "fc2_w":  u(ks[6], (10, 50), 50),
        "fc2_b":  u(ks[7], (10,), 50),
    }


if __name__ == "__main__":
    key = jax.random.PRNGKey(0)
    pkey, xkey = jax.random.split(key)
    params = init_params(pkey)
    prep = prepare_params(params)
    x = jax.random.normal(xkey, (2, 1, 28, 28), dtype=jnp.float32)

    out = jax.jit(net_forward)(x, prep)
    out = jax.block_until_ready(out)

    assert out.shape == (2, 10), out.shape
    # rows of log_softmax must exp-sum to ~1
    assert bool(jnp.all(jnp.abs(jnp.sum(jnp.exp(out), axis=1) - 1.0) < 1e-4))
    # cross-check the fused kernel against a pure-JAX eval-mode reference
    ref = net_reference(x, params)
    err = float(jnp.max(jnp.abs(out - ref)))
    assert err < 5e-2, err
    print("KERNEL_OK")
</pallas_src>

<mosaic_0001>
module attributes {stable_mosaic.version = 11 : i64} {
  func.func @_net_kernel(%arg0: i32, %arg1: memref<2x28x28xf32, #tpu.memory_space<vmem>>, %arg2: memref<5x28x240xf32, #tpu.memory_space<vmem>>, %arg3: memref<1x240xf32, #tpu.memory_space<vmem>>, %arg4: memref<5x230x160xf32, #tpu.memory_space<vmem>>, %arg5: memref<1x160xf32, #tpu.memory_space<vmem>>, %arg6: memref<4x140x128xf32, #tpu.memory_space<vmem>>, %arg7: memref<1x128xf32, #tpu.memory_space<vmem>>, %arg8: memref<128x128xf32, #tpu.memory_space<vmem>>, %arg9: memref<1x128xf32, #tpu.memory_space<vmem>>, %arg10: memref<2x128xf32, #tpu.memory_space<vmem>>, %arg11: memref<2x12x230xf32, #tpu.memory_space<vmem>>, %arg12: memref<2x4x140xf32, #tpu.memory_space<vmem>>) attributes {dimension_semantics = [#tpu.dimension_semantics<parallel>], iteration_bounds = array<i64: 1>, scalar_prefetch = 0 : i64, scratch_operands = 2 : i64, tpu.core_type = #tpu.core_type<tc>, window_params = [{transform_indices = @transform_0, window_bounds = array<i64: 2, 28, 28>}, {pipeline_mode = #tpu.pipeline_mode<synchronous>, transform_indices = @transform_1, window_bounds = array<i64: 5, 28, 240>}, {pipeline_mode = #tpu.pipeline_mode<synchronous>, transform_indices = @transform_2, window_bounds = array<i64: 1, 240>}, {pipeline_mode = #tpu.pipeline_mode<synchronous>, transform_indices = @transform_3, window_bounds = array<i64: 5, 230, 160>}, {pipeline_mode = #tpu.pipeline_mode<synchronous>, transform_indices = @transform_4, window_bounds = array<i64: 1, 160>}, {pipeline_mode = #tpu.pipeline_mode<synchronous>, transform_indices = @transform_5, window_bounds = array<i64: 4, 140, 128>}, {pipeline_mode = #tpu.pipeline_mode<synchronous>, transform_indices = @transform_6, window_bounds = array<i64: 1, 128>}, {pipeline_mode = #tpu.pipeline_mode<synchronous>, transform_indices = @transform_7, window_bounds = array<i64: 128, 128>}, {pipeline_mode = #tpu.pipeline_mode<synchronous>, transform_indices = @transform_8, window_bounds = array<i64: 1, 128>}, {transform_indices = @transform_9, window_bounds = array<i64: 2, 128>}]} {
    %c0 = arith.constant 0 : index
    %c0_0 = arith.constant 0 : index
    %c0_1 = arith.constant 0 : index
    %0 = vector.load %arg1[%c0, %c0_0, %c0_1] : memref<2x28x28xf32, #tpu.memory_space<vmem>>, vector<2x24x28xf32>
    %1 = vector.shape_cast %0 : vector<2x24x28xf32> to vector<48x28xf32>
    %c0_2 = arith.constant 0 : index
    %c0_3 = arith.constant 0 : index
    %c0_4 = arith.constant 0 : index
    %2 = vector.load %arg2[%c0_2, %c0_3, %c0_4] : memref<5x28x240xf32, #tpu.memory_space<vmem>>, vector<1x28x240xf32>
    %3 = vector.shape_cast %2 : vector<1x28x240xf32> to vector<28x240xf32>
    %cst = arith.constant dense<0.000000e+00> : vector<48x240xf32>
    %4 = tpu.matmul %1, %3, %cst {dimension_numbers = #tpu.dot_dimension_numbers<[1], [0], [0], [1], [0, 0, 1, 1], [], []>} : vector<48x28xf32>, vector<28x240xf32>, vector<48x240xf32> -> vector<48x240xf32>
    %c0_5 = arith.constant 0 : index
    %c1 = arith.constant 1 : index
    %c0_6 = arith.constant 0 : index
    %5 = vector.load %arg1[%c0_5, %c1, %c0_6] : memref<2x28x28xf32, #tpu.memory_space<vmem>>, vector<2x24x28xf32>
    %6 = vector.shape_cast %5 : vector<2x24x28xf32> to vector<48x28xf32>
    %c1_7 = arith.constant 1 : index
    %c0_8 = arith.constant 0 : index
    %c0_9 = arith.constant 0 : index
    %7 = vector.load %arg2[%c1_7, %c0_8, %c0_9] : memref<5x28x240xf32, #tpu.memory_space<vmem>>, vector<1x28x240xf32>
    %8 = vector.shape_cast %7 : vector<1x28x240xf32> to vector<28x240xf32>
    %cst_10 = arith.constant dense<0.000000e+00> : vector<48x240xf32>
    %9 = tpu.matmul %6, %8, %cst_10 {dimension_numbers = #tpu.dot_dimension_numbers<[1], [0], [0], [1], [0, 0, 1, 1], [], []>} : vector<48x28xf32>, vector<28x240xf32>, vector<48x240xf32> -> vector<48x240xf32>
    %10 = arith.addf %4, %9 : vector<48x240xf32>
    %c0_11 = arith.constant 0 : index
    %c2 = arith.constant 2 : index
    %c0_12 = arith.constant 0 : index
    %11 = vector.load %arg1[%c0_11, %c2, %c0_12] : memref<2x28x28xf32, #tpu.memory_space<vmem>>, vector<2x24x28xf32>
    %12 = vector.shape_cast %11 : vector<2x24x28xf32> to vector<48x28xf32>
    %c2_13 = arith.constant 2 : index
    %c0_14 = arith.constant 0 : index
    %c0_15 = arith.constant 0 : index
    %13 = vector.load %arg2[%c2_13, %c0_14, %c0_15] : memref<5x28x240xf32, #tpu.memory_space<vmem>>, vector<1x28x240xf32>
    %14 = vector.shape_cast %13 : vector<1x28x240xf32> to vector<28x240xf32>
    %cst_16 = arith.constant dense<0.000000e+00> : vector<48x240xf32>
    %15 = tpu.matmul %12, %14, %cst_16 {dimension_numbers = #tpu.dot_dimension_numbers<[1], [0], [0], [1], [0, 0, 1, 1], [], []>} : vector<48x28xf32>, vector<28x240xf32>, vector<48x240xf32> -> vector<48x240xf32>
    %16 = arith.addf %10, %15 : vector<48x240xf32>
    %c0_17 = arith.constant 0 : index
    %c3 = arith.constant 3 : index
    %c0_18 = arith.constant 0 : index
    %17 = vector.load %arg1[%c0_17, %c3, %c0_18] : memref<2x28x28xf32, #tpu.memory_space<vmem>>, vector<2x24x28xf32>
    %18 = vector.shape_cast %17 : vector<2x24x28xf32> to vector<48x28xf32>
    %c3_19 = arith.constant 3 : index
    %c0_20 = arith.constant 0 : index
    %c0_21 = arith.constant 0 : index
    %19 = vector.load %arg2[%c3_19, %c0_20, %c0_21] : memref<5x28x240xf32, #tpu.memory_space<vmem>>, vector<1x28x240xf32>
    %20 = vector.shape_cast %19 : vector<1x28x240xf32> to vector<28x240xf32>
    %cst_22 = arith.constant dense<0.000000e+00> : vector<48x240xf32>
    %21 = tpu.matmul %18, %20, %cst_22 {dimension_numbers = #tpu.dot_dimension_numbers<[1], [0], [0], [1], [0, 0, 1, 1], [], []>} : vector<48x28xf32>, vector<28x240xf32>, vector<48x240xf32> -> vector<48x240xf32>
    %22 = arith.addf %16, %21 : vector<48x240xf32>
    %c0_23 = arith.constant 0 : index
    %c4 = arith.constant 4 : index
    %c0_24 = arith.constant 0 : index
    %23 = vector.load %arg1[%c0_23, %c4, %c0_24] : memref<2x28x28xf32, #tpu.memory_space<vmem>>, vector<2x24x28xf32>
    %24 = vector.shape_cast %23 : vector<2x24x28xf32> to vector<48x28xf32>
    %c4_25 = arith.constant 4 : index
    %c0_26 = arith.constant 0 : index
    %c0_27 = arith.constant 0 : index
    %25 = vector.load %arg2[%c4_25, %c0_26, %c0_27] : memref<5x28x240xf32, #tpu.memory_space<vmem>>, vector<1x28x240xf32>
    %26 = vector.shape_cast %25 : vector<1x28x240xf32> to vector<28x240xf32>
    %cst_28 = arith.constant dense<0.000000e+00> : vector<48x240xf32>
    %27 = tpu.matmul %24, %26, %cst_28 {dimension_numbers = #tpu.dot_dimension_numbers<[1], [0], [0], [1], [0, 0, 1, 1], [], []>} : vector<48x28xf32>, vector<28x240xf32>, vector<48x240xf32> -> vector<48x240xf32>
    %28 = arith.addf %22, %27 : vector<48x240xf32>
    %c0_29 = arith.constant 0 : index
    %c0_30 = arith.constant 0 : index
    %29 = vector.load %arg3[%c0_29, %c0_30] : memref<1x240xf32, #tpu.memory_space<vmem>>, vector<1x240xf32>
    %30 = vector.broadcast %29 : vector<1x240xf32> to vector<48x240xf32>
    %31 = arith.addf %28, %30 : vector<48x240xf32>
    %32 = vector.shape_cast %31 : vector<48x240xf32> to vector<2x24x240xf32>
    %33 = vector.extract_strided_slice %32 {offsets = [0, 0, 0], sizes = [2, 24, 230], strides = [1, 1, 1]} : vector<2x24x240xf32> to vector<2x24x230xf32>
    %34 = vector.extract_strided_slice %32 {offsets = [0, 0, 10], sizes = [2, 24, 230], strides = [1, 1, 1]} : vector<2x24x240xf32> to vector<2x24x230xf32>
    %35 = arith.maximumf %33, %34 : vector<2x24x230xf32>
    %36 = vector.extract_strided_slice %35 {offsets = [0, 0, 0], sizes = [2, 23, 230], strides = [1, 1, 1]} : vector<2x24x230xf32> to vector<2x23x230xf32>
    %37 = vector.extract_strided_slice %35 {offsets = [0, 1, 0], sizes = [2, 23, 230], strides = [1, 1, 1]} : vector<2x24x230xf32> to vector<2x23x230xf32>
    %38 = arith.maximumf %36, %37 : vector<2x23x230xf32>
    %39 = vector.extract_strided_slice %38 {offsets = [0, 0, 0], sizes = [2, 1, 230], strides = [1, 1, 1]} : vector<2x23x230xf32> to vector<2x1x230xf32>
    %cst_31 = arith.constant 0.000000e+00 : f32
    %40 = vector.broadcast %cst_31 : f32 to vector<2x1x230xf32>
    %41 = arith.maximumf %39, %40 : vector<2x1x230xf32>
    %c0_32 = arith.constant 0 : index
    %c0_33 = arith.constant 0 : index
    %c0_34 = arith.constant 0 : index
    %42 = vector.load %arg11[%c0_32, %c0_33, %c0_34] : memref<2x12x230xf32, #tpu.memory_space<vmem>>, vector<2x1x230xf32>
    tpu.vector_store %arg11[%c0_32, %c0_33, %c0_34], %41 {strides = array<i32>} : memref<2x12x230xf32, #tpu.memory_space<vmem>>, vector<2x1x230xf32>,
    %43 = vector.extract_strided_slice %38 {offsets = [0, 2, 0], sizes = [2, 1, 230], strides = [1, 1, 1]} : vector<2x23x230xf32> to vector<2x1x230xf32>
    %cst_35 = arith.constant 0.000000e+00 : f32
    %44 = vector.broadcast %cst_35 : f32 to vector<2x1x230xf32>
    %45 = arith.maximumf %43, %44 : vector<2x1x230xf32>
    %c0_36 = arith.constant 0 : index
    %c1_37 = arith.constant 1 : index
    %c0_38 = arith.constant 0 : index
    %46 = vector.load %arg11[%c0_36, %c1_37, %c0_38] : memref<2x12x230xf32, #tpu.memory_space<vmem>>, vector<2x1x230xf32>
    tpu.vector_store %arg11[%c0_36, %c1_37, %c0_38], %45 {strides = array<i32>} : memref<2x12x230xf32, #tpu.memory_space<vmem>>, vector<2x1x230xf32>,
    %47 = vector.extract_strided_slice %38 {offsets = [0, 4, 0], sizes = [2, 1, 230], strides = [1, 1, 1]} : vector<2x23x230xf32> to vector<2x1x230xf32>
    %cst_39 = arith.constant 0.000000e+00 : f32
    %48 = vector.broadcast %cst_39 : f32 to vector<2x1x230xf32>
    %49 = arith.maximumf %47, %48 : vector<2x1x230xf32>
    %c0_40 = arith.constant 0 : index
    %c2_41 = arith.constant 2 : index
    %c0_42 = arith.constant 0 : index
    %50 = vector.load %arg11[%c0_40, %c2_41, %c0_42] : memref<2x12x230xf32, #tpu.memory_space<vmem>>, vector<2x1x230xf32>
    tpu.vector_store %arg11[%c0_40, %c2_41, %c0_42], %49 {strides = array<i32>} : memref<2x12x230xf32, #tpu.memory_space<vmem>>, vector<2x1x230xf32>,
    %51 = vector.extract_strided_slice %38 {offsets = [0, 6, 0], sizes = [2, 1, 230], strides = [1, 1, 1]} : vector<2x23x230xf32> to vector<2x1x230xf32>
    %cst_43 = arith.constant 0.000000e+00 : f32
    %52 = vector.broadcast %cst_43 : f32 to vector<2x1x230xf32>
    %53 = arith.maximumf %51, %52 : vector<2x1x230xf32>
    %c0_44 = arith.constant 0 : index
    %c3_45 = arith.constant 3 : index
    %c0_46 = arith.constant 0 : index
    %54 = vector.load %arg11[%c0_44, %c3_45, %c0_46] : memref<2x12x230xf32, #tpu.memory_space<vmem>>, vector<2x1x230xf32>
    tpu.vector_store %arg11[%c0_44, %c3_45, %c0_46], %53 {strides = array<i32>} : memref<2x12x230xf32, #tpu.memory_space<vmem>>, vector<2x1x230xf32>,
    %55 = vector.extract_strided_slice %38 {offsets = [0, 8, 0], sizes = [2, 1, 230], strides = [1, 1, 1]} : vector<2x23x230xf32> to vector<2x1x230xf32>
    %cst_47 = arith.constant 0.000000e+00 : f32
    %56 = vector.broadcast %cst_47 : f32 to vector<2x1x230xf32>
    %57 = arith.maximumf %55, %56 : vector<2x1x230xf32>
    %c0_48 = arith.constant 0 : index
    %c4_49 = arith.constant 4 : index
    %c0_50 = arith.constant 0 : index
    %58 = vector.load %arg11[%c0_48, %c4_49, %c0_50] : memref<2x12x230xf32, #tpu.memory_space<vmem>>, vector<2x1x230xf32>
    tpu.vector_store %arg11[%c0_48, %c4_49, %c0_50], %57 {strides = array<i32>} : memref<2x12x230xf32, #tpu.memory_space<vmem>>, vector<2x1x230xf32>,
    %59 = vector.extract_strided_slice %38 {offsets = [0, 10, 0], sizes = [2, 1, 230], strides = [1, 1, 1]} : vector<2x23x230xf32> to vector<2x1x230xf32>
    %cst_51 = arith.constant 0.000000e+00 : f32
    %60 = vector.broadcast %cst_51 : f32 to vector<2x1x230xf32>
    %61 = arith.maximumf %59, %60 : vector<2x1x230xf32>
    %c0_52 = arith.constant 0 : index
    %c5 = arith.constant 5 : index
    %c0_53 = arith.constant 0 : index
    %62 = vector.load %arg11[%c0_52, %c5, %c0_53] : memref<2x12x230xf32, #tpu.memory_space<vmem>>, vector<2x1x230xf32>
    tpu.vector_store %arg11[%c0_52, %c5, %c0_53], %61 {strides = array<i32>} : memref<2x12x230xf32, #tpu.memory_space<vmem>>, vector<2x1x230xf32>,
    %63 = vector.extract_strided_slice %38 {offsets = [0, 12, 0], sizes = [2, 1, 230], strides = [1, 1, 1]} : vector<2x23x230xf32> to vector<2x1x230xf32>
    %cst_54 = arith.constant 0.000000e+00 : f32
    %64 = vector.broadcast %cst_54 : f32 to vector<2x1x230xf32>
    %65 = arith.maximumf %63, %64 : vector<2x1x230xf32>
    %c0_55 = arith.constant 0 : index
    %c6 = arith.constant 6 : index
    %c0_56 = arith.constant 0 : index
    %66 = vector.load %arg11[%c0_55, %c6, %c0_56] : memref<2x12x230xf32, #tpu.memory_space<vmem>>, vector<2x1x230xf32>
    tpu.vector_store %arg11[%c0_55, %c6, %c0_56], %65 {strides = array<i32>} : memref<2x12x230xf32, #tpu.memory_space<vmem>>, vector<2x1x230xf32>,
    %67 = vector.extract_strided_slice %38 {offsets = [0, 14, 0], sizes = [2, 1, 230], strides = [1, 1, 1]} : vector<2x23x230xf32> to vector<2x1x230xf32>
    %cst_57 = arith.constant 0.000000e+00 : f32
    %68 = vector.broadcast %cst_57 : f32 to vector<2x1x230xf32>
    %69 = arith.maximumf %67, %68 : vector<2x1x230xf32>
    %c0_58 = arith.constant 0 : index
    %c7 = arith.constant 7 : index
    %c0_59 = arith.constant 0 : index
    %70 = vector.load %arg11[%c0_58, %c7, %c0_59] : memref<2x12x230xf32, #tpu.memory_space<vmem>>, vector<2x1x230xf32>
    tpu.vector_store %arg11[%c0_58, %c7, %c0_59], %69 {strides = array<i32>} : memref<2x12x230xf32, #tpu.memory_space<vmem>>, vector<2x1x230xf32>,
    %71 = vector.extract_strided_slice %38 {offsets = [0, 16, 0], sizes = [2, 1, 230], strides = [1, 1, 1]} : vector<2x23x230xf32> to vector<2x1x230xf32>
    %cst_60 = arith.constant 0.000000e+00 : f32
    %72 = vector.broadcast %cst_60 : f32 to vector<2x1x230xf32>
    %73 = arith.maximumf %71, %72 : vector<2x1x230xf32>
    %c0_61 = arith.constant 0 : index
    %c8 = arith.constant 8 : index
    %c0_62 = arith.constant 0 : index
    %74 = vector.load %arg11[%c0_61, %c8, %c0_62] : memref<2x12x230xf32, #tpu.memory_space<vmem>>, vector<2x1x230xf32>
    tpu.vector_store %arg11[%c0_61, %c8, %c0_62], %73 {strides = array<i32>} : memref<2x12x230xf32, #tpu.memory_space<vmem>>, vector<2x1x230xf32>,
    %75 = vector.extract_strided_slice %38 {offsets = [0, 18, 0], sizes = [2, 1, 230], strides = [1, 1, 1]} : vector<2x23x230xf32> to vector<2x1x230xf32>
    %cst_63 = arith.constant 0.000000e+00 : f32
    %76 = vector.broadcast %cst_63 : f32 to vector<2x1x230xf32>
    %77 = arith.maximumf %75, %76 : vector<2x1x230xf32>
    %c0_64 = arith.constant 0 : index
    %c9 = arith.constant 9 : index
    %c0_65 = arith.constant 0 : index
    %78 = vector.load %arg11[%c0_64, %c9, %c0_65] : memref<2x12x230xf32, #tpu.memory_space<vmem>>, vector<2x1x230xf32>
    tpu.vector_store %arg11[%c0_64, %c9, %c0_65], %77 {strides = array<i32>} : memref<2x12x230xf32, #tpu.memory_space<vmem>>, vector<2x1x230xf32>,
    %79 = vector.extract_strided_slice %38 {offsets = [0, 20, 0], sizes = [2, 1, 230], strides = [1, 1, 1]} : vector<2x23x230xf32> to vector<2x1x230xf32>
    %cst_66 = arith.constant 0.000000e+00 : f32
    %80 = vector.broadcast %cst_66 : f32 to vector<2x1x230xf32>
    %81 = arith.maximumf %79, %80 : vector<2x1x230xf32>
    %c0_67 = arith.constant 0 : index
    %c10 = arith.constant 10 : index
    %c0_68 = arith.constant 0 : index
    %82 = vector.load %arg11[%c0_67, %c10, %c0_68] : memref<2x12x230xf32, #tpu.memory_space<vmem>>, vector<2x1x230xf32>
    tpu.vector_store %arg11[%c0_67, %c10, %c0_68], %81 {strides = array<i32>} : memref<2x12x230xf32, #tpu.memory_space<vmem>>, vector<2x1x230xf32>,
    %83 = vector.extract_strided_slice %38 {offsets = [0, 22, 0], sizes = [2, 1, 230], strides = [1, 1, 1]} : vector<2x23x230xf32> to vector<2x1x230xf32>
    %cst_69 = arith.constant 0.000000e+00 : f32
    %84 = vector.broadcast %cst_69 : f32 to vector<2x1x230xf32>
    %85 = arith.maximumf %83, %84 : vector<2x1x230xf32>
    %c0_70 = arith.constant 0 : index
    %c11 = arith.constant 11 : index
    %c0_71 = arith.constant 0 : index
    %86 = vector.load %arg11[%c0_70, %c11, %c0_71] : memref<2x12x230xf32, #tpu.memory_space<vmem>>, vector<2x1x230xf32>
    tpu.vector_store %arg11[%c0_70, %c11, %c0_71], %85 {strides = array<i32>} : memref<2x12x230xf32, #tpu.memory_space<vmem>>, vector<2x1x230xf32>,
    %c0_72 = arith.constant 0 : index
    %c0_73 = arith.constant 0 : index
    %c0_74 = arith.constant 0 : index
    %87 = vector.load %arg11[%c0_72, %c0_73, %c0_74] : memref<2x12x230xf32, #tpu.memory_space<vmem>>, vector<2x8x230xf32>
    %88 = vector.shape_cast %87 : vector<2x8x230xf32> to vector<16x230xf32>
    %c0_75 = arith.constant 0 : index
    %c0_76 = arith.constant 0 : index
    %c0_77 = arith.constant 0 : index
    %89 = vector.load %arg4[%c0_75, %c0_76, %c0_77] : memref<5x230x160xf32, #tpu.memory_space<vmem>>, vector<1x230x160xf32>
    %90 = vector.shape_cast %89 : vector<1x230x160xf32> to vector<230x160xf32>
    %cst_78 = arith.constant dense<0.000000e+00> : vector<16x160xf32>
    %91 = tpu.matmul %88, %90, %cst_78 {dimension_numbers = #tpu.dot_dimension_numbers<[1], [0], [0], [1], [0, 0, 1, 1], [], []>} : vector<16x230xf32>, vector<230x160xf32>, vector<16x160xf32> -> vector<16x160xf32>
    %c0_79 = arith.constant 0 : index
    %c1_80 = arith.constant 1 : index
    %c0_81 = arith.constant 0 : index
    %92 = vector.load %arg11[%c0_79, %c1_80, %c0_81] : memref<2x12x230xf32, #tpu.memory_space<vmem>>, vector<2x8x230xf32>
    %93 = vector.shape_cast %92 : vector<2x8x230xf32> to vector<16x230xf32>
    %c1_82 = arith.constant 1 : index
    %c0_83 = arith.constant 0 : index
    %c0_84 = arith.constant 0 : index
    %94 = vector.load %arg4[%c1_82, %c0_83, %c0_84] : memref<5x230x160xf32, #tpu.memory_space<vmem>>, vector<1x230x160xf32>
    %95 = vector.shape_cast %94 : vector<1x230x160xf32> to vector<230x160xf32>
    %cst_85 = arith.constant dense<0.000000e+00> : vector<16x160xf32>
    %96 = tpu.matmul %93, %95, %cst_85 {dimension_numbers = #tpu.dot_dimension_numbers<[1], [0], [0], [1], [0, 0, 1, 1], [], []>} : vector<16x230xf32>, vector<230x160xf32>, vector<16x160xf32> -> vector<16x160xf32>
    %97 = arith.addf %91, %96 : vector<16x160xf32>
    %c0_86 = arith.constant 0 : index
    %c2_87 = arith.constant 2 : index
    %c0_88 = arith.constant 0 : index
    %98 = vector.load %arg11[%c0_86, %c2_87, %c0_88] : memref<2x12x230xf32, #tpu.memory_space<vmem>>, vector<2x8x230xf32>
    %99 = vector.shape_cast %98 : vector<2x8x230xf32> to vector<16x230xf32>
    %c2_89 = arith.constant 2 : index
    %c0_90 = arith.constant 0 : index
    %c0_91 = arith.constant 0 : index
    %100 = vector.load %arg4[%c2_89, %c0_90, %c0_91] : memref<5x230x160xf32, #tpu.memory_space<vmem>>, vector<1x230x160xf32>
    %101 = vector.shape_cast %100 : vector<1x230x160xf32> to vector<230x160xf32>
    %cst_92 = arith.constant dense<0.000000e+00> : vector<16x160xf32>
    %102 = tpu.matmul %99, %101, %cst_92 {dimension_numbers = #tpu.dot_dimension_numbers<[1], [0], [0], [1], [0, 0, 1, 1], [], []>} : vector<16x230xf32>, vector<230x160xf32>, vector<16x160xf32> -> vector<16x160xf32>
    %103 = arith.addf %97, %102 : vector<16x160xf32>
    %c0_93 = arith.constant 0 : index
    %c3_94 = arith.constant 3 : index
    %c0_95 = arith.constant 0 : index
    %104 = vector.load %arg11[%c0_93, %c3_94, %c0_95] : memref<2x12x230xf32, #tpu.memory_space<vmem>>, vector<2x8x230xf32>
    %105 = vector.shape_cast %104 : vector<2x8x230xf32> to vector<16x230xf32>
    %c3_96 = arith.constant 3 : index
    %c0_97 = arith.constant 0 : index
    %c0_98 = arith.constant 0 : index
    %106 = vector.load %arg4[%c3_96, %c0_97, %c0_98] : memref<5x230x160xf32, #tpu.memory_space<vmem>>, vector<1x230x160xf32>
    %107 = vector.shape_cast %106 : vector<1x230x160xf32> to vector<230x160xf32>
    %cst_99 = arith.constant dense<0.000000e+00> : vector<16x160xf32>
    %108 = tpu.matmul %105, %107, %cst_99 {dimension_numbers = #tpu.dot_dimension_numbers<[1], [0], [0], [1], [0, 0, 1, 1], [], []>} : vector<16x230xf32>, vector<230x160xf32>, vector<16x160xf32> -> vector<16x160xf32>
    %109 = arith.addf %103, %108 : vector<16x160xf32>
    %c0_100 = arith.constant 0 : index
    %c4_101 = arith.constant 4 : index
    %c0_102 = arith.constant 0 : index
    %110 = vector.load %arg11[%c0_100, %c4_101, %c0_102] : memref<2x12x230xf32, #tpu.memory_space<vmem>>, vector<2x8x230xf32>
    %111 = vector.shape_cast %110 : vector<2x8x230xf32> to vector<16x230xf32>
    %c4_103 = arith.constant 4 : index
    %c0_104 = arith.constant 0 : index
    %c0_105 = arith.constant 0 : index
    %112 = vector.load %arg4[%c4_103, %c0_104, %c0_105] : memref<5x230x160xf32, #tpu.memory_space<vmem>>, vector<1x230x160xf32>
    %113 = vector.shape_cast %112 : vector<1x230x160xf32> to vector<230x160xf32>
    %cst_106 = arith.constant dense<0.000000e+00> : vector<16x160xf32>
    %114 = tpu.matmul %111, %113, %cst_106 {dimension_numbers = #tpu.dot_dimension_numbers<[1], [0], [0], [1], [0, 0, 1, 1], [], []>} : vector<16x230xf32>, vector<230x160xf32>, vector<16x160xf32> -> vector<16x160xf32>
    %115 = arith.addf %109, %114 : vector<16x160xf32>
    %c0_107 = arith.constant 0 : index
    %c0_108 = arith.constant 0 : index
    %116 = vector.load %arg5[%c0_107, %c0_108] : memref<1x160xf32, #tpu.memory_space<vmem>>, vector<1x160xf32>
    %117 = vector.broadcast %116 : vector<1x160xf32> to vector<16x160xf32>
    %118 = arith.addf %115, %117 : vector<16x160xf32>
    %119 = vector.shape_cast %118 : vector<16x160xf32> to vector<2x8x160xf32>
    %120 = vector.extract_strided_slice %119 {offsets = [0, 0, 0], sizes = [2, 8, 140], strides = [1, 1, 1]} : vector<2x8x160xf32> to vector<2x8x140xf32>
    %121 = vector.extract_strided_slice %119 {offsets = [0, 0, 20], sizes = [2, 8, 140], strides = [1, 1, 1]} : vector<2x8x160xf32> to vector<2x8x140xf32>
    %122 = arith.maximumf %120, %121 : vector<2x8x140xf32>
    %123 = vector.extract_strided_slice %122 {offsets = [0, 0, 0], sizes = [2, 7, 140], strides = [1, 1, 1]} : vector<2x8x140xf32> to vector<2x7x140xf32>
    %124 = vector.extract_strided_slice %122 {offsets = [0, 1, 0], sizes = [2, 7, 140], strides = [1, 1, 1]} : vector<2x8x140xf32> to vector<2x7x140xf32>
    %125 = arith.maximumf %123, %124 : vector<2x7x140xf32>
    %126 = vector.extract_strided_slice %125 {offsets = [0, 0, 0], sizes = [2, 1, 140], strides = [1, 1, 1]} : vector<2x7x140xf32> to vector<2x1x140xf32>
    %cst_109 = arith.constant 0.000000e+00 : f32
    %127 = vector.broadcast %cst_109 : f32 to vector<2x1x140xf32>
    %128 = arith.maximumf %126, %127 : vector<2x1x140xf32>
    %c0_110 = arith.constant 0 : index
    %c0_111 = arith.constant 0 : index
    %c0_112 = arith.constant 0 : index
    %129 = vector.load %arg12[%c0_110, %c0_111, %c0_112] : memref<2x4x140xf32, #tpu.memory_space<vmem>>, vector<2x1x140xf32>
    tpu.vector_store %arg12[%c0_110, %c0_111, %c0_112], %128 {strides = array<i32>} : memref<2x4x140xf32, #tpu.memory_space<vmem>>, vector<2x1x140xf32>,
    %130 = vector.extract_strided_slice %125 {offsets = [0, 2, 0], sizes = [2, 1, 140], strides = [1, 1, 1]} : vector<2x7x140xf32> to vector<2x1x140xf32>
    %cst_113 = arith.constant 0.000000e+00 : f32
    %131 = vector.broadcast %cst_113 : f32 to vector<2x1x140xf32>
    %132 = arith.maximumf %130, %131 : vector<2x1x140xf32>
    %c0_114 = arith.constant 0 : index
    %c1_115 = arith.constant 1 : index
    %c0_116 = arith.constant 0 : index
    %133 = vector.load %arg12[%c0_114, %c1_115, %c0_116] : memref<2x4x140xf32, #tpu.memory_space<vmem>>, vector<2x1x140xf32>
    tpu.vector_store %arg12[%c0_114, %c1_115, %c0_116], %132 {strides = array<i32>} : memref<2x4x140xf32, #tpu.memory_space<vmem>>, vector<2x1x140xf32>,
    %134 = vector.extract_strided_slice %125 {offsets = [0, 4, 0], sizes = [2, 1, 140], strides = [1, 1, 1]} : vector<2x7x140xf32> to vector<2x1x140xf32>
    %cst_117 = arith.constant 0.000000e+00 : f32
    %135 = vector.broadcast %cst_117 : f32 to vector<2x1x140xf32>
    %136 = arith.maximumf %134, %135 : vector<2x1x140xf32>
    %c0_118 = arith.constant 0 : index
    %c2_119 = arith.constant 2 : index
    %c0_120 = arith.constant 0 : index
    %137 = vector.load %arg12[%c0_118, %c2_119, %c0_120] : memref<2x4x140xf32, #tpu.memory_space<vmem>>, vector<2x1x140xf32>
    tpu.vector_store %arg12[%c0_118, %c2_119, %c0_120], %136 {strides = array<i32>} : memref<2x4x140xf32, #tpu.memory_space<vmem>>, vector<2x1x140xf32>,
    %138 = vector.extract_strided_slice %125 {offsets = [0, 6, 0], sizes = [2, 1, 140], strides = [1, 1, 1]} : vector<2x7x140xf32> to vector<2x1x140xf32>
    %cst_121 = arith.constant 0.000000e+00 : f32
    %139 = vector.broadcast %cst_121 : f32 to vector<2x1x140xf32>
    %140 = arith.maximumf %138, %139 : vector<2x1x140xf32>
    %c0_122 = arith.constant 0 : index
    %c3_123 = arith.constant 3 : index
    %c0_124 = arith.constant 0 : index
    %141 = vector.load %arg12[%c0_122, %c3_123, %c0_124] : memref<2x4x140xf32, #tpu.memory_space<vmem>>, vector<2x1x140xf32>
    tpu.vector_store %arg12[%c0_122, %c3_123, %c0_124], %140 {strides = array<i32>} : memref<2x4x140xf32, #tpu.memory_space<vmem>>, vector<2x1x140xf32>,
    %c0_125 = arith.constant 0 : index
    %c0_126 = arith.constant 0 : index
    %c0_127 = arith.constant 0 : index
    %142 = vector.load %arg12[%c0_125, %c0_126, %c0_127] : memref<2x4x140xf32, #tpu.memory_space<vmem>>, vector<2x1x140xf32>
    %143 = vector.shape_cast %142 : vector<2x1x140xf32> to vector<2x140xf32>
    %c0_128 = arith.constant 0 : index
    %c0_129 = arith.constant 0 : index
    %c0_130 = arith.constant 0 : index
    %144 = vector.load %arg6[%c0_128, %c0_129, %c0_130] : memref<4x140x128xf32, #tpu.memory_space<vmem>>, vector<1x140x128xf32>
    %145 = vector.shape_cast %144 : vector<1x140x128xf32> to vector<140x128xf32>
    %cst_131 = arith.constant dense<0.000000e+00> : vector<2x128xf32>
    %146 = tpu.matmul %143, %145, %cst_131 {dimension_numbers = #tpu.dot_dimension_numbers<[1], [0], [0], [1], [0, 0, 1, 1], [], []>} : vector<2x140xf32>, vector<140x128xf32>, vector<2x128xf32> -> vector<2x128xf32>
    %c0_132 = arith.constant 0 : index
    %c1_133 = arith.constant 1 : index
    %c0_134 = arith.constant 0 : index
    %147 = vector.load %arg12[%c0_132, %c1_133, %c0_134] : memref<2x4x140xf32, #tpu.memory_space<vmem>>, vector<2x1x140xf32>
    %148 = vector.shape_cast %147 : vector<2x1x140xf32> to vector<2x140xf32>
    %c1_135 = arith.constant 1 : index
    %c0_136 = arith.constant 0 : index
    %c0_137 = arith.constant 0 : index
    %149 = vector.load %arg6[%c1_135, %c0_136, %c0_137] : memref<4x140x128xf32, #tpu.memory_space<vmem>>, vector<1x140x128xf32>
    %150 = vector.shape_cast %149 : vector<1x140x128xf32> to vector<140x128xf32>
    %cst_138 = arith.constant dense<0.000000e+00> : vector<2x128xf32>
    %151 = tpu.matmul %148, %150, %cst_138 {dimension_numbers = #tpu.dot_dimension_numbers<[1], [0], [0], [1], [0, 0, 1, 1], [], []>} : vector<2x140xf32>, vector<140x128xf32>, vector<2x128xf32> -> vector<2x128xf32>
    %152 = arith.addf %146, %151 : vector<2x128xf32>
    %c0_139 = arith.constant 0 : index
    %c2_140 = arith.constant 2 : index
    %c0_141 = arith.constant 0 : index
    %153 = vector.load %arg12[%c0_139, %c2_140, %c0_141] : memref<2x4x140xf32, #tpu.memory_space<vmem>>, vector<2x1x140xf32>
    %154 = vector.shape_cast %153 : vector<2x1x140xf32> to vector<2x140xf32>
    %c2_142 = arith.constant 2 : index
    %c0_143 = arith.constant 0 : index
    %c0_144 = arith.constant 0 : index
    %155 = vector.load %arg6[%c2_142, %c0_143, %c0_144] : memref<4x140x128xf32, #tpu.memory_space<vmem>>, vector<1x140x128xf32>
    %156 = vector.shape_cast %155 : vector<1x140x128xf32> to vector<140x128xf32>
    %cst_145 = arith.constant dense<0.000000e+00> : vector<2x128xf32>
    %157 = tpu.matmul %154, %156, %cst_145 {dimension_numbers = #tpu.dot_dimension_numbers<[1], [0], [0], [1], [0, 0, 1, 1], [], []>} : vector<2x140xf32>, vector<140x128xf32>, vector<2x128xf32> -> vector<2x128xf32>
    %158 = arith.addf %152, %157 : vector<2x128xf32>
    %c0_146 = arith.constant 0 : index
    %c3_147 = arith.constant 3 : index
    %c0_148 = arith.constant 0 : index
    %159 = vector.load %arg12[%c0_146, %c3_147, %c0_148] : memref<2x4x140xf32, #tpu.memory_space<vmem>>, vector<2x1x140xf32>
    %160 = vector.shape_cast %159 : vector<2x1x140xf32> to vector<2x140xf32>
    %c3_149 = arith.constant 3 : index
    %c0_150 = arith.constant 0 : index
    %c0_151 = arith.constant 0 : index
    %161 = vector.load %arg6[%c3_149, %c0_150, %c0_151] : memref<4x140x128xf32, #tpu.memory_space<vmem>>, vector<1x140x128xf32>
    %162 = vector.shape_cast %161 : vector<1x140x128xf32> to vector<140x128xf32>
    %cst_152 = arith.constant dense<0.000000e+00> : vector<2x128xf32>
    %163 = tpu.matmul %160, %162, %cst_152 {dimension_numbers = #tpu.dot_dimension_numbers<[1], [0], [0], [1], [0, 0, 1, 1], [], []>} : vector<2x140xf32>, vector<140x128xf32>, vector<2x128xf32> -> vector<2x128xf32>
    %164 = arith.addf %158, %163 : vector<2x128xf32>
    %c0_153 = arith.constant 0 : index
    %c0_154 = arith.constant 0 : index
    %165 = vector.load %arg7[%c0_153, %c0_154] : memref<1x128xf32, #tpu.memory_space<vmem>>, vector<1x128xf32>
    %166 = vector.broadcast %165 : vector<1x128xf32> to vector<2x128xf32>
    %167 = arith.addf %164, %166 : vector<2x128xf32>
    %cst_155 = arith.constant 0.000000e+00 : f32
    %168 = vector.broadcast %cst_155 : f32 to vector<2x128xf32>
    %169 = arith.maximumf %167, %168 : vector<2x128xf32>
    %c0_156 = arith.constant 0 : index
    %c0_157 = arith.constant 0 : index
    %170 = vector.load %arg8[%c0_156, %c0_157] : memref<128x128xf32, #tpu.memory_space<vmem>>, vector<128x128xf32>
    %cst_158 = arith.constant dense<0.000000e+00> : vector<2x128xf32>
    %171 = tpu.matmul %169, %170, %cst_158 {dimension_numbers = #tpu.dot_dimension_numbers<[1], [0], [0], [1], [0, 0, 1, 1], [], []>} : vector<2x128xf32>, vector<128x128xf32>, vector<2x128xf32> -> vector<2x128xf32>
    %c0_159 = arith.constant 0 : index
    %c0_160 = arith.constant 0 : index
    %172 = vector.load %arg9[%c0_159, %c0_160] : memref<1x128xf32, #tpu.memory_space<vmem>>, vector<1x128xf32>
    %173 = vector.broadcast %172 : vector<1x128xf32> to vector<2x128xf32>
    %174 = arith.addf %171, %173 : vector<2x128xf32>
    %cst_161 = arith.constant dense<0xFF800000> : vector<2xf32>
    %175 = vector.multi_reduction <maximumf>, %174, %cst_161 [1] : vector<2x128xf32> to vector<2xf32>
    %176 = vector.shape_cast %175 : vector<2xf32> to vector<2x1xf32>
    %177 = vector.broadcast %176 : vector<2x1xf32> to vector<2x128xf32>
    %178 = arith.subf %174, %177 : vector<2x128xf32>
    %179 = math.exp %178 : vector<2x128xf32>
    %cst_162 = arith.constant dense<0.000000e+00> : vector<2xf32>
    %180 = vector.multi_reduction <add>, %179, %cst_162 [1] : vector<2x128xf32> to vector<2xf32>
    %181 = vector.shape_cast %180 : vector<2xf32> to vector<2x1xf32>
    %182 = math.log %181 : vector<2x1xf32>
    %183 = vector.broadcast %182 : vector<2x1xf32> to vector<2x128xf32>
    %184 = arith.subf %178, %183 : vector<2x128xf32>
    %c0_163 = arith.constant 0 : index
    %c0_164 = arith.constant 0 : index
    %185 = vector.load %arg10[%c0_163, %c0_164] : memref<2x128xf32, #tpu.memory_space<vmem>>, vector<2x128xf32>
    tpu.vector_store %arg10[%c0_163, %c0_164], %184 {strides = array<i32>} : memref<2x128xf32, #tpu.memory_space<vmem>>, vector<2x128xf32>,
    return
  }
  func.func @transform_0(%arg0: i32) -> (i32, i32, i32) {
    %c0_i32 = arith.constant 0 : i32
    %c0_i32_0 = arith.constant 0 : i32
    %c0_i32_1 = arith.constant 0 : i32
    return %arg0, %c0_i32, %c0_i32_0 : i32, i32, i32
  }
  func.func @transform_1(%arg0: i32) -> (i32, i32, i32) {
    %c0_i32 = arith.constant 0 : i32
    %c0_i32_0 = arith.constant 0 : i32
    %c0_i32_1 = arith.constant 0 : i32
    %c0_i32_2 = arith.constant 0 : i32
    return %c0_i32, %c0_i32_0, %c0_i32_1 : i32, i32, i32
  }
  func.func @transform_2(%arg0: i32) -> (i32, i32) {
    %c0_i32 = arith.constant 0 : i32
    %c0_i32_0 = arith.constant 0 : i32
    %c0_i32_1 = arith.constant 0 : i32
    return %c0_i32, %c0_i32_0 : i32, i32
  }
  func.func @transform_3(%arg0: i32) -> (i32, i32, i32) {
    %c0_i32 = arith.constant 0 : i32
    %c0_i32_0 = arith.constant 0 : i32
    %c0_i32_1 = arith.constant 0 : i32
    %c0_i32_2 = arith.constant 0 : i32
    return %c0_i32, %c0_i32_0, %c0_i32_1 : i32, i32, i32
  }
  func.func @transform_4(%arg0: i32) -> (i32, i32) {
    %c0_i32 = arith.constant 0 : i32
    %c0_i32_0 = arith.constant 0 : i32
    %c0_i32_1 = arith.constant 0 : i32
    return %c0_i32, %c0_i32_0 : i32, i32
  }
  func.func @transform_5(%arg0: i32) -> (i32, i32, i32) {
    %c0_i32 = arith.constant 0 : i32
    %c0_i32_0 = arith.constant 0 : i32
    %c0_i32_1 = arith.constant 0 : i32
    %c0_i32_2 = arith.constant 0 : i32
    return %c0_i32, %c0_i32_0, %c0_i32_1 : i32, i32, i32
  }
  func.func @transform_6(%arg0: i32) -> (i32, i32) {
    %c0_i32 = arith.constant 0 : i32
    %c0_i32_0 = arith.constant 0 : i32
    %c0_i32_1 = arith.constant 0 : i32
    return %c0_i32, %c0_i32_0 : i32, i32
  }
  func.func @transform_7(%arg0: i32) -> (i32, i32) {
    %c0_i32 = arith.constant 0 : i32
    %c0_i32_0 = arith.constant 0 : i32
    %c0_i32_1 = arith.constant 0 : i32
    return %c0_i32, %c0_i32_0 : i32, i32
  }
  func.func @transform_8(%arg0: i32) -> (i32, i32) {
    %c0_i32 = arith.constant 0 : i32
    %c0_i32_0 = arith.constant 0 : i32
    %c0_i32_1 = arith.constant 0 : i32
    return %c0_i32, %c0_i32_0 : i32, i32
  }
  func.func @transform_9(%arg0: i32) -> (i32, i32) {
    %c0_i32 = arith.constant 0 : i32
    %c0_i32_0 = arith.constant 0 : i32
    return %arg0, %c0_i32 : i32, i32
  }
}

</mosaic_0001>

<bundles_post_ra>
// kernel: net_forward.1
= control target key start
LH: loop header
LB: loop body
LE: loop exit
PB: predicated region body
PF: predicated region fallthrough
CT: control target
= control target key end

     0   :  { %vm81_vm0 = vcmask 1043456   ;;  %vm62_vm1 = vcmask 228352   ;;  %s4804_s0 = inlined_call_operand.vmem [shape: f32[2,28,28], index: 0, kind: input, shape index: {}]   ;;  %s4805_s1 = inlined_call_operand.vmem [shape: f32[5,28,240], index: 1, kind: input, shape index: {}]   ;;  %s4806_s2 = inlined_call_operand.vmem [shape: f32[1,240], index: 2, kind: input, shape index: {}]   ;;  %s4807_s3 = inlined_call_operand.vmem [shape: f32[5,230,160], index: 3, kind: input, shape index: {}]   ;;  %s4808_s4 = inlined_call_operand.vmem [shape: f32[1,160], index: 4, kind: input, shape index: {}]   ;;  %s4809_s5 = inlined_call_operand.vmem [shape: f32[4,140,128], index: 5, kind: input, shape index: {}]   ;;  %s4810_s6 = inlined_call_operand.vmem [shape: f32[1,128], index: 6, kind: input, shape index: {}]   ;;  %s4811_s7 = inlined_call_operand.vmem [shape: f32[128,128], index: 7, kind: input, shape index: {}]   ;;  %s4812_s8 = inlined_call_operand.vmem [shape: f32[1,128], index: 8, kind: input, shape index: {}]   ;;  %s4813_s9 = inlined_call_operand.hbm [shape: f32[2,128], index: 9, kind: output, shape index: {}]  }
   0x1   :  { %v2388_v0 = vld [vmem:[%s4805_s1 + $0x70] sm:$0xf]  ;;  %v2389_v1 = vld [vmem:[%s4805_s1 + $0x78] sm:$0xf]  ;;  %v2386_v2 = vld [vmem:[%s4805_s1 + $0x60] sm:$0xff] }
   0x2   :  { %2390 = vmatpush.msk.msra.mxu0 %vm81_vm0, %v2388_v0  ;;  %2397 = vmatpush.msk.msra.mxu1 %vm81_vm0, %v2389_v1  ;;  %v45_v3 = vld [vmem:[%s4805_s1 + $0x30] sm:$0xf]  ;;  %v2387_v4 = vld [vmem:[%s4805_s1 + $0x68] sm:$0xff]  ;;  %v43_v5 = vld [vmem:[%s4805_s1 + $0x20] sm:$0xff] }
   0x3   :  { %2404 = vmatpush.msk.msra.mxu2 %vm81_vm0, %v45_v3  ;;  %v2384_v6 = vld [vmem:[%s4805_s1 + $0x50] sm:$0xff]  ;;  %v2385_v7 = vld [vmem:[%s4805_s1 + $0x58] sm:$0xff]  ;;  %v2382_v9 = vld [vmem:[%s4805_s1 + $0x40] sm:$0xff] }
   0x4   :  { %101 = vmatpush.msra.mxu0 %v2386_v2  ;;  %136 = vmatpush.msra.mxu1 %v2387_v4  ;;  %v41_v8 = vld [vmem:[%s4805_s1 + $0x10] sm:$0xff]  ;;  %v2383_v10 = vld [vmem:[%s4805_s1 + $0x48] sm:$0xff]  ;;  %v46_v11 = vld [vmem:[%s4805_s1 + $0x38] sm:$0xf] }
   0x5   :  { %195 = vmatpush.msra.mxu2 %v43_v5  ;;  %v39_v12 = vld [vmem:[%s4805_s1] sm:$0xff]  ;;  %2808 = vmatpush.msk.msra.mxu3 %vm81_vm0, %v46_v11  ;;  %v44_v15 = vld [vmem:[%s4805_s1 + $0x28] sm:$0xff]  ;;  %v42_v16 = vld [vmem:[%s4805_s1 + $0x18] sm:$0xff] }
   0x6   :  { %102 = vmatpush.msra.mxu0 %v2384_v6  ;;  %137 = vmatpush.msra.mxu1 %v2385_v7  ;;  %v47_v13 = vld [vmem:[%s4804_s0 + $0x1] sm:$0xff] }
   0x7   :  { %196 = vmatpush.msra.mxu2 %v41_v8  ;;  %v2948_v14 = vld [vmem:[%s4804_s0] sm:$0xff]  ;;  %2809 = vmatpush.msra.mxu3 %v44_v15 }
   0x8   :  { %103 = vmatpush.msra.mxu0 %v2382_v9  ;;  %138 = vmatpush.msra.mxu1 %v2383_v10 }
   0x9   :  { %197 = vmatpush.msra.mxu2 %v39_v12  ;;  %2391 = vmatmul.msk.f32.vlgmr.msra.gmra.mxu0 %vm62_vm1, %v47_v13 }
   0xa   :  { %2398 = vmatmul.msk.f32.vlgmr.msra.gmra.mxu1 %vm62_vm1, %v47_v13  ;;  %2405 = vmatmul.msk.f32.vlgmr.msra.gmra.mxu2 %vm62_vm1, %v2948_v14 }
   0xb   :  { %2411 = vmatpush.msk.msrb.mxu0 %vm81_vm0, %v46_v11 }
   0xc   :  { %14 = vsyncpa [#allocation5], 0  ;;  %v40_v17 = vld [vmem:[%s4805_s1 + $0x8] sm:$0xff]  ;;  %2810 = vmatpush.msra.mxu3 %v42_v16  ;;  %v35_v18 = vld [vmem:[%s4804_s0 + $0x10] sm:$0xff]  ;;  %s2847_s23 = smov 118   ;;  %vm712_vm2 = vcmask 1046528  }
   0xd   :  { %230 = vmatpush.msrb.mxu0 %v44_v15  ;;  %v48_v19 = vld [vmem:[%s4804_s0 + $0x9] sm:$0xff]  ;;  %v2447_v20 = vld [vmem:[%s4805_s1 + $0xf8] sm:$0xf]  ;;  %v36_v28 = vld [vmem:[%s4804_s0 + $0x20] sm:$0xff]  ;;  %vm669_vm3 = vcmask 965632   ;;  %vm767_vm4 = vcmask 1040384  }
   0xe   :  { %v2977_v21 = vld [vmem:[%s4804_s0 + $0x8] sm:$0xff]  ;;  %2811 = vmatpush.msra.mxu3 %v40_v17  ;;  %v2425_v23 = vld [vmem:[%s4805_s1 + $0xb8] sm:$0xf]  ;;  %v2446_v31 = vld [vmem:[%s4805_s1 + $0xf0] sm:$0xf]  ;;  %vm1112_vm6 = vcmask 1045504  }
   0xf   :  { %231 = vmatpush.msrb.mxu0 %v42_v16  ;;  %2414 = vmatmul.msk.f32.vlgmr.msra.gmra.mxu3 %vm62_vm1, %v35_v18  ;;  %v2445_v22 = vld [vmem:[%s4805_s1 + $0xe8] sm:$0xff]  ;;  %v2443_v24 = vld [vmem:[%s4805_s1 + $0xd8] sm:$0xff]  ;;  %v2444_v32 = vld [vmem:[%s4805_s1 + $0xe0] sm:$0xff]  ;;  %vm1107_vm7 = vcmask 834560   ;;  %vm1526_vm8 = vcmask 1044480   ;;  %s2848_s28 = smov 108  }
  0x10   :  { %2455 = vmatpush.msk.msrb.mxu3 %vm81_vm0, %v2447_v20  ;;  %v2423_v25 = vld [vmem:[%s4805_s1 + $0xa8] sm:$0xff]  ;;  %2433 = vmatpush.msk.msrb.mxu1 %vm81_vm0, %v2425_v23  ;;  %v2421_v27 = vld [vmem:[%s4805_s1 + $0x98] sm:$0xff]  ;;  %v2424_v35 = vld [vmem:[%s4805_s1 + $0xb0] sm:$0xf]  ;;  %vm1923_vm9 = vcmask 883712   ;;  %vm2057_vm11 = vcmask 97280  }
  0x11   :  { %2392 = vmatmul.msk.f32.gmra.mxu0 %vm62_vm1, %v48_v19  ;;  %v2441_v26 = vld [vmem:[%s4805_s1 + $0xc8] sm:$0xff]  ;;  %v49_v29 = vld [vmem:[%s4804_s0 + $0x11] sm:$0xff]  ;;  %2448 = vmatpush.msk.msrb.mxu2 %vm81_vm0, %v2446_v31  ;;  %v2422_v37 = vld [vmem:[%s4805_s1 + $0xa0] sm:$0xff]  ;;  %vm2352_vm12 = vcmask 1041408  }
  0x12   :  { %2399 = vmatmul.msk.f32.gmra.mxu1 %vm62_vm1, %v48_v19  ;;  %2406 = vmatmul.msk.f32.gmra.mxu2 %vm62_vm1, %v2977_v21  ;;  %v2419_v30 = vld [vmem:[%s4805_s1 + $0x88] sm:$0xff]  ;;  %v2442_v36 = vld [vmem:[%s4805_s1 + $0xd0] sm:$0xff]  ;;  %v2440_v38 = vld [vmem:[%s4805_s1 + $0xc0] sm:$0xff] }
  0x13   :  { %460 = vmatpush.msrb.mxu3 %v2445_v22  ;;  %232 = vmatpush.msrb.mxu0 %v40_v17  ;;  %v37_v33 = vld [vmem:[%s4804_s0 + $0x28] sm:$0xff]  ;;  %v2420_v39 = vld [vmem:[%s4805_s1 + $0x90] sm:$0xff]  ;;  %v2418_v42 = vld [vmem:[%s4805_s1 + $0x80] sm:$0xff] }
  0x14   :  { %339 = vmatpush.msrb.mxu1 %v2423_v25  ;;  %425 = vmatpush.msrb.mxu2 %v2444_v32  ;;  %v50_v34 = vld [vmem:[%s4804_s0 + $0x21] sm:$0xff]  ;;  %v38_v40 = vld [vmem:[%s4804_s0 + $0x30] sm:$0xff]  ;;  %v2469_v49 = vld [vmem:[%s4805_s1 + $0x138] sm:$0xf] }
  0x15   :  { %461 = vmatpush.msrb.mxu3 %v2443_v24  ;;  %2426 = vmatpush.msk.msra.mxu0 %vm81_vm0, %v2424_v35  ;;  %v51_v41 = vld [vmem:[%s4804_s0 + $0x29] sm:$0xff]  ;;  %v52_v44 = vld [vmem:[%s4804_s0 + $0x31] sm:$0xff]  ;;  %v2466_v58 = vld [vmem:[%s4805_s1 + $0x120] sm:$0xff] }
  0x16   :  { %340 = vmatpush.msrb.mxu1 %v2421_v27  ;;  %426 = vmatpush.msrb.mxu2 %v2442_v36  ;;  %v373_v43 = vld [vmem:[%s4804_s0 + $0x3] sm:$0xff]  ;;  %v374_v45 = vld [vmem:[%s4804_s0 + $0xb] sm:$0xff]  ;;  %v375_v47 = vld [vmem:[%s4804_s0 + $0x13] sm:$0xff] }
  0x17   :  { %462 = vmatpush.msrb.mxu3 %v2441_v26  ;;  %304 = vmatpush.msra.mxu0 %v2422_v37  ;;  %v252_v46 = vld [vmem:[%s4804_s0 + $0x2] sm:$0xff]  ;;  %v253_v48 = vld [vmem:[%s4804_s0 + $0xa] sm:$0xff]  ;;  %v2465_v51 = vld [vmem:[%s4805_s1 + $0x118] sm:$0xff] }
  0x18   :  { %2415 = vmatmul.msk.f32.gmra.mxu3 %vm62_vm1, %v36_v28  ;;  %341 = vmatpush.msrb.mxu1 %v2419_v30  ;;  %v2467_v50 = vld [vmem:[%s4805_s1 + $0x128] sm:$0xff]  ;;  %v254_v54 = vld [vmem:[%s4804_s0 + $0x12] sm:$0xff]  ;;  %v2462_v60 = vld [vmem:[%s4805_s1 + $0x100] sm:$0xff] }
  0x19   :  { %2393 = vmatmul.msk.f32.gmra.mxu0 %vm62_vm1, %v49_v29  ;;  %427 = vmatpush.msrb.mxu2 %v2440_v38  ;;  %v376_v52 = vld [vmem:[%s4804_s0 + $0x23] sm:$0xff]  ;;  %v2468_v55 = vld [vmem:[%s4805_s1 + $0x130] sm:$0xf]  ;;  %v496_v2 = vld [vmem:[%s4804_s0 + $0x14] sm:$0xff] }
  0x1a   :  { %2400 = vmatmul.msk.f32.gmra.mxu1 %vm62_vm1, %v49_v29  ;;  %2407 = vmatmul.msk.f32.gmra.mxu2 %vm62_vm1, %v35_v18  ;;  %v2463_v53 = vld [vmem:[%s4805_s1 + $0x108] sm:$0xff]  ;;  %v2464_v59 = vld [vmem:[%s4805_s1 + $0x110] sm:$0xff] }
  0x1b   :  { %305 = vmatpush.msra.mxu0 %v2420_v39  ;;  %2477 = vmatpush.msk.msra.mxu1 %vm81_vm0, %v2469_v49  ;;  %v377_v56 = vld [vmem:[%s4804_s0 + $0x2b] sm:$0xff]  ;;  %v255_v57 = vld [vmem:[%s4804_s0 + $0x22] sm:$0xff]  ;;  %v378_v61 = vld [vmem:[%s4804_s0 + $0x33] sm:$0xff] }
  0x1c   :  { %v256_v62 = vld [vmem:[%s4804_s0 + $0x2a] sm:$0xff]  ;;  %v257_v63 = vld [vmem:[%s4804_s0 + $0x32] sm:$0xff] }
  0x1d   :  { %306 = vmatpush.msra.mxu0 %v2418_v42  ;;  %581 = vmatpush.msra.mxu1 %v2467_v50  ;;  %v494_v0 = vld [vmem:[%s4804_s0 + $0x4] sm:$0xff]  ;;  %v495_v1 = vld [vmem:[%s4804_s0 + $0xc] sm:$0xff]  ;;  %v499_v9 = vld [vmem:[%s4804_s0 + $0x34] sm:$0xff] }
  0x1e   :  { %v497_v3 = vld [vmem:[%s4804_s0 + $0x24] sm:$0xff]  ;;  %v498_v6 = vld [vmem:[%s4804_s0 + $0x2c] sm:$0xff] }
  0x1f   :  { %582 = vmatpush.msra.mxu1 %v2465_v51 }
  0x20   :  { %2416 = vmatmul.msk.f32.gmra.mxu3 %vm62_vm1, %v37_v33 }
  0x21   :  { %2394 = vmatmul.msk.f32.gmra.mxu0 %vm62_vm1, %v50_v34  ;;  %583 = vmatpush.msra.mxu1 %v2463_v53 }
  0x22   :  { %2401 = vmatmul.msk.f32.gmra.mxu1 %vm62_vm1, %v50_v34  ;;  %2408 = vmatmul.msk.f32.gmra.mxu2 %vm62_vm1, %v36_v28 }
  0x28   :  { %2417 = vmatmul.msk.f32.gmra.mxu3 %vm62_vm1, %v38_v40 }
  0x29   :  { %2395 = vmatmul.msk.f32.gmra.mxu0 %vm62_vm1, %v51_v41 }
  0x2a   :  { %2402 = vmatmul.msk.f32.gmra.mxu1 %vm62_vm1, %v51_v41  ;;  %2409 = vmatmul.msk.f32.gmra.mxu2 %vm62_vm1, %v37_v33 }
  0x30   :  { %2456 = vmatmul.msk.f32.vlgmr.msrb.gmra.mxu3 %vm62_vm1, %v373_v43 }
  0x31   :  { %2396 = vmatmul.msk.f32.gmra.mxu0 %vm62_vm1, %v52_v44 }
  0x32   :  { %2403 = vmatmul.msk.f32.gmra.mxu1 %vm62_vm1, %v52_v44  ;;  %2410 = vmatmul.msk.f32.gmra.mxu2 %vm62_vm1, %v38_v40 }
  0x38   :  { %2457 = vmatmul.msk.f32.gmra.mxu3 %vm62_vm1, %v374_v45 }
  0x39   :  { %2412 = vmatmul.msk.f32.vlgmr.msrb.gmra.mxu0 %vm62_vm1, %v2948_v14 }
  0x3a   :  { %2434 = vmatmul.msk.f32.vlgmr.msrb.gmra.mxu1 %vm62_vm1, %v252_v46  ;;  %2449 = vmatmul.msk.f32.vlgmr.msrb.gmra.mxu2 %vm62_vm1, %v373_v43 }
  0x3b   :  { %2470 = vmatpush.msk.msrb.mxu0 %vm81_vm0, %v2468_v55 }
  0x3d   :  { %546 = vmatpush.msrb.mxu0 %v2466_v58 }
  0x3f   :  { %547 = vmatpush.msrb.mxu0 %v2464_v59 }
  0x40   :  { %2458 = vmatmul.msk.f32.gmra.mxu3 %vm62_vm1, %v375_v47 }
  0x41   :  { %2413 = vmatmul.msk.f32.gmra.mxu0 %vm62_vm1, %v2977_v21 }
  0x42   :  { %2435 = vmatmul.msk.f32.gmra.mxu1 %vm62_vm1, %v253_v48  ;;  %2450 = vmatmul.msk.f32.gmra.mxu2 %vm62_vm1, %v374_v45 }
  0x43   :  { %548 = vmatpush.msrb.mxu0 %v2462_v60 }
  0x48   :  { %2459 = vmatmul.msk.f32.gmra.mxu3 %vm62_vm1, %v376_v52 }
  0x49   :  { %2427 = vmatmul.msk.f32.vlgmr.msra.gmra.mxu0 %vm62_vm1, %v252_v46 }
  0x4a   :  { %2436 = vmatmul.msk.f32.gmra.mxu1 %vm62_vm1, %v254_v54  ;;  %2451 = vmatmul.msk.f32.gmra.mxu2 %vm62_vm1, %v375_v47 }
  0x50   :  { %2460 = vmatmul.msk.f32.gmra.mxu3 %vm62_vm1, %v377_v56 }
  0x51   :  { %2428 = vmatmul.msk.f32.gmra.mxu0 %vm62_vm1, %v253_v48 }
  0x52   :  { %2437 = vmatmul.msk.f32.gmra.mxu1 %vm62_vm1, %v255_v57  ;;  %2452 = vmatmul.msk.f32.gmra.mxu2 %vm62_vm1, %v376_v52  ;;  %v615_v52 = vld [vmem:[%s4806_s2] sm:$0x3] }
  0x58   :  { %2461 = vmatmul.msk.f32.gmra.mxu3 %vm62_vm1, %v378_v61 }
  0x59   :  { %2429 = vmatmul.msk.f32.gmra.mxu0 %vm62_vm1, %v254_v54 }
  0x5a   :  { %2438 = vmatmul.msk.f32.gmra.mxu1 %vm62_vm1, %v256_v62  ;;  %2453 = vmatmul.msk.f32.gmra.mxu2 %vm62_vm1, %v377_v56  ;;  %v3218_v56 = vperm.slane %v615_v52, 1 }
  0x61   :  { %2430 = vmatmul.msk.f32.gmra.mxu0 %vm62_vm1, %v255_v57 }
  0x62   :  { %2439 = vmatmul.msk.f32.gmra.mxu1 %vm62_vm1, %v257_v63  ;;  %2454 = vmatmul.msk.f32.gmra.mxu2 %vm62_vm1, %v378_v61 }
  0x69   :  { %2431 = vmatmul.msk.f32.gmra.mxu0 %vm62_vm1, %v256_v62 }
  0x6a   :  { %2478 = vmatmul.msk.f32.vlgmr.msra.gmra.mxu1 %vm62_vm1, %v494_v0 }
  0x71   :  { %2432 = vmatmul.msk.f32.gmra.mxu0 %vm62_vm1, %v257_v63 }
  0x72   :  { %2479 = vmatmul.msk.f32.gmra.mxu1 %vm62_vm1, %v495_v1 }
  0x79   :  { %2471 = vmatmul.msk.f32.vlgmr.msrb.gmra.mxu0 %vm62_vm1, %v494_v0 }
  0x7a   :  { %2480 = vmatmul.msk.f32.gmra.mxu1 %vm62_vm1, %v496_v2 }
  0x81   :  { %2472 = vmatmul.msk.f32.gmra.mxu0 %vm62_vm1, %v495_v1 }
  0x82   :  { %2481 = vmatmul.msk.f32.gmra.mxu1 %vm62_vm1, %v497_v3 }
  0x86   :  { %v3177_v4 = vpop.f32.mrf.mxu0 }
  0x87   :  { %v140_v5 = vpop.f32.mrf.mxu1 }
  0x89   :  { %2473 = vmatmul.msk.f32.gmra.mxu0 %vm62_vm1, %v496_v2 }
  0x8a   :  { %2482 = vmatmul.msk.f32.gmra.mxu1 %vm62_vm1, %v498_v6 }
  0x8d   :  { %v199_v19 = vpop.f32.mrf.mxu2 }
  0x8e   :  { %v3184_v7 = vpop.f32.mrf.mxu0  ;;  %v200_v1 = vadd.f32 %v199_v19, %v3177_v4 }
  0x8f   :  { %v143_v8 = vpop.f32.mrf.mxu1 }
  0x91   :  { %2474 = vmatmul.msk.f32.gmra.mxu0 %vm62_vm1, %v497_v3 }
  0x92   :  { %2483 = vmatmul.msk.f32.gmra.mxu1 %vm62_vm1, %v499_v9  ;;  %v240_v10 = vpop.f32.mrf.mxu3 }
  0x95   :  { %v202_v26 = vpop.f32.mrf.mxu2 }
  0x96   :  { %v111_v11 = vpop.f32.mrf.mxu0 }
  0x97   :  { %v146_v12 = vpop.f32.mrf.mxu1 }
  0x98   :  { %v241_v30 = vadd.f32 %v240_v10, %v146_v12  ;;  %v617_v10 = vperm.slane %v615_v52, 0  ;;  %v203_v12 = vadd.f32 %v202_v26, %v3184_v7 }
  0x99   :  { %2475 = vmatmul.msk.f32.gmra.mxu0 %vm62_vm1, %v498_v6 }
  0x9b   :  { %v243_v13 = vpop.f32.mrf.mxu3 }
  0x9d   :  { %v205_v29 = vpop.f32.mrf.mxu2 }
  0x9e   :  { %v3192_v14 = vpop.f32.mrf.mxu0  ;;  %v206_v39 = vadd.f32 %v205_v29, %v111_v11 }
  0x9f   :  { %v149_v15 = vpop.f32.mrf.mxu1 }
  0xa0   :  { %v244_v35 = vadd.f32 %v243_v13, %v149_v15 }
  0xa1   :  { %2476 = vmatmul.msk.f32.gmra.mxu0 %vm62_vm1, %v499_v9 }
  0xa3   :  { %v3195_v16 = vpop.f32.mrf.mxu3 }
  0xa5   :  { %v3205_v34 = vpop.f32.mrf.mxu2 }
  0xa6   :  { %v3197_v17 = vpop.f32.mrf.mxu0 }
  0xa7   :  { %v3199_v18 = vpop.f32.mrf.mxu1 }
  0xab   :  { %v249_v22 = vpop.f32.mrf.mxu3 }
  0xad   :  { %v3209_v40 = vpop.f32.mrf.mxu2 }
  0xae   :  { %v3201_v20 = vpop.f32.mrf.mxu0 }
  0xaf   :  { %v155_v21 = vpop.f32.mrf.mxu1 }
  0xb0   :  { %v250_v23 = vadd.f32 %v249_v22, %v155_v21 }
  0xb3   :  { %v464_v44 = vpop.f32.mrf.mxu3 }
  0xb5   :  { %v3213_v48 = vpop.f32.mrf.mxu2 }
  0xb6   :  { %v234_v24 = vpop.f32.mrf.mxu0 }
  0xb7   :  { %v343_v25 = vpop.f32.mrf.mxu1  ;;  %v235_v45 = vadd.f32 %v234_v24, %v140_v5 }
  0xb9   :  { %v362_v50 = vadd.f32 %v343_v25, %v235_v45  ;;  %v212_v45 = vadd.f32 %v3209_v40, %v3197_v17  ;;  %v215_v17 = vadd.f32 %v3213_v48, %v3201_v20 }
  0xbb   :  { %v467_v51 = vpop.f32.mrf.mxu3  ;;  %v483_v53 = vadd.f32 %v464_v44, %v362_v50 }
  0xbd   :  { %v429_v58 = vpop.f32.mrf.mxu2 }
  0xbe   :  { %v237_v27 = vpop.f32.mrf.mxu0 }
  0xbf   :  { %v346_v28 = vpop.f32.mrf.mxu1  ;;  %v238_v54 = vadd.f32 %v237_v27, %v143_v8 }
  0xc1   :  { %v364_v60 = vadd.f32 %v346_v28, %v238_v54  ;;  %v247_v28 = vadd.f32 %v3195_v16, %v3199_v18 }
  0xc3   :  { %v3225_v62 = vpop.f32.mrf.mxu3  ;;  %v485_v63 = vadd.f32 %v467_v51, %v364_v60 }
  0xc5   :  { %v432_v6 = vpop.f32.mrf.mxu2 }
  0xc6   :  { %v308_v31 = vpop.f32.mrf.mxu0 }
  0xc7   :  { %v349_v32 = vpop.f32.mrf.mxu1  ;;  %v361_v5 = vadd.f32 %v308_v31, %v200_v1 }
  0xc8   :  { %v3203_v33 = vadd.f32 %v349_v32, %v241_v30 }
  0xc9   :  { %v482_v9 = vadd.f32 %v429_v58, %v361_v5 }
  0xcb   :  { %v473_v13 = vpop.f32.mrf.mxu3 }
  0xcd   :  { %v435_v19 = vpop.f32.mrf.mxu2 }
  0xce   :  { %v311_v36 = vpop.f32.mrf.mxu0 }
  0xcf   :  { %v352_v37 = vpop.f32.mrf.mxu1  ;;  %v363_v22 = vadd.f32 %v311_v36, %v203_v12 }
  0xd0   :  { %v3207_v38 = vadd.f32 %v352_v37, %v244_v35  ;;  %v209_v35 = vadd.f32 %v3205_v34, %v3192_v14 }
  0xd3   :  { %v476_v29 = vpop.f32.mrf.mxu3 }
  0xd5   :  { %v438_v31 = vpop.f32.mrf.mxu2 }
  0xd6   :  { %v314_v41 = vpop.f32.mrf.mxu0 }
  0xd7   :  { %v3211_v42 = vadd.f32 %v314_v41, %v206_v39  ;;  %v355_v43 = vpop.f32.mrf.mxu1 }
  0xd8   :  { %v370_v7 = vadd.f32 %v355_v43, %v247_v28  ;;  %v772_v28 = vlaneseq }
  0xda   :  { %v491_v26 = vadd.f32 %v476_v29, %v370_v7  ;;  %vm3308_vm5 = vcmp.lt.s32.totalorder %v772_v28, 230  ;;  %vm4572_vm10 = vcmp.lt.s32.totalorder %v772_v28, 140 }
  0xdb   :  { %v479_v16 = vpop.f32.mrf.mxu3 }
  0xdd   :  { %v441_v51 = vpop.f32.mrf.mxu2 }
  0xde   :  { %v317_v46 = vpop.f32.mrf.mxu0 }
  0xdf   :  { %v358_v47 = vpop.f32.mrf.mxu1  ;;  %v367_v39 = vadd.f32 %v317_v46, %v209_v35 }
  0xe0   :  { %v372_v49 = vadd.f32 %v358_v47, %v250_v23  ;;  %v484_v23 = vadd.f32 %v432_v6, %v363_v22 }
  0xe1   :  { %v488_v18 = vadd.f32 %v438_v31, %v367_v39 }
  0xe2   :  { %v493_v43 = vadd.f32 %v479_v16, %v372_v49 }
  0xe5   :  { %v444_v60 = vpop.f32.mrf.mxu2 }
  0xe6   :  { %v320_v55 = vpop.f32.mrf.mxu0 }
  0xe7   :  { %v585_v57 = vpop.f32.mrf.mxu1  ;;  %v369_v34 = vadd.f32 %v320_v55, %v212_v45 }
  0xe8   :  { %v604_v59 = vadd.f32 %v585_v57, %v483_v53  ;;  %v489_v53 = vadd.f32 %v473_v13, %v3207_v38  ;;  %v487_v38 = vadd.f32 %v3225_v62, %v3203_v33 }
  0xe9   :  { %v490_v49 = vadd.f32 %v441_v51, %v369_v34 }
  0xea   :  { %v3221_v61 = vadd.f32 %v3218_v56, %v604_v59 }
  0xec   :  { %647 = vrot.lane.b32.xlu0 %v3221_v61, %s2847_s23 }
  0xee   :  { %v323_v0 = vpop.f32.mrf.mxu0 }
  0xef   :  { %v588_v2 = vpop.f32.mrf.mxu1  ;;  %v371_v58 = vadd.f32 %v323_v0, %v215_v17 }
  0xf0   :  { %v606_v3 = vadd.f32 %v588_v2, %v485_v63  ;;  %v486_v63 = vadd.f32 %v435_v19, %v3211_v42 }
  0xf1   :  { %v492_v1 = vadd.f32 %v444_v60, %v371_v58 }
  0xf2   :  { %v3229_v8 = vadd.f32 %v3218_v56, %v606_v3 }
  0xf4   :  { %651 = vrot.lane.b32.xlu1 %v3229_v8, %s2847_s23 }
  0xf6   :  { %v550_v11 = vpop.f32.mrf.mxu0 }
  0xf7   :  { %v603_v15 = vadd.f32 %v550_v11, %v482_v9  ;;  %v591_v21 = vpop.f32.mrf.mxu1 }
  0xf8   :  { %v608_v20 = vadd.f32 %v591_v21, %v487_v38 }
  0xf9   :  { %v3234_v4 = vadd.f32 %v617_v10, %v603_v15 }
  0xfa   :  { %v3277_v6 = vadd.f32 %v3218_v56, %v608_v20 }
  0xfb   :  { %645 = vrot.lane.b32.xlu0 %v3234_v4, %s2847_s23 }
  0xfe   :  { %v553_v24 = vpop.f32.mrf.mxu0 }
  0xff   :  { %v605_v25 = vadd.f32 %v553_v24, %v484_v23  ;;  %v594_v27 = vpop.f32.mrf.mxu1 }
 0x100   :  { %v610_v54 = vadd.f32 %v594_v27, %v489_v53 }
 0x101   :  { %v3240_v30 = vadd.f32 %v617_v10, %v605_v25 }
 0x102   :  { %v628_v55 = vadd.f32 %v3218_v56, %v610_v54 }
 0x103   :  { %649 = vrot.lane.b32.xlu1 %v3240_v30, %s2847_s23 }
 0x106   :  { %v556_v32 = vpop.f32.mrf.mxu0 }
 0x107   :  { %v597_v36 = vpop.f32.mrf.mxu1  ;;  %v607_v2 = vadd.f32 %v556_v32, %v486_v63 }
 0x108   :  { %v612_v37 = vadd.f32 %v597_v36, %v491_v26 }
 0x109   :  { %v3272_v3 = vadd.f32 %v617_v10, %v607_v2 }
 0x10a   :  { %v3247_v41 = vadd.f32 %v3218_v56, %v612_v37 }
 0x10c   :  { %663 = vrot.lane.b32.xlu1 %v3247_v41, %s2847_s23 }
 0x10e   :  { %v559_v44 = vpop.f32.mrf.mxu0 }
 0x10f   :  { %v609_v47 = vadd.f32 %v559_v44, %v488_v18  ;;  %v600_v50 = vpop.f32.mrf.mxu1 }
 0x110   :  { %v614_v14 = vadd.f32 %v600_v50, %v493_v43 }
 0x111   :  { %v3253_v52 = vadd.f32 %v617_v10, %v609_v47 }
 0x112   :  { %v3256_v46 = vadd.f32 %v3218_v56, %v614_v14 }
 0x113   :  { %657 = vrot.lane.b32.xlu2 %v3253_v52, %s2847_s23 }
 0x116   :  { %v562_v57 = vpop.f32.mrf.mxu0 }
 0x117   :  { %v611_v40 = vadd.f32 %v562_v57, %v490_v49 }
 0x119   :  { %v3264_v59 = vadd.f32 %v617_v10, %v611_v40 }
 0x11b   :  { %659 = vrot.lane.b32.xlu2 %v628_v55, %s2847_s23  ;;  %661 = vrot.lane.b32.xlu0 %v3264_v59, %s2847_s23 }
 0x11e   :  { %v565_v48 = vpop.f32.mrf.mxu0 }
 0x11f   :  { %v613_v0 = vadd.f32 %v565_v48, %v492_v1 }
 0x121   :  { %v3274_v5 = vadd.f32 %v617_v10, %v613_v0 }
 0x123   :  { %653 = vrot.lane.b32.xlu2 %v3272_v3, %s2847_s23  ;;  %665 = vrot.lane.b32.xlu1 %v3274_v5, %s2847_s23 }
 0x124   :  { %655 = vrot.lane.b32.xlu0 %v3277_v6, %s2847_s23 }
 0x12b   :  { %667 = vrot.lane.b32.xlu2 %v3256_v46, %s2847_s23 }
 0x15e   :  { %v648_v33 = vpop.permute.xlu0 %647 }
 0x15f   :  { %v689_v42 = vmax.f32 %v3221_v61, %v648_v33 }
 0x161   :  { %v716_v56 = vrot.slane %v689_v42, 1 }
 0x166   :  { %v652_v62 = vpop.permute.xlu1 %651 }
 0x167   :  { %v3289_v9 = vmax.f32 %v3229_v8, %v652_v62 }
 0x169   :  { %v717_v10 = vrot.slane %v3289_v9, 1 }
 0x16b   :  { %v718_v11 = vsel %vm712_vm2, %v716_v56, %v717_v10 }
 0x16c   :  { %v746_v12 = vmax.f32 %v689_v42, %v718_v11 }
 0x16d   :  { %v658_v13 = vpop.permute.xlu2 %657  ;;  %v646_v21 = vpop.permute.xlu0 %645 }
 0x16e   :  { %v3295_v15 = vmax.f32 %v746_v12, 0.0  ;;  %v670_v61 = vsel %vm669_vm3, %v646_v21, %v648_v33 }
 0x16f   :  { %v688_v8 = vmax.f32 %v3234_v4, %v670_v61  ;;  %v2597_v4 = vld [vmem:[%s4807_s3 + $0x4f8] sm:$0xff] }
 0x170   :  { %782 = vst [vmem:[#allocation1 + $0x9] sm:$0xff] %v3295_v15  ;;  %v765_v31 = vrot.slane %v3295_v15, 7 }
 0x171   :  { %v713_v25 = vrot.slane %v688_v8, 1 }
 0x175   :  { %v660_v22 = vpop.permute.xlu2 %659  ;;  %v650_v19 = vpop.permute.xlu1 %649 }
 0x176   :  { %v671_v23 = vsel %vm669_vm3, %v650_v19, %v652_v62  ;;  %v695_v26 = vmax.f32 %v628_v55, %v660_v22  ;;  %v673_v47 = vsel %vm669_vm3, %v658_v13, %v660_v22 }
 0x177   :  { %v3302_v24 = vmax.f32 %v3240_v30, %v671_v23  ;;  %v694_v51 = vmax.f32 %v3253_v52, %v673_v47  ;;  %v2510_v47 = vld [vmem:[%s4807_s3 + $0x2a0] sm:$0xff] }
 0x178   :  { %v726_v39 = vrot.slane %v695_v26, 1 }
 0x179   :  { %v714_v27 = vrot.slane %v3302_v24, 1  ;;  %v723_v54 = vrot.slane %v694_v51, 1 }
 0x17b   :  { %v715_v29 = vsel %vm712_vm2, %v713_v25, %v714_v27 }
 0x17c   :  { %v745_v7 = vmax.f32 %v688_v8, %v715_v29 }
 0x17d   :  { %v654_v30 = vpop.permute.xlu2 %653 }
 0x17e   :  { %v3312_v32 = vmax.f32 %v745_v7, 0.0  ;;  %v664_v35 = vpop.permute.xlu1 %663 }
 0x17f   :  { %v697_v36 = vmax.f32 %v3247_v41, %v664_v35 }
 0x180   :  { %v768_v37 = vsel %vm767_vm4, %v3312_v32, %v765_v31  ;;  %781 = vst [vmem:[#allocation1] sm:$0xff] %v3312_v32 }
 0x181   :  { %776 = vst.msk [vmem:[#allocation2] ss:$8 sm:$0x3] %vm3308_vm5, %v768_v37  ;;  %v727_v16 = vrot.slane %v697_v36, 1 }
 0x183   :  { %v728_v18 = vsel %vm712_vm2, %v726_v39, %v727_v16  ;;  %v988_v39 = vld [vmem:[%s4807_s3 + $0xe0] sm:$0xff] }
 0x184   :  { %v752_v43 = vmax.f32 %v695_v26, %v728_v18  ;;  %v2514_v18 = vld [vmem:[%s4807_s3 + $0x2c0] sm:$0xff] }
 0x185   :  { %v668_v41 = vpop.permute.xlu2 %667  ;;  %1119 = vmatpush.msra.mxu2 %v2514_v18  ;;  %v2522_v18 = vld [vmem:[%s4807_s3 + $0x300] sm:$0xff] }
 0x186   :  { %v3321_v44 = vmax.f32 %v752_v43, 0.0  ;;  %v699_v50 = vmax.f32 %v3256_v46, %v668_v41  ;;  %v986_v43 = vld [vmem:[%s4807_s3 + $0xd0] sm:$0xff] }
 0x187   :  { %v784_v45 = vld [vmem:[#allocation1 + $0x2] ss:$9 sm:$0xff] }
 0x188   :  { %791 = vst.msk [vmem:[#allocation2 + $0x1] ss:$8 sm:$0x3] %vm3308_vm5, %v784_v45  ;;  %v731_v53 = vrot.slane %v699_v50, 1  ;;  %v766_v55 = vrot.slane %v3321_v44, 7  ;;  %v2512_v45 = vld [vmem:[%s4807_s3 + $0x2b0] sm:$0xff] }
 0x189   :  { %786 = vst [vmem:[#allocation1 + $0x9] sm:$0xff] %v3321_v44  ;;  %1120 = vmatpush.msra.mxu2 %v2512_v45  ;;  %v2515_v45 = vld [vmem:[%s4807_s3 + $0x2c8] sm:$0xff] }
 0x18a   :  { %v732_v17 = vsel %vm712_vm2, %v727_v16, %v731_v53  ;;  %v756_v46 = vmax.f32 %v699_v50, %v731_v53  ;;  %v2506_v53 = vld [vmem:[%s4807_s3 + $0x280] sm:$0xff] }
 0x18b   :  { %v754_v63 = vmax.f32 %v697_v36, %v732_v17  ;;  %1121 = vmatpush.msra.mxu2 %v2510_v47  ;;  %v976_v17 = vld [vmem:[%s4807_s3 + $0x80] sm:$0xff] }
 0x18c   :  { %v3348_v56 = vmax.f32 %v756_v46, 0.0 }
 0x18d   :  { %v662_v14 = vpop.permute.xlu0 %661  ;;  %v3346_v62 = vmax.f32 %v754_v63, 0.0  ;;  %v1012_v63 = vld [vmem:[%s4807_s3 + $0x1a0] sm:$0xff] }
 0x18e   :  { %v674_v34 = vsel %vm669_vm3, %v662_v14, %v664_v35  ;;  %v990_v35 = vld [vmem:[%s4807_s3 + $0xf0] sm:$0xff] }
 0x18f   :  { %v696_v49 = vmax.f32 %v3264_v59, %v674_v34  ;;  %v835_v25 = vrot.slane %v3346_v62, 7  ;;  %1223 = vmatpush.msra.mxu0 %v990_v35  ;;  %v2508_v14 = vld [vmem:[%s4807_s3 + $0x290] sm:$0xff]  ;;  %v980_v34 = vld [vmem:[%s4807_s3 + $0xa0] sm:$0xff] }
 0x190   :  { %1122 = vmatpush.msra.mxu2 %v2508_v14  ;;  %v2486_v35 = vld [vmem:[%s4807_s3 + $0x1e0] sm:$0xff]  ;;  %v2513_v14 = vld [vmem:[%s4807_s3 + $0x2b8] sm:$0xff] }
 0x191   :  { %v724_v57 = vrot.slane %v696_v49, 1  ;;  %1224 = vmatpush.msra.mxu0 %v988_v39  ;;  %v996_v39 = vld [vmem:[%s4807_s3 + $0x120] sm:$0xff] }
 0x192   :  { %1123 = vmatpush.msra.mxu2 %v2506_v53  ;;  %v2518_v53 = vld [vmem:[%s4807_s3 + $0x2e0] sm:$0xff] }
 0x193   :  { %v725_v40 = vsel %vm712_vm2, %v723_v54, %v724_v57  ;;  %1225 = vmatpush.msra.mxu0 %v986_v43  ;;  %v1016_v54 = vld [vmem:[%s4807_s3 + $0x1c0] sm:$0x3f] }
 0x194   :  { %v751_v58 = vmax.f32 %v694_v51, %v725_v40  ;;  %v982_v51 = vld [vmem:[%s4807_s3 + $0xb0] sm:$0xff]  ;;  %2548 = vmatpush.msk.msrb.mxu1 %vm1112_vm6, %v1016_v54  ;;  %v2582_v43 = vld [vmem:[%s4807_s3 + $0x480] sm:$0xff] }
 0x195   :  { %v666_v60 = vpop.permute.xlu1 %665  ;;  %v1014_v40 = vld [vmem:[%s4807_s3 + $0x1b0] sm:$0xff]  ;;  %v2610_v54 = vld [vmem:[%s4807_s3 + $0x560] sm:$0x3f] }
 0x196   :  { %v3334_v38 = vmax.f32 %v751_v58, 0.0  ;;  %v675_v52 = vsel %vm669_vm3, %v666_v60, %v668_v41  ;;  %v656_v1 = vpop.permute.xlu0 %655  ;;  %v984_v41 = vld [vmem:[%s4807_s3 + $0xc0] sm:$0xff]  ;;  %1250 = vmatpush.msrb.mxu1 %v1014_v40  ;;  %v974_v60 = vld [vmem:[%s4807_s3 + $0x70] sm:$0xff] }
 0x197   :  { %v698_v2 = vmax.f32 %v3274_v5, %v675_v52  ;;  %v672_v59 = vsel %vm669_vm3, %v654_v30, %v656_v1  ;;  %v693_v20 = vmax.f32 %v3277_v6, %v656_v1  ;;  %1226 = vmatpush.msra.mxu0 %v984_v41  ;;  %v2502_v58 = vld [vmem:[%s4807_s3 + $0x260] sm:$0xff]  ;;  %v2500_v52 = vld [vmem:[%s4807_s3 + $0x250] sm:$0xff] }
 0x198   :  { %v769_v48 = vsel %vm767_vm4, %v3334_v38, %v766_v55  ;;  %785 = vst [vmem:[#allocation1] sm:$0xff] %v3334_v38  ;;  %v692_v0 = vmax.f32 %v3272_v3, %v672_v59  ;;  %v2540_v55 = vld [vmem:[%s4807_s3 + $0x390] sm:$0x3f]  ;;  %1251 = vmatpush.msrb.mxu1 %v1012_v63  ;;  %v2538_v1 = vld [vmem:[%s4807_s3 + $0x380] sm:$0xff] }
 0x199   :  { %779 = vst.msk [vmem:[#allocation2 + $0x20] ss:$8 sm:$0x3] %vm3308_vm5, %v769_v48  ;;  %v729_v33 = vrot.slane %v698_v2, 1  ;;  %v721_v42 = vrot.slane %v693_v20, 1  ;;  %1227 = vmatpush.msra.mxu0 %v982_v51  ;;  %2542 = vmatpush.msk.msra.mxu3 %vm1112_vm6, %v2540_v55  ;;  %v1010_v59 = vld [vmem:[%s4807_s3 + $0x190] sm:$0xff] }
 0x19a   :  { %v719_v5 = vrot.slane %v692_v0, 1  ;;  %1252 = vmatpush.msrb.mxu1 %v1010_v59  ;;  %v970_v48 = vld [vmem:[%s4807_s3 + $0x50] sm:$0xff]  ;;  %v2509_v55 = vld [vmem:[%s4807_s3 + $0x298] sm:$0xff]  ;;  %v2574_v63 = vld [vmem:[%s4807_s3 + $0x440] sm:$0xff] }
 0x19b   :  { %v730_v11 = vsel %vm712_vm2, %v724_v57, %v729_v33  ;;  %v755_v6 = vmax.f32 %v698_v2, %v729_v33  ;;  %v722_v12 = vsel %vm712_vm2, %v717_v10, %v721_v42  ;;  %v750_v13 = vmax.f32 %v693_v20, %v721_v42  ;;  %1228 = vmatpush.msra.mxu0 %v980_v34  ;;  %v2504_v57 = vld [vmem:[%s4807_s3 + $0x270] sm:$0xff]  ;;  %v972_v2 = vld [vmem:[%s4807_s3 + $0x60] sm:$0xff] }
 0x19c   :  { %v753_v21 = vmax.f32 %v696_v49, %v730_v11  ;;  %v720_v3 = vsel %vm712_vm2, %v714_v27, %v719_v5  ;;  %v748_v61 = vmax.f32 %v3289_v9, %v722_v12  ;;  %v749_v8 = vmax.f32 %v692_v0, %v719_v5  ;;  %v978_v49 = vld [vmem:[%s4807_s3 + $0x90] sm:$0xff]  ;;  %1124 = vmatpush.msra.mxu2 %v2504_v57  ;;  %v2498_v20 = vld [vmem:[%s4807_s3 + $0x240] sm:$0xff]  ;;  %v2511_v57 = vld [vmem:[%s4807_s3 + $0x2a8] sm:$0xff] }
 0x19d   :  { %v3356_v22 = vmax.f32 %v755_v6, 0.0  ;;  %v747_v19 = vmax.f32 %v3302_v24, %v720_v3  ;;  %v3359_v23 = vmax.f32 %v750_v13, 0.0  ;;  %v900_v10 = vrot.slane %v3348_v56, 7  ;;  %1229 = vmatpush.msra.mxu0 %v978_v49  ;;  %1146 = vmatpush.msra.mxu3 %v2538_v1  ;;  %v2496_v0 = vld [vmem:[%s4807_s3 + $0x230] sm:$0xff]  ;;  %v2534_v33 = vld [vmem:[%s4807_s3 + $0x360] sm:$0xff]  ;;  %v2539_v1 = vld [vmem:[%s4807_s3 + $0x388] sm:$0xff] }
 0x19e   :  { %v3362_v29 = vmax.f32 %v753_v21, 0.0  ;;  %v3364_v7 = vmax.f32 %v748_v61, 0.0  ;;  %v3369_v27 = vmax.f32 %v749_v8, 0.0  ;;  %1125 = vmatpush.msra.mxu2 %v2502_v58  ;;  %v968_v42 = vld [vmem:[%s4807_s3 + $0x40] sm:$0xff]  ;;  %v1006_v5 = vld [vmem:[%s4807_s3 + $0x170] sm:$0xff] }
 0x19f   :  { %v787_v26 = vld [vmem:[#allocation1 + $0x2] ss:$9 sm:$0xff]  ;;  %v3367_v31 = vmax.f32 %v747_v19, 0.0  ;;  %v899_v9 = vrot.slane %v3359_v23, 7  ;;  %v902_v36 = vsel %vm767_vm4, %v3356_v22, %v900_v10  ;;  %1230 = vmatpush.msra.mxu0 %v976_v17 }
 0x1a0   :  { %796 = vst [vmem:[#allocation1] sm:$0xff] %v3312_v32  ;;  %v837_v24 = vsel %vm767_vm4, %v3362_v29, %v835_v25  ;;  %v834_v30 = vrot.slane %v3364_v7, 7  ;;  %1126 = vmatpush.msra.mxu2 %v2500_v52  ;;  %v2494_v11 = vld [vmem:[%s4807_s3 + $0x220] sm:$0xff]  ;;  %v2532_v6 = vld [vmem:[%s4807_s3 + $0x350] sm:$0xff]  ;;  %v2507_v52 = vld [vmem:[%s4807_s3 + $0x288] sm:$0xff] }
 0x1a1   :  { %797 = vst [vmem:[#allocation1 + $0x9] sm:$0xff] %v3295_v15  ;;  %v901_v16 = vsel %vm767_vm4, %v3369_v27, %v899_v9  ;;  %1231 = vmatpush.msra.mxu0 %v974_v60  ;;  %v966_v12 = vld [vmem:[%s4807_s3 + $0x30] sm:$0xff]  ;;  %v1004_v13 = vld [vmem:[%s4807_s3 + $0x160] sm:$0xff]  ;;  %v2541_v60 = vld [vmem:[%s4807_s3 + $0x398] sm:$0x3f] }
 0x1a2   :  { %794 = vst.msk [vmem:[#allocation2 + $0x21] ss:$8 sm:$0x3] %vm3308_vm5, %v787_v26  ;;  %v836_v37 = vsel %vm767_vm4, %v3367_v31, %v834_v30  ;;  %1127 = vmatpush.msra.mxu2 %v2498_v20  ;;  %v2492_v21 = vld [vmem:[%s4807_s3 + $0x210] sm:$0xff]  ;;  %v2530_v3 = vld [vmem:[%s4807_s3 + $0x340] sm:$0xff]  ;;  %v2505_v20 = vld [vmem:[%s4807_s3 + $0x278] sm:$0xff] }
 0x1a3   :  { %844 = vst.msk [vmem:[#allocation2 + $0x24] ss:$8 sm:$0x3] %vm3308_vm5, %v837_v24  ;;  %1232 = vmatpush.msra.mxu0 %v972_v2  ;;  %v964_v8 = vld [vmem:[%s4807_s3 + $0x20] sm:$0xff]  ;;  %v1002_v19 = vld [vmem:[%s4807_s3 + $0x150] sm:$0xff] }
 0x1a4   :  { %909 = vst.msk [vmem:[#allocation2 + $0x30] ss:$8 sm:$0x3] %vm3308_vm5, %v902_v36  ;;  %1128 = vmatpush.msra.mxu2 %v2496_v0  ;;  %v2490_v25 = vld [vmem:[%s4807_s3 + $0x200] sm:$0xff]  ;;  %v2528_v10 = vld [vmem:[%s4807_s3 + $0x330] sm:$0xff] }
 0x1a5   :  { %841 = vst.msk [vmem:[#allocation2 + $0x4] ss:$8 sm:$0x3] %vm3308_vm5, %v836_v37  ;;  %1233 = vmatpush.msra.mxu0 %v970_v48  ;;  %v962_v26 = vld [vmem:[%s4807_s3 + $0x10] sm:$0xff]  ;;  %v960_v24 = vld [vmem:[%s4807_s3] sm:$0xff] }
 0x1a6   :  { %906 = vst.msk [vmem:[#allocation2 + $0x10] ss:$8 sm:$0x3] %vm3308_vm5, %v901_v16  ;;  %1129 = vmatpush.msra.mxu2 %v2494_v11  ;;  %v2488_v9 = vld [vmem:[%s4807_s3 + $0x1f0] sm:$0xff]  ;;  %v992_v34 = vld [vmem:[%s4807_s3 + $0x100] sm:$0xff] }
 0x1a7   :  { %1234 = vmatpush.msra.mxu0 %v968_v42  ;;  %v998_v30 = vld [vmem:[%s4807_s3 + $0x130] sm:$0xff]  ;;  %v2578_v49 = vld [vmem:[%s4807_s3 + $0x460] sm:$0xff]  ;;  %v2535_v42 = vld [vmem:[%s4807_s3 + $0x368] sm:$0xff] }
 0x1a8   :  { %v799_v50 = vld [vmem:[#allocation1 + $0x4] ss:$9 sm:$0xff]  ;;  %1130 = vmatpush.msra.mxu2 %v2492_v21 }
 0x1a9   :  { %800 = vst [vmem:[#allocation1] sm:$0xff] %v3334_v38  ;;  %1235 = vmatpush.msra.mxu0 %v966_v12  ;;  %v2524_v36 = vld [vmem:[%s4807_s3 + $0x310] sm:$0xff]  ;;  %v2602_v0 = vld [vmem:[%s4807_s3 + $0x520] sm:$0xff]  ;;  %v2533_v12 = vld [vmem:[%s4807_s3 + $0x358] sm:$0xff] }
 0x1aa   :  { %801 = vst [vmem:[#allocation1 + $0x9] sm:$0xff] %v3321_v44  ;;  %1131 = vmatpush.msra.mxu2 %v2490_v25  ;;  %v2584_v37 = vld [vmem:[%s4807_s3 + $0x490] sm:$0xff]  ;;  %v2598_v21 = vld [vmem:[%s4807_s3 + $0x500] sm:$0xff]  ;;  %v2497_v25 = vld [vmem:[%s4807_s3 + $0x238] sm:$0xff] }
 0x1ab   :  { %806 = vst.msk [vmem:[#allocation2 + $0x2] ss:$8 sm:$0x3] %vm3308_vm5, %v799_v50  ;;  %1236 = vmatpush.msra.mxu0 %v964_v8  ;;  %v2484_v16 = vld [vmem:[%s4807_s3 + $0x1d0] sm:$0xff] }
 0x1ac   :  { %1132 = vmatpush.msra.mxu2 %v2488_v9  ;;  %v994_v41 = vld [vmem:[%s4807_s3 + $0x110] sm:$0xff] }
 0x1ad   :  { %1237 = vmatpush.msra.mxu0 %v962_v26  ;;  %v2520_v50 = vld [vmem:[%s4807_s3 + $0x2f0] sm:$0xff]  ;;  %v2562_v26 = vld [vmem:[%s4807_s3 + $0x3e0] sm:$0xff] }
 0x1ae   :  { %1133 = vmatpush.msra.mxu2 %v2486_v35  ;;  %v2580_v51 = vld [vmem:[%s4807_s3 + $0x470] sm:$0xff] }
 0x1af   :  { %1238 = vmatpush.msra.mxu0 %v960_v24  ;;  %v2516_v17 = vld [vmem:[%s4807_s3 + $0x2d0] sm:$0xff]  ;;  %v2527_v24 = vld [vmem:[%s4807_s3 + $0x328] sm:$0xff] }
 0x1b0   :  { %1134 = vmatpush.msra.mxu2 %v2484_v16  ;;  %v2576_v40 = vld [vmem:[%s4807_s3 + $0x450] sm:$0xff]  ;;  %v2590_v16 = vld [vmem:[%s4807_s3 + $0x4c0] sm:$0xff] }
 0x1b1   :  { %v802_v46 = vld [vmem:[#allocation1 + $0x4] ss:$9 sm:$0xff]  ;;  %1414 = vmatpush.msrb.mxu0 %v2584_v37 }
 0x1b2   :  { %811 = vst [vmem:[#allocation1] sm:$0xff] %v3312_v32  ;;  %v2536_v32 = vld [vmem:[%s4807_s3 + $0x370] sm:$0xff]  ;;  %1165 = vmatpush.msrb.mxu2 %v2515_v45  ;;  %v2525_v37 = vld [vmem:[%s4807_s3 + $0x318] sm:$0xff] }
 0x1b3   :  { %812 = vst [vmem:[#allocation1 + $0x9] sm:$0xff] %v3295_v15  ;;  %1147 = vmatpush.msra.mxu3 %v2536_v32  ;;  %v1008_v15 = vld [vmem:[%s4807_s3 + $0x180] sm:$0xff]  ;;  %1415 = vmatpush.msrb.mxu0 %v2582_v43  ;;  %v2608_v58 = vld [vmem:[%s4807_s3 + $0x550] sm:$0xff]  ;;  %v2537_v32 = vld [vmem:[%s4807_s3 + $0x378] sm:$0xff] }
 0x1b4   :  { %809 = vst.msk [vmem:[#allocation2 + $0x22] ss:$8 sm:$0x3] %vm3308_vm5, %v802_v46  ;;  %1253 = vmatpush.msrb.mxu1 %v1008_v15  ;;  %1166 = vmatpush.msrb.mxu2 %v2513_v14  ;;  %v2606_v46 = vld [vmem:[%s4807_s3 + $0x540] sm:$0xff]  ;;  %v2572_v2 = vld [vmem:[%s4807_s3 + $0x430] sm:$0xff]  ;;  %v2523_v43 = vld [vmem:[%s4807_s3 + $0x308] sm:$0xff] }
 0x1b5   :  { %1148 = vmatpush.msra.mxu3 %v2534_v33  ;;  %1416 = vmatpush.msrb.mxu0 %v2580_v51  ;;  %v2604_v59 = vld [vmem:[%s4807_s3 + $0x530] sm:$0xff]  ;;  %v2570_v15 = vld [vmem:[%s4807_s3 + $0x420] sm:$0xff]  ;;  %v2503_v33 = vld [vmem:[%s4807_s3 + $0x268] sm:$0xff] }
 0x1b6   :  { %1254 = vmatpush.msrb.mxu1 %v1006_v5  ;;  %1167 = vmatpush.msrb.mxu2 %v2511_v57  ;;  %v2568_v5 = vld [vmem:[%s4807_s3 + $0x410] sm:$0xff]  ;;  %v2554_v51 = vld [vmem:[%s4807_s3 + $0x3a0] sm:$0xff]  ;;  %v2517_v57 = vld [vmem:[%s4807_s3 + $0x2d8] sm:$0xff] }
 0x1b7   :  { %1149 = vmatpush.msra.mxu3 %v2532_v6  ;;  %1417 = vmatpush.msrb.mxu0 %v2578_v49  ;;  %v2600_v11 = vld [vmem:[%s4807_s3 + $0x510] sm:$0xff]  ;;  %v2501_v6 = vld [vmem:[%s4807_s3 + $0x258] sm:$0xff]  ;;  %v2586_v14 = vld [vmem:[%s4807_s3 + $0x4a0] sm:$0xff] }
 0x1b8   :  { %1255 = vmatpush.msrb.mxu1 %v1004_v13  ;;  %1168 = vmatpush.msrb.mxu2 %v2509_v55  ;;  %v2566_v13 = vld [vmem:[%s4807_s3 + $0x400] sm:$0xff]  ;;  %v2564_v8 = vld [vmem:[%s4807_s3 + $0x3f0] sm:$0xff] }
 0x1b9   :  { %1150 = vmatpush.msra.mxu3 %v2530_v3  ;;  %1418 = vmatpush.msrb.mxu0 %v2576_v40  ;;  %v2499_v3 = vld [vmem:[%s4807_s3 + $0x248] sm:$0xff]  ;;  %v2592_v35 = vld [vmem:[%s4807_s3 + $0x4d0] sm:$0xff]  ;;  %v1021_v55 = vld [vmem:[#allocation2 + $0x18] sm:$0x1] }
 0x1ba   :  { %v814_v61 = vld [vmem:[#allocation1 + $0x6] ss:$9 sm:$0xff]  ;;  %1256 = vmatpush.msrb.mxu1 %v1002_v19  ;;  %1169 = vmatpush.msrb.mxu2 %v2507_v52 }
 0x1bb   :  { %815 = vst [vmem:[#allocation1] sm:$0xff] %v3334_v38  ;;  %1151 = vmatpush.msra.mxu3 %v2528_v10  ;;  %v1000_v38 = vld [vmem:[%s4807_s3 + $0x140] sm:$0xff]  ;;  %1419 = vmatpush.msrb.mxu0 %v2574_v63  ;;  %v2596_v19 = vld [vmem:[%s4807_s3 + $0x4f0] sm:$0xff]  ;;  %v2529_v10 = vld [vmem:[%s4807_s3 + $0x338] sm:$0xff] }
 0x1bc   :  { %816 = vst [vmem:[#allocation1 + $0x9] sm:$0xff] %v3321_v44  ;;  %1257 = vmatpush.msrb.mxu1 %v1000_v38  ;;  %v2526_v44 = vld [vmem:[%s4807_s3 + $0x320] sm:$0xff]  ;;  %1170 = vmatpush.msrb.mxu2 %v2505_v20  ;;  %v2556_v45 = vld [vmem:[%s4807_s3 + $0x3b0] sm:$0xff] }
 0x1bd   :  { %821 = vst.msk [vmem:[#allocation2 + $0x3] ss:$8 sm:$0x3] %vm3308_vm5, %v814_v61  ;;  %1152 = vmatpush.msra.mxu3 %v2526_v44  ;;  %1420 = vmatpush.msrb.mxu0 %v2572_v2  ;;  %v2531_v61 = vld [vmem:[%s4807_s3 + $0x348] sm:$0xff]  ;;  %v2594_v38 = vld [vmem:[%s4807_s3 + $0x4e0] sm:$0xff]  ;;  %v2646_v52 = vld [vmem:[%s4807_s3 + $0x650] sm:$0xff] }
 0x1be   :  { %1258 = vmatpush.msrb.mxu1 %v998_v30  ;;  %1171 = vmatpush.msrb.mxu2 %v2503_v33  ;;  %v2495_v44 = vld [vmem:[%s4807_s3 + $0x228] sm:$0xff]  ;;  %v2560_v30 = vld [vmem:[%s4807_s3 + $0x3d0] sm:$0xff] }
 0x1bf   :  { %1153 = vmatpush.msra.mxu3 %v2524_v36  ;;  %1421 = vmatpush.msrb.mxu0 %v2570_v15  ;;  %v2493_v36 = vld [vmem:[%s4807_s3 + $0x218] sm:$0xff] }
 0x1c0   :  { %1259 = vmatpush.msrb.mxu1 %v996_v39  ;;  %1172 = vmatpush.msrb.mxu2 %v2501_v6  ;;  %v2558_v39 = vld [vmem:[%s4807_s3 + $0x3c0] sm:$0xff]  ;;  %v991_v15 = vld [vmem:[%s4807_s3 + $0xf8] sm:$0xff] }
 0x1c1   :  { %1154 = vmatpush.msra.mxu3 %v2522_v18  ;;  %1422 = vmatpush.msrb.mxu0 %v2568_v5  ;;  %v2491_v18 = vld [vmem:[%s4807_s3 + $0x208] sm:$0xff]  ;;  %v2670_v5 = vld [vmem:[%s4807_s3 + $0x710] sm:$0xff]  ;;  %v1015_v6 = vld [vmem:[%s4807_s3 + $0x1b8] sm:$0xff] }
 0x1c2   :  { %1260 = vmatpush.msrb.mxu1 %v994_v41  ;;  %1173 = vmatpush.msrb.mxu2 %v2499_v3  ;;  %v2588_v41 = vld [vmem:[%s4807_s3 + $0x4b0] sm:$0xff]  ;;  %v1025_v3 = vld [vmem:[#allocation2 + $0x38] sm:$0x1] }
 0x1c3   :  { %v817_v47 = vld [vmem:[#allocation1 + $0x6] ss:$9 sm:$0xff]  ;;  %1155 = vmatpush.msra.mxu3 %v2520_v50  ;;  %1423 = vmatpush.msrb.mxu0 %v2566_v13 }
 0x1c4   :  { %824 = vst.msk [vmem:[#allocation2 + $0x23] ss:$8 sm:$0x3] %vm3308_vm5, %v817_v47  ;;  %1261 = vmatpush.msrb.mxu1 %v992_v34  ;;  %1174 = vmatpush.msrb.mxu2 %v2497_v25  ;;  %v2489_v47 = vld [vmem:[%s4807_s3 + $0x1f8] sm:$0xff]  ;;  %v2487_v34 = vld [vmem:[%s4807_s3 + $0x1e8] sm:$0xff]  ;;  %v2642_v13 = vld [vmem:[%s4807_s3 + $0x630] sm:$0xff] }
 0x1c5   :  { %846 = vst [vmem:[#allocation1] sm:$0xff] %v3367_v31  ;;  %1156 = vmatpush.msra.mxu3 %v2518_v53  ;;  %1424 = vmatpush.msrb.mxu0 %v2564_v8  ;;  %v2521_v50 = vld [vmem:[%s4807_s3 + $0x2f8] sm:$0xff]  ;;  %v2519_v53 = vld [vmem:[%s4807_s3 + $0x2e8] sm:$0xff]  ;;  %v2640_v25 = vld [vmem:[%s4807_s3 + $0x620] sm:$0xff] }
 0x1c6   :  { %847 = vst [vmem:[#allocation1 + $0x9] sm:$0xff] %v3364_v7  ;;  %2612 = vmatpush.msk.msra.mxu1 %vm1112_vm6, %v2610_v54  ;;  %1175 = vmatpush.msrb.mxu2 %v2495_v44  ;;  %v2485_v54 = vld [vmem:[%s4807_s3 + $0x1d8] sm:$0xff]  ;;  %v1013_v8 = vld [vmem:[%s4807_s3 + $0x1a8] sm:$0xff] }
 0x1c7   :  { %1157 = vmatpush.msra.mxu3 %v2516_v17  ;;  %1425 = vmatpush.msrb.mxu0 %v2562_v26 }
 0x1c8   :  { %1441 = vmatpush.msra.mxu1 %v2608_v58  ;;  %1176 = vmatpush.msrb.mxu2 %v2493_v36  ;;  %v1020_v58 = vld [vmem:[#allocation2 + $0x10] sm:$0x1] }
 0x1c9   :  { %2545 = vmatpush.msk.msrb.mxu3 %vm1112_vm6, %v2541_v60  ;;  %1426 = vmatpush.msrb.mxu0 %v2560_v30  ;;  %v985_v30 = vld [vmem:[%s4807_s3 + $0xc8] sm:$0xff] }
 0x1ca   :  { %1442 = vmatpush.msra.mxu1 %v2606_v46  ;;  %1177 = vmatpush.msrb.mxu2 %v2491_v18  ;;  %v1035_v46 = vrot.slane %v1020_v58, 1 }
 0x1cb   :  { %1192 = vmatpush.msrb.mxu3 %v2539_v1  ;;  %1427 = vmatpush.msrb.mxu0 %v2558_v39  ;;  %v2672_v1 = vld [vmem:[%s4807_s3 + $0x720] sm:$0xff]  ;;  %v2638_v39 = vld [vmem:[%s4807_s3 + $0x610] sm:$0xff] }
 0x1cc   :  { %1443 = vmatpush.msra.mxu1 %v2604_v59  ;;  %1178 = vmatpush.msrb.mxu2 %v2489_v47  ;;  %v1009_v47 = vld [vmem:[%s4807_s3 + $0x188] sm:$0xff] }
 0x1cd   :  { %v849_v48 = vld [vmem:[#allocation1 + $0x2] ss:$9 sm:$0xff]  ;;  %1193 = vmatpush.msrb.mxu3 %v2537_v32  ;;  %1428 = vmatpush.msrb.mxu0 %v2556_v45  ;;  %v1038_v32 = vrot.slane %v1021_v55, 1 }
 0x1ce   :  { %850 = vst [vmem:[#allocation1] sm:$0xff] %v3362_v29  ;;  %1444 = vmatpush.msra.mxu1 %v2602_v0  ;;  %1179 = vmatpush.msrb.mxu2 %v2487_v34  ;;  %v1017_v0 = vld [vmem:[%s4807_s3 + $0x1c8] sm:$0x3f]  ;;  %v1007_v34 = vld [vmem:[%s4807_s3 + $0x178] sm:$0xff] }
 0x1cf   :  { %851 = vst [vmem:[#allocation1 + $0x9] sm:$0xff] %v3346_v62  ;;  %1194 = vmatpush.msrb.mxu3 %v2535_v42  ;;  %1429 = vmatpush.msrb.mxu0 %v2554_v51  ;;  %v2644_v42 = vld [vmem:[%s4807_s3 + $0x640] sm:$0xff]  ;;  %v2662_v51 = vld [vmem:[%s4807_s3 + $0x6d0] sm:$0xff] }
 0x1d0   :  { %856 = vst.msk [vmem:[#allocation2 + $0x5] ss:$8 sm:$0x3] %vm3308_vm5, %v849_v48  ;;  %1445 = vmatpush.msra.mxu1 %v2600_v11  ;;  %1180 = vmatpush.msrb.mxu2 %v2485_v54  ;;  %v989_v11 = vld [vmem:[%s4807_s3 + $0xe8] sm:$0xff]  ;;  %v979_v54 = vld [vmem:[%s4807_s3 + $0x98] sm:$0xff] }
 0x1d1   :  { %1195 = vmatpush.msrb.mxu3 %v2533_v12  ;;  %v1024_v12 = vld [vmem:[#allocation2 + $0x30] sm:$0x1] }
 0x1d2   :  { %1446 = vmatpush.msra.mxu1 %v2598_v21  ;;  %v2668_v21 = vld [vmem:[%s4807_s3 + $0x700] sm:$0xff]  ;;  %v1041_v26 = vrot.slane %v1024_v12, 1  ;;  %v973_v12 = vld [vmem:[%s4807_s3 + $0x68] sm:$0xff] }
 0x1d3   :  { %1196 = vmatpush.msrb.mxu3 %v2531_v61  ;;  %v987_v61 = vld [vmem:[%s4807_s3 + $0xd8] sm:$0xff] }
 0x1d4   :  { %1447 = vmatpush.msra.mxu1 %v2596_v19 }
 0x1d5   :  { %1197 = vmatpush.msrb.mxu3 %v2529_v10  ;;  %v2666_v10 = vld [vmem:[%s4807_s3 + $0x6f0] sm:$0xff] }
 0x1d6   :  { %v852_v9 = vld [vmem:[#allocation1 + $0x2] ss:$9 sm:$0xff]  ;;  %1448 = vmatpush.msra.mxu1 %v2594_v38 }
 0x1d7   :  { %861 = vst [vmem:[#allocation1] sm:$0xff] %v3367_v31  ;;  %1198 = vmatpush.msrb.mxu3 %v2527_v24  ;;  %v1044_v24 = vrot.slane %v1025_v3, 1  ;;  %v997_v3 = vld [vmem:[%s4807_s3 + $0x128] sm:$0xff] }
 0x1d8   :  { %862 = vst [vmem:[#allocation1 + $0x9] sm:$0xff] %v3364_v7  ;;  %1449 = vmatpush.msra.mxu1 %v2592_v35  ;;  %v1011_v35 = vld [vmem:[%s4807_s3 + $0x198] sm:$0xff] }
 0x1d9   :  { %859 = vst.msk [vmem:[#allocation2 + $0x25] ss:$8 sm:$0x3] %vm3308_vm5, %v852_v9  ;;  %1199 = vmatpush.msrb.mxu3 %v2525_v37 }
 0x1da   :  { %1450 = vmatpush.msra.mxu1 %v2590_v16  ;;  %v2664_v16 = vld [vmem:[%s4807_s3 + $0x6e0] sm:$0xff] }
 0x1db   :  { %1200 = vmatpush.msrb.mxu3 %v2523_v43 }
 0x1dc   :  { %1451 = vmatpush.msra.mxu1 %v2588_v41  ;;  %v983_v41 = vld [vmem:[%s4807_s3 + $0xb8] sm:$0xff] }
 0x1dd   :  { %1201 = vmatpush.msrb.mxu3 %v2521_v50  ;;  %v2636_v50 = vld [vmem:[%s4807_s3 + $0x600] sm:$0xff] }
 0x1de   :  { %1452 = vmatpush.msra.mxu1 %v2586_v14  ;;  %v981_v14 = vld [vmem:[%s4807_s3 + $0xa8] sm:$0xff] }
 0x1df   :  { %v864_v49 = vld [vmem:[#allocation1 + $0x4] ss:$9 sm:$0xff]  ;;  %1202 = vmatpush.msrb.mxu3 %v2519_v53 }
 0x1e0   :  { %865 = vst [vmem:[#allocation1] sm:$0xff] %v3362_v29  ;;  %v2634_v53 = vld [vmem:[%s4807_s3 + $0x5f0] sm:$0xff] }
 0x1e1   :  { %866 = vst [vmem:[#allocation1 + $0x9] sm:$0xff] %v3346_v62  ;;  %1203 = vmatpush.msrb.mxu3 %v2517_v57  ;;  %v1005_v57 = vld [vmem:[%s4807_s3 + $0x168] sm:$0xff] }
 0x1e2   :  { %871 = vst.msk [vmem:[#allocation2 + $0x6] ss:$8 sm:$0x3] %vm3308_vm5, %v864_v49  ;;  %v2660_v49 = vld [vmem:[%s4807_s3 + $0x6c0] sm:$0xff] }
 0x1e8   :  { %v867_v17 = vld [vmem:[#allocation1 + $0x4] ss:$9 sm:$0xff] }
 0x1e9   :  { %876 = vst [vmem:[#allocation1] sm:$0xff] %v3367_v31  ;;  %v2648_v31 = vld [vmem:[%s4807_s3 + $0x660] sm:$0xff] }
 0x1ea   :  { %877 = vst [vmem:[#allocation1 + $0x9] sm:$0xff] %v3364_v7  ;;  %v2674_v7 = vld [vmem:[%s4807_s3 + $0x730] sm:$0x3f] }
 0x1eb   :  { %874 = vst.msk [vmem:[#allocation2 + $0x26] ss:$8 sm:$0x3] %vm3308_vm5, %v867_v17  ;;  %v2632_v17 = vld [vmem:[%s4807_s3 + $0x5e0] sm:$0xff] }
 0x1f1   :  { %v879_v40 = vld [vmem:[#allocation1 + $0x6] ss:$9 sm:$0xff] }
 0x1f2   :  { %880 = vst [vmem:[#allocation1] sm:$0xff] %v3362_v29 }
 0x1f3   :  { %881 = vst [vmem:[#allocation1 + $0x9] sm:$0xff] %v3346_v62 }
 0x1f4   :  { %886 = vst.msk [vmem:[#allocation2 + $0x7] ss:$8 sm:$0x3] %vm3308_vm5, %v879_v40 }
 0x1fa   :  { %v882_v60 = vld [vmem:[#allocation1 + $0x6] ss:$9 sm:$0xff] }
 0x1fb   :  { %911 = vst [vmem:[#allocation1] sm:$0xff] %v3369_v27  ;;  %v3788_v29 = vld [vmem:[#allocation2] sm:$0xff]  ;;  %v3790_v62 = vld [vmem:[#allocation2 + $0x8] sm:$0xff] }
 0x1fc   :  { %v1018_v63 = vld [vmem:[#allocation2] sm:$0xfe]  ;;  %912 = vst [vmem:[#allocation1 + $0x9] sm:$0xff] %v3359_v23  ;;  %1239 = vmatmul.f32.vlgmr.msra.gmra.mxu0 %v3788_v29  ;;  %2549 = vmatmul.msk.f32.vlgmr.msrb.gmra.mxu1 %vm1107_vm7, %v3790_v62  ;;  %v1019_v59 = vld [vmem:[#allocation2 + $0x8] sm:$0xfe] }
 0x1fd   :  { %v1034_v2 = vrot.slane %v1018_v63, 1  ;;  %889 = vst.msk [vmem:[#allocation2 + $0x27] ss:$8 sm:$0x3] %vm3308_vm5, %v882_v60  ;;  %1610 = vmatpush.msrb.mxu1 %v2648_v31  ;;  %2676 = vmatpush.msk.msra.mxu0 %vm1112_vm6, %v2674_v7  ;;  %v1037_v20 = vrot.slane %v1019_v59, 1  ;;  %v2658_v60 = vld [vmem:[%s4807_s3 + $0x6b0] sm:$0xff] }
 0x1fe   :  { %v1315_v58 = vld [vmem:[#allocation2] sm:$0xfc]  ;;  %v1316_v55 = vld [vmem:[#allocation2 + $0x8] sm:$0xfc]  ;;  %v2656_v59 = vld [vmem:[%s4807_s3 + $0x6a0] sm:$0xff] }
 0x1ff   :  { %v3806_v48 = vsel %vm712_vm2, %v1034_v2, %v1035_v46  ;;  %1611 = vmatpush.msrb.mxu1 %v2646_v52  ;;  %1637 = vmatpush.msra.mxu0 %v2672_v1  ;;  %v3815_v33 = vsel %vm712_vm2, %v1037_v20, %v1038_v32  ;;  %v977_v63 = vld [vmem:[%s4807_s3 + $0x88] sm:$0xff]  ;;  %v1003_v46 = vld [vmem:[%s4807_s3 + $0x158] sm:$0xff]  ;;  %v2630_v2 = vld [vmem:[%s4807_s3 + $0x5d0] sm:$0xff]  ;;  %v1331_v20 = vrot.slane %v1315_v58, 2  ;;  %v1334_v32 = vrot.slane %v1316_v55, 2 }
 0x200   :  { %1135 = vmatmul.f32.vlgmr.msra.gmra.mxu2 %v3806_v48  ;;  %2543 = vmatmul.msk.f32.vlgmr.msra.gmra.mxu3 %vm1107_vm7, %v3815_v33  ;;  %v2618_v58 = vld [vmem:[%s4807_s3 + $0x570] sm:$0xff]  ;;  %v963_v55 = vld [vmem:[%s4807_s3 + $0x18] sm:$0xff] }
 0x201   :  { %1269 = vmatpush.msra.mxu3 %v991_v15  ;;  %2551 = vmatpush.msk.msra.mxu2 %vm1112_vm6, %v1017_v0  ;;  %v975_v15 = vld [vmem:[%s4807_s3 + $0x78] sm:$0xff]  ;;  %v1001_v0 = vld [vmem:[%s4807_s3 + $0x148] sm:$0xff] }
 0x202   :  { %1612 = vmatpush.msrb.mxu1 %v2644_v42  ;;  %1638 = vmatpush.msra.mxu0 %v2670_v5 }
 0x203   :  { %v914_v19 = vld [vmem:[#allocation1 + $0x2] ss:$9 sm:$0xff]  ;;  %1270 = vmatpush.msra.mxu3 %v989_v11  ;;  %1296 = vmatpush.msra.mxu2 %v1015_v6 }
 0x204   :  { %915 = vst [vmem:[#allocation1] sm:$0xff] %v3356_v22  ;;  %1613 = vmatpush.msrb.mxu1 %v2642_v13  ;;  %1639 = vmatpush.msra.mxu0 %v2668_v21  ;;  %v3852_v38 = vld [vmem:[#allocation2 + $0x20] sm:$0xff]  ;;  %v3854_v9 = vld [vmem:[#allocation2 + $0x28] sm:$0xff]  ;;  %v2628_v11 = vld [vmem:[%s4807_s3 + $0x5c0] sm:$0xff] }
 0x205   :  { %v1022_v44 = vld [vmem:[#allocation2 + $0x20] sm:$0xfe]  ;;  %916 = vst [vmem:[#allocation1 + $0x9] sm:$0xff] %v3348_v56  ;;  %1271 = vmatpush.msra.mxu3 %v987_v61  ;;  %1297 = vmatpush.msra.mxu2 %v1013_v8  ;;  %v1023_v37 = vld [vmem:[#allocation2 + $0x28] sm:$0xfe]  ;;  %v999_v13 = vld [vmem:[%s4807_s3 + $0x138] sm:$0xff] }
 0x206   :  { %v1040_v36 = vrot.slane %v1022_v44, 1  ;;  %921 = vst.msk [vmem:[#allocation2 + $0x11] ss:$8 sm:$0x3] %vm3308_vm5, %v914_v19  ;;  %1242 = vmatmul.f32.gmra.mxu0 %v3852_v38  ;;  %2550 = vmatmul.msk.f32.gmra.mxu1 %vm1107_vm7, %v3854_v9  ;;  %v1043_v18 = vrot.slane %v1023_v37, 1  ;;  %v2654_v6 = vld [vmem:[%s4807_s3 + $0x690] sm:$0xff] }
 0x207   :  { %1614 = vmatpush.msrb.mxu1 %v2640_v25  ;;  %1640 = vmatpush.msra.mxu0 %v2666_v10  ;;  %v971_v21 = vld [vmem:[%s4807_s3 + $0x58] sm:$0xff]  ;;  %v1319_v61 = vld [vmem:[#allocation2 + $0x20] sm:$0xfc]  ;;  %v2624_v19 = vld [vmem:[%s4807_s3 + $0x5a0] sm:$0xff] }
 0x208   :  { %v3875_v43 = vsel %vm712_vm2, %v1040_v36, %v1041_v26  ;;  %1272 = vmatpush.msra.mxu3 %v985_v30  ;;  %1298 = vmatpush.msra.mxu2 %v1011_v35  ;;  %v3878_v45 = vsel %vm712_vm2, %v1043_v18, %v1044_v24  ;;  %v2650_v26 = vld [vmem:[%s4807_s3 + $0x670] sm:$0xff]  ;;  %v969_v24 = vld [vmem:[%s4807_s3 + $0x48] sm:$0xff]  ;;  %v995_v30 = vld [vmem:[%s4807_s3 + $0x118] sm:$0xff] }
 0x209   :  { %1615 = vmatpush.msrb.mxu1 %v2638_v39  ;;  %1641 = vmatpush.msra.mxu0 %v2664_v16  ;;  %v1320_v44 = vld [vmem:[#allocation2 + $0x28] sm:$0xfc]  ;;  %v1337_v16 = vrot.slane %v1319_v61, 2  ;;  %v2575_v61 = vld [vmem:[%s4807_s3 + $0x448] sm:$0xff] }
 0x20a   :  { %1138 = vmatmul.f32.gmra.mxu2 %v3875_v43  ;;  %2544 = vmatmul.msk.f32.gmra.mxu3 %vm1107_vm7, %v3878_v45  ;;  %v2712_v37 = vld [vmem:[%s4807_s3 + $0x830] sm:$0xff]  ;;  %v1340_v18 = vrot.slane %v1320_v44, 2  ;;  %v2605_v44 = vld [vmem:[%s4807_s3 + $0x538] sm:$0xff] }
 0x20b   :  { %1273 = vmatpush.msra.mxu3 %v983_v41  ;;  %1299 = vmatpush.msra.mxu2 %v1009_v47  ;;  %v2622_v39 = vld [vmem:[%s4807_s3 + $0x590] sm:$0xff]  ;;  %v967_v41 = vld [vmem:[%s4807_s3 + $0x38] sm:$0xff]  ;;  %v993_v47 = vld [vmem:[%s4807_s3 + $0x108] sm:$0xff] }
 0x20c   :  { %v917_v40 = vld [vmem:[#allocation1 + $0x2] ss:$9 sm:$0xff]  ;;  %1616 = vmatpush.msrb.mxu1 %v2636_v50  ;;  %1642 = vmatpush.msra.mxu0 %v2662_v51 }
 0x20d   :  { %926 = vst [vmem:[#allocation1] sm:$0xff] %v3369_v27  ;;  %1274 = vmatpush.msra.mxu3 %v981_v14  ;;  %1300 = vmatpush.msra.mxu2 %v1007_v34  ;;  %v1317_v31 = vld [vmem:[#allocation2 + $0x10] sm:$0x3]  ;;  %v1318_v7 = vld [vmem:[#allocation2 + $0x18] sm:$0x3] }
 0x20e   :  { %927 = vst [vmem:[#allocation1 + $0x9] sm:$0xff] %v3359_v23  ;;  %1617 = vmatpush.msrb.mxu1 %v2634_v53  ;;  %1643 = vmatpush.msra.mxu0 %v2660_v49  ;;  %v1332_v52 = vrot.slane %v1317_v31, 2  ;;  %v1335_v1 = vrot.slane %v1318_v7, 2  ;;  %v2710_v14 = vld [vmem:[%s4807_s3 + $0x820] sm:$0xff]  ;;  %v2585_v34 = vld [vmem:[%s4807_s3 + $0x498] sm:$0xff]  ;;  %v2583_v49 = vld [vmem:[%s4807_s3 + $0x488] sm:$0xff] }
 0x20f   :  { %924 = vst.msk [vmem:[#allocation2 + $0x31] ss:$8 sm:$0x3] %vm3308_vm5, %v917_v40  ;;  %1275 = vmatpush.msra.mxu3 %v979_v54  ;;  %1301 = vmatpush.msra.mxu2 %v1005_v57  ;;  %v2620_v53 = vld [vmem:[%s4807_s3 + $0x580] sm:$0xff]  ;;  %v1510_v54 = vld [vmem:[#allocation2] sm:$0xf8] }
 0x210   :  { %1618 = vmatpush.msrb.mxu1 %v2632_v17  ;;  %1644 = vmatpush.msra.mxu0 %v2658_v60  ;;  %v3942_v42 = vsel %vm1112_vm6, %v1331_v20, %v1332_v52  ;;  %v3945_v5 = vsel %vm1112_vm6, %v1334_v32, %v1335_v1  ;;  %v2706_v60 = vld [vmem:[%s4807_s3 + $0x800] sm:$0xff]  ;;  %v1511_v7 = vld [vmem:[#allocation2 + $0x8] sm:$0xf8]  ;;  %v1527_v20 = vrot.slane %v1510_v54, 3 }
 0x211   :  { %1276 = vmatpush.msra.mxu3 %v977_v63  ;;  %1302 = vmatpush.msra.mxu2 %v1003_v46  ;;  %v2738_v31 = vld [vmem:[%s4807_s3 + $0x900] sm:$0x3f]  ;;  %v2581_v63 = vld [vmem:[%s4807_s3 + $0x478] sm:$0xff]  ;;  %v961_v46 = vld [vmem:[%s4807_s3 + $0x8] sm:$0xff]  ;;  %v1530_v32 = vrot.slane %v1511_v7, 3 }
 0x212   :  { %1619 = vmatpush.msrb.mxu1 %v2630_v2  ;;  %1645 = vmatpush.msra.mxu0 %v2656_v59  ;;  %v2736_v2 = vld [vmem:[%s4807_s3 + $0x8f0] sm:$0xff]  ;;  %v2579_v59 = vld [vmem:[%s4807_s3 + $0x468] sm:$0xff]  ;;  %v2722_v54 = vld [vmem:[%s4807_s3 + $0x880] sm:$0xff] }
 0x213   :  { %1181 = vmatmul.f32.vlgmr.msrb.gmra.mxu2 %v3806_v48  ;;  %2546 = vmatmul.msk.f32.vlgmr.msrb.gmra.mxu3 %vm1107_vm7, %v3815_v33  ;;  %v2626_v48 = vld [vmem:[%s4807_s3 + $0x5b0] sm:$0xff]  ;;  %v2652_v33 = vld [vmem:[%s4807_s3 + $0x680] sm:$0xff]  ;;  %v2561_v7 = vld [vmem:[%s4807_s3 + $0x3d8] sm:$0xff] }
 0x214   :  { %1277 = vmatpush.msra.mxu3 %v975_v15  ;;  %1303 = vmatpush.msra.mxu2 %v1001_v0 }
 0x215   :  { %1430 = vmatmul.f32.vlgmr.msrb.gmra.mxu0 %v3942_v42  ;;  %2613 = vmatmul.msk.f32.vlgmr.msra.gmra.mxu1 %vm1107_vm7, %v3945_v5  ;;  %v929_v8 = vld [vmem:[#allocation1 + $0x4] ss:$9 sm:$0xff] }
 0x216   :  { %1620 = vmatpush.msrb.mxu1 %v2628_v11  ;;  %1646 = vmatpush.msra.mxu0 %v2654_v6  ;;  %v1321_v25 = vld [vmem:[#allocation2 + $0x30] sm:$0x3]  ;;  %v1322_v10 = vld [vmem:[#allocation2 + $0x38] sm:$0x3]  ;;  %930 = vst [vmem:[#allocation1] sm:$0xff] %v3356_v22 }
 0x217   :  { %1278 = vmatpush.msra.mxu3 %v973_v12  ;;  %1304 = vmatpush.msra.mxu2 %v999_v13  ;;  %936 = vst.msk [vmem:[#allocation2 + $0x12] ss:$8 sm:$0x3] %vm3308_vm5, %v929_v8  ;;  %v1338_v35 = vrot.slane %v1321_v25, 2  ;;  %v1341_v36 = vrot.slane %v1322_v10, 2  ;;  %v2702_v11 = vld [vmem:[%s4807_s3 + $0x7e0] sm:$0xff] }
 0x218   :  { %1621 = vmatpush.msrb.mxu1 %v2626_v48  ;;  %1647 = vmatpush.msra.mxu0 %v2652_v33  ;;  %931 = vst [vmem:[#allocation1 + $0x9] sm:$0xff] %v3348_v56  ;;  %v2734_v6 = vld [vmem:[%s4807_s3 + $0x8e0] sm:$0xff]  ;;  %v2577_v12 = vld [vmem:[%s4807_s3 + $0x458] sm:$0xff]  ;;  %v2700_v48 = vld [vmem:[%s4807_s3 + $0x7d0] sm:$0xff] }
 0x219   :  { %1279 = vmatpush.msra.mxu3 %v971_v21  ;;  %1305 = vmatpush.msra.mxu2 %v997_v3  ;;  %v4006_v50 = vsel %vm1112_vm6, %v1337_v16, %v1338_v35  ;;  %v4009_v51 = vsel %vm1112_vm6, %v1340_v18, %v1341_v36  ;;  %v2609_v13 = vld [vmem:[%s4807_s3 + $0x558] sm:$0xff]  ;;  %v2732_v33 = vld [vmem:[%s4807_s3 + $0x8d0] sm:$0xff]  ;;  %v2607_v8 = vld [vmem:[%s4807_s3 + $0x548] sm:$0xff] }
 0x21a   :  { %1622 = vmatpush.msrb.mxu1 %v2624_v19  ;;  %1648 = vmatpush.msra.mxu0 %v2650_v26  ;;  %v2698_v19 = vld [vmem:[%s4807_s3 + $0x7c0] sm:$0xff]  ;;  %v1515_v10 = vld [vmem:[#allocation2 + $0x28] sm:$0xf8]  ;;  %v2573_v26 = vld [vmem:[%s4807_s3 + $0x438] sm:$0xff] }
 0x21b   :  { %1280 = vmatpush.msra.mxu3 %v969_v24  ;;  %1306 = vmatpush.msra.mxu2 %v995_v30  ;;  %v2730_v25 = vld [vmem:[%s4807_s3 + $0x8c0] sm:$0xff]  ;;  %v2728_v35 = vld [vmem:[%s4807_s3 + $0x8b0] sm:$0xff]  ;;  %v2571_v36 = vld [vmem:[%s4807_s3 + $0x428] sm:$0xff] }
 0x21c   :  { %1805 = vmatpush.msrb.mxu0 %v2712_v37  ;;  %1623 = vmatpush.msrb.mxu1 %v2622_v39  ;;  %v1536_v39 = vrot.slane %v1515_v10, 3 }
 0x21d   :  { %1184 = vmatmul.f32.gmra.mxu2 %v3875_v43  ;;  %2547 = vmatmul.msk.f32.gmra.mxu3 %vm1107_vm7, %v3878_v45  ;;  %v965_v43 = vld [vmem:[%s4807_s3 + $0x28] sm:$0xff]  ;;  %v2708_v45 = vld [vmem:[%s4807_s3 + $0x810] sm:$0xff] }
 0x21e   :  { %1281 = vmatpush.msra.mxu3 %v967_v41  ;;  %1307 = vmatpush.msra.mxu2 %v993_v47  ;;  %v1512_v57 = vld [vmem:[#allocation2 + $0x10] sm:$0x7]  ;;  %v1513_v17 = vld [vmem:[#allocation2 + $0x18] sm:$0x7] }
 0x21f   :  { %1433 = vmatmul.f32.gmra.mxu0 %v4006_v50  ;;  %2614 = vmatmul.msk.f32.gmra.mxu1 %vm1107_vm7, %v4009_v51  ;;  %v932_v40 = vld [vmem:[#allocation1 + $0x4] ss:$9 sm:$0xff]  ;;  %v1528_v52 = vrot.slane %v1512_v57, 3  ;;  %v1531_v1 = vrot.slane %v1513_v17, 3 }
 0x220   :  { %1806 = vmatpush.msrb.mxu0 %v2710_v14  ;;  %1460 = vmatpush.msrb.mxu2 %v2585_v34  ;;  %939 = vst.msk [vmem:[#allocation2 + $0x32] ss:$8 sm:$0x3] %vm3308_vm5, %v932_v40  ;;  %v2694_v41 = vld [vmem:[%s4807_s3 + $0x7a0] sm:$0xff]  ;;  %v2569_v14 = vld [vmem:[%s4807_s3 + $0x418] sm:$0xff]  ;;  %v2688_v17 = vld [vmem:[%s4807_s3 + $0x770] sm:$0xff] }
 0x221   :  { %1624 = vmatpush.msrb.mxu1 %v2620_v53  ;;  %1282 = vmatpush.msra.mxu3 %v965_v43  ;;  %941 = vst [vmem:[#allocation1] sm:$0xff] %v3369_v27  ;;  %v2704_v27 = vld [vmem:[%s4807_s3 + $0x7f0] sm:$0xff]  ;;  %v4071_v15 = vsel %vm1526_vm8, %v1527_v20, %v1528_v52  ;;  %v4074_v0 = vsel %vm1526_vm8, %v1530_v32, %v1531_v1  ;;  %v2726_v47 = vld [vmem:[%s4807_s3 + $0x8a0] sm:$0xff]  ;;  %v2601_v34 = vld [vmem:[%s4807_s3 + $0x518] sm:$0xff] }
 0x222   :  { %1807 = vmatpush.msrb.mxu0 %v2708_v45  ;;  %1461 = vmatpush.msrb.mxu2 %v2583_v49  ;;  %942 = vst [vmem:[#allocation1 + $0x9] sm:$0xff] %v3359_v23  ;;  %v2611_v23 = vld [vmem:[%s4807_s3 + $0x568] sm:$0x3f]  ;;  %v2690_v49 = vld [vmem:[%s4807_s3 + $0x780] sm:$0xff]  ;;  %v2565_v57 = vld [vmem:[%s4807_s3 + $0x3f8] sm:$0xff] }
 0x223   :  { %1625 = vmatpush.msrb.mxu1 %v2618_v58  ;;  %1283 = vmatpush.msra.mxu3 %v963_v55  ;;  %v2567_v43 = vld [vmem:[%s4807_s3 + $0x408] sm:$0xff]  ;;  %v2720_v40 = vld [vmem:[%s4807_s3 + $0x870] sm:$0xff]  ;;  %v2682_v32 = vld [vmem:[%s4807_s3 + $0x740] sm:$0xff] }
 0x224   :  { %1808 = vmatpush.msrb.mxu0 %v2706_v60  ;;  %1462 = vmatpush.msrb.mxu2 %v2581_v63  ;;  %v2599_v45 = vld [vmem:[%s4807_s3 + $0x508] sm:$0xff]  ;;  %v2686_v60 = vld [vmem:[%s4807_s3 + $0x760] sm:$0xff]  ;;  %v2593_v63 = vld [vmem:[%s4807_s3 + $0x4d8] sm:$0xff] }
 0x225   :  { %2740 = vmatpush.msk.msra.mxu1 %vm1112_vm6, %v2738_v31  ;;  %1284 = vmatpush.msra.mxu3 %v961_v46  ;;  %v2563_v58 = vld [vmem:[%s4807_s3 + $0x3e8] sm:$0xff]  ;;  %v2718_v31 = vld [vmem:[%s4807_s3 + $0x860] sm:$0xff]  ;;  %v2684_v1 = vld [vmem:[%s4807_s3 + $0x750] sm:$0xff] }
 0x226   :  { %1809 = vmatpush.msrb.mxu0 %v2704_v27  ;;  %1463 = vmatpush.msrb.mxu2 %v2579_v59  ;;  %v2595_v55 = vld [vmem:[%s4807_s3 + $0x4e8] sm:$0xff]  ;;  %v2716_v27 = vld [vmem:[%s4807_s3 + $0x850] sm:$0xff] }
 0x227   :  { %1832 = vmatpush.msra.mxu1 %v2736_v2  ;;  %2615 = vmatpush.msk.msrb.mxu3 %vm1112_vm6, %v2611_v23  ;;  %v1516_v21 = vld [vmem:[#allocation2 + $0x30] sm:$0x7]  ;;  %v1706_v2 = vld [vmem:[#allocation2] sm:$0xf0]  ;;  %v1707_v20 = vld [vmem:[#allocation2 + $0x8] sm:$0xf0] }
 0x228   :  { %1285 = vmatmul.f32.vlgmr.msra.gmra.mxu3 %v3788_v29  ;;  %2552 = vmatmul.msk.f32.vlgmr.msra.gmra.mxu2 %vm1107_vm7, %v3790_v62  ;;  %v1514_v29 = vld [vmem:[#allocation2 + $0x20] sm:$0xf8]  ;;  %v1517_v62 = vld [vmem:[#allocation2 + $0x38] sm:$0x7]  ;;  %v1534_v24 = vrot.slane %v1516_v21, 3 }
 0x229   :  { %1626 = vmatmul.f32.vlgmr.msrb.gmra.mxu1 %v4071_v15  ;;  %2677 = vmatmul.msk.f32.vlgmr.msra.gmra.mxu0 %vm1107_vm7, %v4074_v0  ;;  %v944_v3 = vld [vmem:[#allocation1 + $0x6] ss:$9 sm:$0xff]  ;;  %v1537_v30 = vrot.slane %v1517_v62, 3  ;;  %v1533_v37 = vrot.slane %v1514_v29, 3  ;;  %v1725_v29 = vrot.slane %v1707_v20, 4 }
 0x22a   :  { %1810 = vmatpush.msrb.mxu0 %v2702_v11  ;;  %1833 = vmatpush.msra.mxu1 %v2734_v6  ;;  %951 = vst.msk [vmem:[#allocation2 + $0x13] ss:$8 sm:$0x3] %vm3308_vm5, %v944_v3  ;;  %v2559_v59 = vld [vmem:[%s4807_s3 + $0x3c8] sm:$0xff]  ;;  %v2714_v11 = vld [vmem:[%s4807_s3 + $0x840] sm:$0xff]  ;;  %v2701_v20 = vld [vmem:[%s4807_s3 + $0x7d8] sm:$0xff] }
 0x22b   :  { %1464 = vmatpush.msrb.mxu2 %v2577_v12  ;;  %1487 = vmatpush.msrb.mxu3 %v2609_v13  ;;  %945 = vst [vmem:[#allocation1] sm:$0xff] %v3356_v22  ;;  %v2696_v22 = vld [vmem:[%s4807_s3 + $0x7b0] sm:$0xff]  ;;  %v4136_v16 = vsel %vm1526_vm8, %v1533_v37, %v1534_v24  ;;  %v4139_v18 = vsel %vm1526_vm8, %v1536_v39, %v1537_v30  ;;  %v2591_v23 = vld [vmem:[%s4807_s3 + $0x4c8] sm:$0xff]  ;;  %v2557_v13 = vld [vmem:[%s4807_s3 + $0x3b8] sm:$0xff] }
 0x22c   :  { %1811 = vmatpush.msrb.mxu0 %v2700_v48  ;;  %1834 = vmatpush.msra.mxu1 %v2732_v33  ;;  %946 = vst [vmem:[#allocation1 + $0x9] sm:$0xff] %v3348_v56  ;;  %v2603_v56 = vld [vmem:[%s4807_s3 + $0x528] sm:$0xff]  ;;  %v2589_v48 = vld [vmem:[%s4807_s3 + $0x4b8] sm:$0xff]  ;;  %v1722_v33 = vrot.slane %v1706_v2, 4  ;;  %v1711_v30 = vld [vmem:[#allocation2 + $0x28] sm:$0xf0] }
 0x22d   :  { %1465 = vmatpush.msrb.mxu2 %v2575_v61  ;;  %1488 = vmatpush.msrb.mxu3 %v2607_v8  ;;  %v2555_v21 = vld [vmem:[%s4807_s3 + $0x3a8] sm:$0xff]  ;;  %v2643_v37 = vld [vmem:[%s4807_s3 + $0x638] sm:$0xff] }
 0x22e   :  { %1812 = vmatpush.msrb.mxu0 %v2698_v19  ;;  %1835 = vmatpush.msra.mxu1 %v2730_v25  ;;  %v2587_v62 = vld [vmem:[%s4807_s3 + $0x4a8] sm:$0xff]  ;;  %v2675_v19 = vld [vmem:[%s4807_s3 + $0x738] sm:$0x3f] }
 0x22f   :  { %1466 = vmatpush.msrb.mxu2 %v2573_v26  ;;  %1489 = vmatpush.msrb.mxu3 %v2605_v44  ;;  %v2649_v8 = vld [vmem:[%s4807_s3 + $0x668] sm:$0xff]  ;;  %v2647_v44 = vld [vmem:[%s4807_s3 + $0x658] sm:$0xff] }
 0x230   :  { %1813 = vmatpush.msrb.mxu0 %v2696_v22  ;;  %1836 = vmatpush.msra.mxu1 %v2728_v35  ;;  %v1710_v26 = vld [vmem:[#allocation2 + $0x20] sm:$0xf0]  ;;  %v2705_v2 = vld [vmem:[%s4807_s3 + $0x7f8] sm:$0xff] }
 0x231   :  { %1467 = vmatpush.msrb.mxu2 %v2571_v36  ;;  %1490 = vmatpush.msrb.mxu3 %v2603_v56  ;;  %v1708_v46 = vld [vmem:[#allocation2 + $0x10] sm:$0xf]  ;;  %v1709_v52 = vld [vmem:[#allocation2 + $0x18] sm:$0xf]  ;;  %v2673_v24 = vld [vmem:[%s4807_s3 + $0x728] sm:$0xff]  ;;  %v1728_v36 = vrot.slane %v1710_v26, 4 }
 0x232   :  { %1288 = vmatmul.f32.gmra.mxu3 %v3852_v38  ;;  %2553 = vmatmul.msk.f32.gmra.mxu2 %vm1107_vm7, %v3854_v9  ;;  %v2692_v38 = vld [vmem:[%s4807_s3 + $0x790] sm:$0xff]  ;;  %v1723_v6 = vrot.slane %v1708_v46, 4  ;;  %v1726_v12 = vrot.slane %v1709_v52, 4  ;;  %v1731_v56 = vrot.slane %v1711_v30, 4  ;;  %v2669_v39 = vld [vmem:[%s4807_s3 + $0x708] sm:$0xff]  ;;  %v2709_v52 = vld [vmem:[%s4807_s3 + $0x818] sm:$0xff] }
 0x233   :  { %1629 = vmatmul.f32.gmra.mxu1 %v4136_v16  ;;  %2678 = vmatmul.msk.f32.gmra.mxu0 %vm1107_vm7, %v4139_v18  ;;  %v2724_v9 = vld [vmem:[%s4807_s3 + $0x890] sm:$0xff]  ;;  %v2621_v46 = vld [vmem:[%s4807_s3 + $0x588] sm:$0xff]  ;;  %v2717_v26 = vld [vmem:[%s4807_s3 + $0x858] sm:$0xff] }
 0x234   :  { %v947_v53 = vld [vmem:[#allocation1 + $0x6] ss:$9 sm:$0xff]  ;;  %1814 = vmatpush.msrb.mxu0 %v2694_v41  ;;  %1837 = vmatpush.msra.mxu1 %v2726_v47  ;;  %v4240_v3 = vsel %vm81_vm0, %v1722_v33, %v1723_v6  ;;  %v4243_v61 = vsel %vm81_vm0, %v1725_v29, %v1726_v12 }
 0x235   :  { %954 = vst.msk [vmem:[#allocation2 + $0x33] ss:$8 sm:$0x3] %vm3308_vm5, %v947_v53  ;;  %1468 = vmatpush.msrb.mxu2 %v2569_v14  ;;  %1491 = vmatpush.msrb.mxu3 %v2601_v34  ;;  %v2641_v14 = vld [vmem:[%s4807_s3 + $0x628] sm:$0xff]  ;;  %v2667_v34 = vld [vmem:[%s4807_s3 + $0x6f8] sm:$0xff] }
 0x236   :  { %1815 = vmatpush.msrb.mxu0 %v2692_v38  ;;  %1838 = vmatpush.msra.mxu1 %v2724_v9  ;;  %v2639_v38 = vld [vmem:[%s4807_s3 + $0x618] sm:$0xff]  ;;  %v2665_v9 = vld [vmem:[%s4807_s3 + $0x6e8] sm:$0xff] }
 0x237   :  { %1469 = vmatpush.msrb.mxu2 %v2567_v43  ;;  %1492 = vmatpush.msrb.mxu3 %v2599_v45  ;;  %v2637_v53 = vld [vmem:[%s4807_s3 + $0x608] sm:$0xff]  ;;  %v2697_v6 = vld [vmem:[%s4807_s3 + $0x7b8] sm:$0xff] }
 0x238   :  { %1816 = vmatpush.msrb.mxu0 %v2690_v49  ;;  %1839 = vmatpush.msra.mxu1 %v2722_v54  ;;  %v2661_v43 = vld [vmem:[%s4807_s3 + $0x6c8] sm:$0xff]  ;;  %v2659_v49 = vld [vmem:[%s4807_s3 + $0x6b8] sm:$0xff] }
 0x239   :  { %1470 = vmatpush.msrb.mxu2 %v2565_v57  ;;  %1493 = vmatpush.msrb.mxu3 %v2597_v4  ;;  %v2633_v45 = vld [vmem:[%s4807_s3 + $0x5e8] sm:$0xff]  ;;  %v2631_v54 = vld [vmem:[%s4807_s3 + $0x5d8] sm:$0xff] }
 0x23a   :  { %1817 = vmatpush.msrb.mxu0 %v2688_v17  ;;  %1840 = vmatpush.msra.mxu1 %v2720_v40  ;;  %v2657_v57 = vld [vmem:[%s4807_s3 + $0x6a8] sm:$0xff]  ;;  %v2655_v17 = vld [vmem:[%s4807_s3 + $0x698] sm:$0xff] }
 0x23b   :  { %1471 = vmatpush.msrb.mxu2 %v2563_v58  ;;  %1494 = vmatpush.msrb.mxu3 %v2595_v55  ;;  %v2629_v4 = vld [vmem:[%s4807_s3 + $0x5c8] sm:$0xff]  ;;  %v2627_v40 = vld [vmem:[%s4807_s3 + $0x5b8] sm:$0xff] }
 0x23c   :  { %1818 = vmatpush.msrb.mxu0 %v2686_v60  ;;  %1841 = vmatpush.msra.mxu1 %v2718_v31  ;;  %v1712_v25 = vld [vmem:[#allocation2 + $0x30] sm:$0xf]  ;;  %v1713_v10 = vld [vmem:[#allocation2 + $0x38] sm:$0xf]  ;;  %v2653_v58 = vld [vmem:[%s4807_s3 + $0x688] sm:$0xff] }
 0x23d   :  { %1472 = vmatpush.msrb.mxu2 %v2561_v7  ;;  %1495 = vmatpush.msrb.mxu3 %v2593_v63  ;;  %v1729_v22 = vrot.slane %v1712_v25, 4  ;;  %v1732_v35 = vrot.slane %v1713_v10, 4  ;;  %v2625_v55 = vld [vmem:[%s4807_s3 + $0x5a8] sm:$0xff]  ;;  %v2651_v60 = vld [vmem:[%s4807_s3 + $0x678] sm:$0xff] }
 0x23e   :  { %1819 = vmatpush.msrb.mxu0 %v2684_v1  ;;  %1842 = vmatpush.msra.mxu1 %v2716_v27  ;;  %v2713_v31 = vld [vmem:[%s4807_s3 + $0x838] sm:$0xff]  ;;  %v2711_v63 = vld [vmem:[%s4807_s3 + $0x828] sm:$0xff] }
 0x23f   :  { %1473 = vmatpush.msrb.mxu2 %v2559_v59  ;;  %1496 = vmatpush.msrb.mxu3 %v2591_v23  ;;  %v4277_v41 = vsel %vm81_vm0, %v1728_v36, %v1729_v22  ;;  %v4280_v47 = vsel %vm81_vm0, %v1731_v56, %v1732_v35  ;;  %v2623_v7 = vld [vmem:[%s4807_s3 + $0x598] sm:$0xff]  ;;  %v2739_v27 = vld [vmem:[%s4807_s3 + $0x908] sm:$0x3f] }
 0x240   :  { %1820 = vmatpush.msrb.mxu0 %v2682_v32  ;;  %1843 = vmatpush.msra.mxu1 %v2714_v11  ;;  %v2619_v1 = vld [vmem:[%s4807_s3 + $0x578] sm:$0xff]  ;;  %v2703_v23 = vld [vmem:[%s4807_s3 + $0x7e8] sm:$0xff] }
 0x241   :  { %1474 = vmatpush.msrb.mxu2 %v2557_v13  ;;  %1497 = vmatpush.msrb.mxu3 %v2589_v48  ;;  %v2737_v59 = vld [vmem:[%s4807_s3 + $0x8f8] sm:$0xff]  ;;  %v2731_v11 = vld [vmem:[%s4807_s3 + $0x8c8] sm:$0xff] }
 0x242   :  { %1821 = vmatmul.f32.vlgmr.msrb.gmra.mxu0 %v4240_v3  ;;  %2741 = vmatmul.msk.f32.vlgmr.msra.gmra.mxu1 %vm1107_vm7, %v4243_v61  ;;  %v2733_v32 = vld [vmem:[%s4807_s3 + $0x8d8] sm:$0xff]  ;;  %v2695_v13 = vld [vmem:[%s4807_s3 + $0x7a8] sm:$0xff] }
 0x243   :  { %1475 = vmatpush.msrb.mxu2 %v2555_v21  ;;  %1498 = vmatpush.msrb.mxu3 %v2587_v62  ;;  %v2729_v12 = vld [vmem:[%s4807_s3 + $0x8b8] sm:$0xff]  ;;  %v2727_v48 = vld [vmem:[%s4807_s3 + $0x8a8] sm:$0xff] }
 0x244   :  { %1476 = vmatmul.f32.vlgmr.msrb.gmra.mxu2 %v3942_v42  ;;  %2616 = vmatmul.msk.f32.vlgmr.msrb.gmra.mxu3 %vm1107_vm7, %v3945_v5  ;;  %v2645_v42 = vld [vmem:[%s4807_s3 + $0x648] sm:$0xff]  ;;  %v2671_v5 = vld [vmem:[%s4807_s3 + $0x718] sm:$0xff] }
 0x245   :  { %1656 = vmatpush.msra.mxu3 %v2649_v8  ;;  %2679 = vmatpush.msk.msra.mxu2 %vm1112_vm6, %v2675_v19  ;;  %v2725_v33 = vld [vmem:[%s4807_s3 + $0x898] sm:$0xff]  ;;  %v2691_v29 = vld [vmem:[%s4807_s3 + $0x788] sm:$0xff] }
 0x246   :  { %v2723_v21 = vld [vmem:[%s4807_s3 + $0x888] sm:$0xff]  ;;  %v2689_v62 = vld [vmem:[%s4807_s3 + $0x778] sm:$0xff] }
 0x247   :  { %1657 = vmatpush.msra.mxu3 %v2647_v44  ;;  %1683 = vmatpush.msra.mxu2 %v2673_v24  ;;  %v2721_v8 = vld [vmem:[%s4807_s3 + $0x878] sm:$0xff]  ;;  %v2687_v19 = vld [vmem:[%s4807_s3 + $0x768] sm:$0xff] }
 0x248   :  { %v2719_v25 = vld [vmem:[%s4807_s3 + $0x868] sm:$0xff]  ;;  %v2685_v10 = vld [vmem:[%s4807_s3 + $0x758] sm:$0xff] }
 0x249   :  { %1658 = vmatpush.msra.mxu3 %v2645_v42  ;;  %1684 = vmatpush.msra.mxu2 %v2671_v5  ;;  %v2683_v44 = vld [vmem:[%s4807_s3 + $0x748] sm:$0xff] }
 0x24a   :  { %1824 = vmatmul.f32.gmra.mxu0 %v4277_v41  ;;  %2742 = vmatmul.msk.f32.gmra.mxu1 %vm1107_vm7, %v4280_v47  ;;  %v2715_v24 = vld [vmem:[%s4807_s3 + $0x848] sm:$0xff] }
 0x24b   :  { %1659 = vmatpush.msra.mxu3 %v2643_v37  ;;  %1685 = vmatpush.msra.mxu2 %v2669_v39 }
 0x24c   :  { %1479 = vmatmul.f32.gmra.mxu2 %v4006_v50  ;;  %2617 = vmatmul.msk.f32.gmra.mxu3 %vm1107_vm7, %v4009_v51  ;;  %v2663_v50 = vld [vmem:[%s4807_s3 + $0x6d8] sm:$0xff] }
 0x24d   :  { %1660 = vmatpush.msra.mxu3 %v2641_v14  ;;  %1686 = vmatpush.msra.mxu2 %v2667_v34  ;;  %v2635_v51 = vld [vmem:[%s4807_s3 + $0x5f8] sm:$0xff] }
 0x24f   :  { %1661 = vmatpush.msra.mxu3 %v2639_v38  ;;  %1687 = vmatpush.msra.mxu2 %v2665_v9 }
 0x251   :  { %1662 = vmatpush.msra.mxu3 %v2637_v53  ;;  %1688 = vmatpush.msra.mxu2 %v2663_v50 }
 0x253   :  { %1663 = vmatpush.msra.mxu3 %v2635_v51  ;;  %1689 = vmatpush.msra.mxu2 %v2661_v43 }
 0x255   :  { %1664 = vmatpush.msra.mxu3 %v2633_v45  ;;  %1690 = vmatpush.msra.mxu2 %v2659_v49 }
 0x257   :  { %1665 = vmatpush.msra.mxu3 %v2631_v54  ;;  %1691 = vmatpush.msra.mxu2 %v2657_v57  ;;  %v4454_v57 = vld [vmem:[%s4808_s4] sm:$0x3] }
 0x259   :  { %1666 = vmatpush.msra.mxu3 %v2629_v4  ;;  %1692 = vmatpush.msra.mxu2 %v2655_v17 }
 0x25b   :  { %1667 = vmatpush.msra.mxu3 %v2627_v40  ;;  %1693 = vmatpush.msra.mxu2 %v2653_v58 }
 0x25d   :  { %1668 = vmatpush.msra.mxu3 %v2625_v55  ;;  %1694 = vmatpush.msra.mxu2 %v2651_v60 }
 0x25e   :  { %2680 = vmatmul.msk.f32.vlgmr.msra.gmra.mxu2 %vm1107_vm7, %v4074_v0  ;;  %v2707_v0 = vld [vmem:[%s4807_s3 + $0x808] sm:$0xff] }
 0x25f   :  { %1851 = vmatpush.msrb.mxu2 %v2713_v31  ;;  %1669 = vmatpush.msra.mxu3 %v2623_v7  ;;  %v1903_v31 = vperm.slane %v4454_v57, 0 }
 0x261   :  { %1852 = vmatpush.msrb.mxu2 %v2711_v63  ;;  %1670 = vmatpush.msra.mxu3 %v2621_v46 }
 0x263   :  { %1853 = vmatpush.msrb.mxu2 %v2709_v52  ;;  %1671 = vmatpush.msra.mxu3 %v2619_v1 }
 0x264   :  { %1672 = vmatmul.f32.vlgmr.msra.gmra.mxu3 %v4071_v15  ;;  %v2735_v15 = vld [vmem:[%s4807_s3 + $0x8e8] sm:$0xff] }
 0x265   :  { %1854 = vmatpush.msrb.mxu2 %v2707_v0  ;;  %2743 = vmatpush.msk.msrb.mxu3 %vm1112_vm6, %v2739_v27 }
 0x266   :  { %2681 = vmatmul.msk.f32.gmra.mxu2 %vm1107_vm7, %v4139_v18  ;;  %v2699_v18 = vld [vmem:[%s4807_s3 + $0x7c8] sm:$0xff] }
 0x267   :  { %1855 = vmatpush.msrb.mxu2 %v2705_v2  ;;  %1878 = vmatpush.msrb.mxu3 %v2737_v59 }
 0x269   :  { %1856 = vmatpush.msrb.mxu2 %v2703_v23  ;;  %1879 = vmatpush.msrb.mxu3 %v2735_v15 }
 0x26b   :  { %1857 = vmatpush.msrb.mxu2 %v2701_v20  ;;  %1880 = vmatpush.msrb.mxu3 %v2733_v32 }
 0x26c   :  { %1675 = vmatmul.f32.gmra.mxu3 %v4136_v16  ;;  %v2693_v16 = vld [vmem:[%s4807_s3 + $0x798] sm:$0xff] }
 0x26d   :  { %1858 = vmatpush.msrb.mxu2 %v2699_v18  ;;  %1881 = vmatpush.msrb.mxu3 %v2731_v11 }
 0x26f   :  { %1859 = vmatpush.msrb.mxu2 %v2697_v6  ;;  %1882 = vmatpush.msrb.mxu3 %v2729_v12 }
 0x271   :  { %1860 = vmatpush.msrb.mxu2 %v2695_v13  ;;  %1883 = vmatpush.msrb.mxu3 %v2727_v48 }
 0x273   :  { %1861 = vmatpush.msrb.mxu2 %v2693_v16  ;;  %1884 = vmatpush.msrb.mxu3 %v2725_v33 }
 0x275   :  { %1862 = vmatpush.msrb.mxu2 %v2691_v29  ;;  %1885 = vmatpush.msrb.mxu3 %v2723_v21 }
 0x277   :  { %1863 = vmatpush.msrb.mxu2 %v2689_v62  ;;  %1886 = vmatpush.msrb.mxu3 %v2721_v8 }
 0x279   :  { %1864 = vmatpush.msrb.mxu2 %v2687_v19  ;;  %1887 = vmatpush.msrb.mxu3 %v2719_v25  ;;  %v1240_v30 = vpop.f32.mrf.mxu0  ;;  %v1263_v22 = vpop.f32.mrf.mxu1 }
 0x27b   :  { %1865 = vmatpush.msrb.mxu2 %v2685_v10  ;;  %1888 = vmatpush.msrb.mxu3 %v2717_v26 }
 0x27d   :  { %1866 = vmatpush.msrb.mxu2 %v2683_v44  ;;  %1889 = vmatpush.msrb.mxu3 %v2715_v24 }
 0x27e   :  { %1867 = vmatmul.f32.vlgmr.msrb.gmra.mxu2 %v4240_v3  ;;  %2744 = vmatmul.msk.f32.vlgmr.msrb.gmra.mxu3 %vm1107_vm7, %v4243_v61 }
 0x283   :  { %v1243_v35 = vpop.f32.mrf.mxu0  ;;  %v1266_v42 = vpop.f32.mrf.mxu1 }
 0x284   :  { %v1136_v56 = vpop.f32.mrf.mxu2  ;;  %v1159_v37 = vpop.f32.mrf.mxu3 }
 0x285   :  { %v1160_v61 = vadd.f32 %v1159_v37, %v1136_v56  ;;  %v1904_v37 = vperm.slane %v4454_v57, 1  ;;  %v2024_v57 = vld [vmem:[%s4809_s5 + $0x70] sm:$0xff] }
 0x286   :  { %1870 = vmatmul.f32.gmra.mxu2 %v4277_v41  ;;  %2745 = vmatmul.msk.f32.gmra.mxu3 %vm1107_vm7, %v4280_v47 }
 0x287   :  { %v1241_v47 = vadd.f32 %v1240_v30, %v1160_v61 }
 0x289   :  { %v1264_v49 = vadd.f32 %v1263_v22, %v1241_v47 }
 0x28d   :  { %v1139_v34 = vpop.f32.mrf.mxu2  ;;  %v1162_v3 = vpop.f32.mrf.mxu3 }
 0x28e   :  { %v1163_v45 = vadd.f32 %v1162_v3, %v1139_v34 }
 0x290   :  { %v1244_v58 = vadd.f32 %v1243_v35, %v1163_v45  ;;  %v2760_v45 = vld [vmem:[%s4809_s5 + $0x100] sm:$0xff] }
 0x292   :  { %v1431_v5 = vpop.f32.mrf.mxu0  ;;  %v1454_v36 = vpop.f32.mrf.mxu1  ;;  %v1267_v1 = vadd.f32 %v1266_v42, %v1244_v58  ;;  %v2757_v58 = vld [vmem:[%s4809_s5 + $0xe8] sm:$0xff] }
 0x293   :  { %v1455_v43 = vadd.f32 %v1454_v36, %v1431_v5 }
 0x295   :  { %v1506_v4 = vadd.f32 %v1455_v43, %v1264_v49  ;;  %v2761_v43 = vld [vmem:[%s4809_s5 + $0x108] sm:$0xff]  ;;  %v2759_v49 = vld [vmem:[%s4809_s5 + $0xf8] sm:$0xff] }
 0x296   :  { %v1182_v53 = vpop.f32.mrf.mxu2  ;;  %v1205_v41 = vpop.f32.mrf.mxu3  ;;  %2063 = vmatpush.msrb.mxu1 %v2761_v43  ;;  %v2746_v43 = vld [vmem:[%s4809_s5 + $0x90] sm:$0xff] }
 0x297   :  { %v1206_v8 = vadd.f32 %v1205_v41, %v1182_v53 }
 0x298   :  { %2064 = vmatpush.msrb.mxu1 %v2760_v45  ;;  %v2803_v45 = vld [vmem:[%s4809_s5 + $0x228] sm:$0xff] }
 0x29a   :  { %2065 = vmatpush.msrb.mxu1 %v2759_v49 }
 0x29c   :  { %v1434_v39 = vpop.f32.mrf.mxu0  ;;  %v1457_v14 = vpop.f32.mrf.mxu1 }
 0x29d   :  { %v1458_v46 = vadd.f32 %v1457_v14, %v1434_v39 }
 0x29f   :  { %v1508_v2 = vadd.f32 %v1458_v46, %v1267_v1  ;;  %v2781_v46 = vld [vmem:[%s4809_s5 + $0x188] sm:$0xff]  ;;  %v2755_v1 = vld [vmem:[%s4809_s5 + $0xd8] sm:$0xff] }
 0x2a0   :  { %v1185_v7 = vpop.f32.mrf.mxu2  ;;  %v1208_v63 = vpop.f32.mrf.mxu3 }
 0x2a1   :  { %v1209_v30 = vadd.f32 %v1208_v63, %v1185_v7  ;;  %v2756_v7 = vld [vmem:[%s4809_s5 + $0xe0] sm:$0xff]  ;;  %v2021_v63 = vld [vmem:[%s4809_s5 + $0x58] sm:$0xff] }
 0x2a6   :  { %v1627_v38 = vpop.f32.mrf.mxu1  ;;  %v1650_v9 = vpop.f32.mrf.mxu0 }
 0x2a7   :  { %v1651_v54 = vadd.f32 %v1650_v9, %v1627_v38 }
 0x2a9   :  { %v1702_v55 = vadd.f32 %v1651_v54, %v1506_v4  ;;  %v2025_v54 = vld [vmem:[%s4809_s5 + $0x78] sm:$0xff]  ;;  %v2758_v4 = vld [vmem:[%s4809_s5 + $0xf0] sm:$0xff] }
 0x2aa   :  { %2116 = vmatpush.msra.mxu3 %v2025_v54  ;;  %2066 = vmatpush.msrb.mxu1 %v2758_v4  ;;  %v2802_v54 = vld [vmem:[%s4809_s5 + $0x220] sm:$0xff]  ;;  %v2800_v4 = vld [vmem:[%s4809_s5 + $0x210] sm:$0xff] }
 0x2ab   :  { %v1286_v18 = vpop.f32.mrf.mxu3  ;;  %v1309_v11 = vpop.f32.mrf.mxu2 }
 0x2ac   :  { %v1287_v10 = vadd.f32 %v1286_v18, %v1206_v8  ;;  %2117 = vmatpush.msra.mxu3 %v2024_v57  ;;  %2067 = vmatpush.msrb.mxu1 %v2757_v58  ;;  %v2019_v18 = vld [vmem:[%s4809_s5 + $0x48] sm:$0xff]  ;;  %v2801_v57 = vld [vmem:[%s4809_s5 + $0x218] sm:$0xff] }
 0x2ad   :  { %v2013_v58 = vld [vmem:[%s4809_s5 + $0x18] sm:$0xff] }
 0x2ae   :  { %v1310_v44 = vadd.f32 %v1309_v11, %v1287_v10  ;;  %2068 = vmatpush.msrb.mxu1 %v2756_v7  ;;  %v2751_v10 = vld [vmem:[%s4809_s5 + $0xb8] sm:$0xff]  ;;  %v2012_v7 = vld [vmem:[%s4809_s5 + $0x10] sm:$0xff] }
 0x2b0   :  { %v1630_v50 = vpop.f32.mrf.mxu1  ;;  %v1653_v51 = vpop.f32.mrf.mxu0  ;;  %2069 = vmatpush.msrb.mxu1 %v2755_v1  ;;  %v2011_v1 = vld [vmem:[%s4809_s5 + $0x8] sm:$0xff] }
 0x2b1   :  { %v1654_v0 = vadd.f32 %v1653_v51, %v1630_v50 }
 0x2b3   :  { %v1704_v15 = vadd.f32 %v1654_v0, %v1508_v2  ;;  %v2020_v0 = vld [vmem:[%s4809_s5 + $0x50] sm:$0xff] }
 0x2b5   :  { %v1289_v12 = vpop.f32.mrf.mxu3  ;;  %v1312_v13 = vpop.f32.mrf.mxu2 }
 0x2b6   :  { %v1290_v5 = vadd.f32 %v1289_v12, %v1209_v30  ;;  %v2779_v12 = vld [vmem:[%s4809_s5 + $0x178] sm:$0xff] }
 0x2b8   :  { %v1313_v34 = vadd.f32 %v1312_v13, %v1290_v5 }
 0x2bf   :  { %v1822_v17 = vpop.f32.mrf.mxu0  ;;  %v1845_v40 = vpop.f32.mrf.mxu1 }
 0x2c0   :  { %v1846_v60 = vadd.f32 %v1845_v40, %v1822_v17  ;;  %v2023_v17 = vld [vmem:[%s4809_s5 + $0x68] sm:$0xff]  ;;  %v2763_v40 = vld [vmem:[%s4809_s5 + $0x118] sm:$0xf] }
 0x2c1   :  { %2764 = vmatpush.msk.msra.mxu0 %vm81_vm0, %v2763_v40  ;;  %2118 = vmatpush.msra.mxu3 %v2023_v17  ;;  %v2027_v40 = vld [vmem:[%s4809_s5 + $0x88] sm:$0xf] }
 0x2c2   :  { %v1897_v52 = vadd.f32 %v1846_v60, %v1702_v55  ;;  %v2022_v55 = vld [vmem:[%s4809_s5 + $0x60] sm:$0xff]  ;;  %v2783_v60 = vld [vmem:[%s4809_s5 + $0x198] sm:$0xff] }
 0x2c3   :  { %2190 = vmatpush.msra.mxu2 %v2783_v60  ;;  %2119 = vmatpush.msra.mxu3 %v2022_v55  ;;  %v2775_v55 = vld [vmem:[%s4809_s5 + $0x158] sm:$0xff] }
 0x2c4   :  { %v4457_v27 = vadd.f32 %v1903_v31, %v1897_v52  ;;  %v2762_v52 = vld [vmem:[%s4809_s5 + $0x110] sm:$0xff] }
 0x2c5   :  { %2098 = vmatpush.msra.mxu0 %v2762_v52  ;;  %2120 = vmatpush.msra.mxu3 %v2021_v63  ;;  %v2774_v63 = vld [vmem:[%s4809_s5 + $0x150] sm:$0xff]  ;;  %v2026_v52 = vld [vmem:[%s4809_s5 + $0x80] sm:$0xff] }
 0x2c6   :  { %1915 = vrot.lane.b32.xlu0 %v4457_v27, %s2848_s28 }
 0x2c7   :  { %v1825_v59 = vpop.f32.mrf.mxu0  ;;  %v1848_v23 = vpop.f32.mrf.mxu1  ;;  %2121 = vmatpush.msra.mxu3 %v2020_v0  ;;  %2766 = vmatpush.msk.msrb.mxu0 %vm81_vm0, %v2027_v40  ;;  %v2773_v0 = vld [vmem:[%s4809_s5 + $0x148] sm:$0xff] }
 0x2c8   :  { %v1849_v20 = vadd.f32 %v1848_v23, %v1825_v59  ;;  %v1477_v48 = vpop.f32.mrf.mxu2  ;;  %v1500_v16 = vpop.f32.mrf.mxu3  ;;  %v2780_v23 = vld [vmem:[%s4809_s5 + $0x180] sm:$0xff] }
 0x2c9   :  { %v1501_v26 = vadd.f32 %v1500_v16, %v1477_v48  ;;  %v2753_v48 = vld [vmem:[%s4809_s5 + $0xc8] sm:$0xff]  ;;  %v2018_v16 = vld [vmem:[%s4809_s5 + $0x40] sm:$0xff]  ;;  %2122 = vmatpush.msra.mxu3 %v2019_v18  ;;  %2151 = vmatpush.msrb.mxu0 %v2026_v52 }
 0x2ca   :  { %v1899_v32 = vadd.f32 %v1849_v20, %v1704_v15 }
 0x2cb   :  { %v1507_v22 = vadd.f32 %v1501_v26, %v1310_v44  ;;  %2123 = vmatpush.msra.mxu3 %v2018_v16  ;;  %v2016_v26 = vld [vmem:[%s4809_s5 + $0x30] sm:$0xff]  ;;  %v2768_v16 = vld [vmem:[%s4809_s5 + $0x120] sm:$0xff] }
 0x2cc   :  { %v4461_v6 = vadd.f32 %v1903_v31, %v1899_v32  ;;  %v2782_v31 = vld [vmem:[%s4809_s5 + $0x190] sm:$0xff] }
 0x2cd   :  { %2191 = vmatpush.msra.mxu2 %v2782_v31  ;;  %v2754_v32 = vld [vmem:[%s4809_s5 + $0xd0] sm:$0xff]  ;;  %v2799_v31 = vld [vmem:[%s4809_s5 + $0x208] sm:$0xff] }
 0x2ce   :  { %1919 = vrot.lane.b32.xlu2 %v4461_v6, %s2848_s28  ;;  %2070 = vmatpush.msrb.mxu1 %v2754_v32  ;;  %v2795_v32 = vld [vmem:[%s4809_s5 + $0x1e8] sm:$0xff] }
 0x2cf   :  { %2192 = vmatpush.msra.mxu2 %v2781_v46  ;;  %v2798_v46 = vld [vmem:[%s4809_s5 + $0x200] sm:$0xff] }
 0x2d0   :  { %v1480_v33 = vpop.f32.mrf.mxu2  ;;  %v1503_v29 = vpop.f32.mrf.mxu3  ;;  %2071 = vmatpush.msrb.mxu1 %v2753_v48  ;;  %v2793_v48 = vld [vmem:[%s4809_s5 + $0x1d8] sm:$0xff] }
 0x2d1   :  { %v1504_v39 = vadd.f32 %v1503_v29, %v1480_v33  ;;  %2193 = vmatpush.msra.mxu2 %v2780_v23  ;;  %v2772_v23 = vld [vmem:[%s4809_s5 + $0x140] sm:$0xff] }
 0x2d3   :  { %v1509_v9 = vadd.f32 %v1504_v39, %v1313_v34  ;;  %2194 = vmatpush.msra.mxu2 %v2779_v12  ;;  %v2749_v34 = vld [vmem:[%s4809_s5 + $0xa8] sm:$0xff]  ;;  %v2794_v12 = vld [vmem:[%s4809_s5 + $0x1e0] sm:$0xff] }
 0x2e1   :  { %v1696_v21 = vpop.f32.mrf.mxu2 }
 0x2e7   :  { %v1673_v62 = vpop.f32.mrf.mxu3 }
 0x2e8   :  { %v1697_v24 = vadd.f32 %v1696_v21, %v1673_v62  ;;  %v2752_v21 = vld [vmem:[%s4809_s5 + $0xc0] sm:$0xff]  ;;  %v2017_v62 = vld [vmem:[%s4809_s5 + $0x38] sm:$0xff] }
 0x2e9   :  { %v1699_v19 = vpop.f32.mrf.mxu2  ;;  %2072 = vmatpush.msrb.mxu1 %v2752_v21  ;;  %2124 = vmatpush.msra.mxu3 %v2017_v62  ;;  %v2789_v62 = vld [vmem:[%s4809_s5 + $0x1b8] sm:$0xff] }
 0x2ea   :  { %v1703_v36 = vadd.f32 %v1697_v24, %v1507_v22  ;;  %v2776_v22 = vld [vmem:[%s4809_s5 + $0x160] sm:$0xff] }
 0x2eb   :  { %2073 = vmatpush.msrb.mxu1 %v2751_v10  ;;  %2125 = vmatpush.msra.mxu3 %v2016_v26  ;;  %v2785_v26 = vld [vmem:[%s4809_s5 + $0x1a8] sm:$0xf] }
 0x2ef   :  { %v1676_v25 = vpop.f32.mrf.mxu3 }
 0x2f0   :  { %v1700_v3 = vadd.f32 %v1699_v19, %v1676_v25  ;;  %v2777_v19 = vld [vmem:[%s4809_s5 + $0x168] sm:$0xff] }
 0x2f2   :  { %v1705_v41 = vadd.f32 %v1700_v3, %v1509_v9  ;;  %v2014_v3 = vld [vmem:[%s4809_s5 + $0x20] sm:$0xff] }
 0x2f3   :  { %v2748_v9 = vld [vmem:[%s4809_s5 + $0xa0] sm:$0xff] }
 0x301   :  { %v1868_v35 = vpop.f32.mrf.mxu2  ;;  %v1891_v42 = vpop.f32.mrf.mxu3 }
 0x302   :  { %v1892_v56 = vadd.f32 %v1891_v42, %v1868_v35  ;;  %v2805_v35 = vld [vmem:[%s4809_s5 + $0x238] sm:$0xf] }
 0x304   :  { %v1898_v14 = vadd.f32 %v1892_v56, %v1703_v36  ;;  %v2750_v56 = vld [vmem:[%s4809_s5 + $0xb0] sm:$0xff] }
 0x305   :  { %2074 = vmatpush.msrb.mxu1 %v2750_v56 }
 0x306   :  { %v1908_v38 = vadd.f32 %v1904_v37, %v1898_v14 }
 0x307   :  { %2075 = vmatpush.msrb.mxu1 %v2749_v34 }
 0x308   :  { %1917 = vrot.lane.b32.xlu1 %v1908_v38, %s2848_s28 }
 0x309   :  { %v1871_v61 = vpop.f32.mrf.mxu2  ;;  %v1894_v53 = vpop.f32.mrf.mxu3  ;;  %2076 = vmatpush.msrb.mxu1 %v2748_v9  ;;  %v2327_v9 = vld [vmem:[%s4811_s7 + $0x78] sm:$0xff] }
 0x30a   :  { %v1895_v50 = vadd.f32 %v1894_v53, %v1871_v61 }
 0x30c   :  { %v1900_v51 = vadd.f32 %v1895_v50, %v1705_v41  ;;  %v2747_v41 = vld [vmem:[%s4809_s5 + $0x98] sm:$0xff] }
 0x30d   :  { %2077 = vmatpush.msrb.mxu1 %v2747_v41  ;;  %v2324_v41 = vld [vmem:[%s4811_s7 + $0x60] sm:$0xff] }
 0x30e   :  { %v4467_v47 = vadd.f32 %v1904_v37, %v1900_v51  ;;  %v2015_v37 = vld [vmem:[%s4809_s5 + $0x28] sm:$0xff] }
 0x30f   :  { %2126 = vmatpush.msra.mxu3 %v2015_v37  ;;  %2078 = vmatpush.msrb.mxu1 %v2746_v43  ;;  %v2320_v43 = vld [vmem:[%s4811_s7 + $0x40] sm:$0xff] }
 0x310   :  { %1921 = vrot.lane.b32.xlu0 %v4467_v47, %s2848_s28 }
 0x311   :  { %2127 = vmatpush.msra.mxu3 %v2014_v3  ;;  %2265 = vmatpush.msra.mxu1 %v2803_v45  ;;  %v2319_v45 = vld [vmem:[%s4811_s7 + $0x38] sm:$0xff] }
 0x313   :  { %2266 = vmatpush.msra.mxu1 %v2802_v54  ;;  %2128 = vmatpush.msra.mxu3 %v2013_v58  ;;  %v2317_v54 = vld [vmem:[%s4811_s7 + $0x28] sm:$0xff] }
 0x314   :  { %v2313_v58 = vld [vmem:[%s4811_s7 + $0x8] sm:$0xff] }
 0x315   :  { %2267 = vmatpush.msra.mxu1 %v2801_v57  ;;  %2129 = vmatpush.msra.mxu3 %v2012_v7  ;;  %v2316_v57 = vld [vmem:[%s4811_s7 + $0x20] sm:$0xff] }
 0x317   :  { %2268 = vmatpush.msra.mxu1 %v2800_v4  ;;  %2130 = vmatpush.msra.mxu3 %v2011_v1  ;;  %v2315_v4 = vld [vmem:[%s4811_s7 + $0x18] sm:$0xff] }
 0x319   :  { %2269 = vmatpush.msra.mxu1 %v2799_v31 }
 0x31b   :  { %2270 = vmatpush.msra.mxu1 %v2798_v46 }
 0x328   :  { %v1920_v44 = vpop.permute.xlu2 %1919 }
 0x338   :  { %v1916_v2 = vpop.permute.xlu0 %1915 }
 0x37a   :  { %v1918_v59 = vpop.permute.xlu1 %1917 }
 0x37b   :  { %v1924_v15 = vsel %vm1923_vm9, %v1916_v2, %v1918_v59  ;;  %v1931_v20 = vmax.f32 %v1908_v38, %v1918_v59  ;;  %v2797_v2 = vld [vmem:[%s4809_s5 + $0x1f8] sm:$0xff]  ;;  %v2010_v59 = vld [vmem:[%s4809_s5] sm:$0xff] }
 0x37c   :  { %v1930_v11 = vmax.f32 %v4457_v27, %v1924_v15  ;;  %v2778_v27 = vld [vmem:[%s4809_s5 + $0x170] sm:$0xff]  ;;  %2271 = vmatpush.msra.mxu1 %v2797_v2  ;;  %2131 = vmatpush.msra.mxu3 %v2010_v59 }
 0x37d   :  { %v1939_v13 = vrot.slane %v1931_v20, 1  ;;  %2195 = vmatpush.msra.mxu2 %v2778_v27  ;;  %v2796_v15 = vld [vmem:[%s4809_s5 + $0x1f0] sm:$0xff]  ;;  %v2791_v27 = vld [vmem:[%s4809_s5 + $0x1c8] sm:$0xff] }
 0x37e   :  { %v1938_v33 = vrot.slane %v1930_v11, 1  ;;  %2272 = vmatpush.msra.mxu1 %v2796_v15  ;;  %2332 = vmatpush.msrb.mxu3 %v2327_v9 }
 0x37f   :  { %v1947_v29 = vmax.f32 %v1931_v20, %v1939_v13  ;;  %2196 = vmatpush.msra.mxu2 %v2777_v19  ;;  %v2771_v20 = vld [vmem:[%s4809_s5 + $0x138] sm:$0xff]  ;;  %v2769_v13 = vld [vmem:[%s4809_s5 + $0x128] sm:$0xff] }
 0x380   :  { %v1946_v8 = vmax.f32 %v1930_v11, %v1938_v33  ;;  %2273 = vmatpush.msra.mxu1 %v2795_v32  ;;  %v2770_v11 = vld [vmem:[%s4809_s5 + $0x130] sm:$0xff]  ;;  %v2815_v32 = vld [vmem:[%s4810_s6] ss:$0 sm:$0xff]  ;;  %s2849_s6 = smov [#allocation4]  }
 0x381   :  { %v4558_v25 = vmax.f32 %v1947_v29, 0.0  ;;  %2197 = vmatpush.msra.mxu2 %v2776_v22  ;;  %v2792_v33 = vld [vmem:[%s4809_s5 + $0x1d0] sm:$0xff]  ;;  %v2790_v29 = vld [vmem:[%s4809_s5 + $0x1c0] sm:$0xff]  ;;  %s2371_s25 = sshll.u32 %s2849_s6, 4  ;;  %s2372_s25 = int_to_ptr.vmem [resolvable:$true] %s2371_s25 }
 0x382   :  { %v4566_v24 = vmax.f32 %v1946_v8, 0.0  ;;  %v1922_v30 = vpop.permute.xlu0 %1921  ;;  %2274 = vmatpush.msra.mxu1 %v2794_v12 }
 0x383   :  { %v1958_v42 = vrot.slane %v4558_v25, 7  ;;  %1970 = vst [vmem:[#allocation1 + $0x9] sm:$0xff] %v4558_v25  ;;  %v1925_v5 = vsel %vm1923_vm9, %v1920_v44, %v1922_v30  ;;  %v1933_v36 = vmax.f32 %v4467_v47, %v1922_v30  ;;  %2198 = vmatpush.msra.mxu2 %v2775_v55  ;;  %v2312_v55 = vld [vmem:[%s4811_s7] sm:$0xff] }
 0x384   :  { %1969 = vst [vmem:[#allocation1] sm:$0xff] %v4566_v24  ;;  %v1932_v28 = vmax.f32 %v4461_v6, %v1925_v5  ;;  %2275 = vmatpush.msra.mxu1 %v2793_v48 }
 0x385   :  { %v1960_v39 = vsel %vm767_vm4, %v4566_v24, %v1958_v42  ;;  %v1941_v14 = vrot.slane %v1933_v36, 1  ;;  %2199 = vmatpush.msra.mxu2 %v2774_v63  ;;  %v2784_v42 = vld [vmem:[%s4809_s5 + $0x1a0] sm:$0xff] }
 0x386   :  { %1966 = vst.msk [vmem:[#allocation3] ss:$4 sm:$0x3] %vm4572_vm10, %v1960_v39  ;;  %v1940_v38 = vrot.slane %v1932_v28, 1  ;;  %2276 = vmatpush.msra.mxu1 %v2792_v33 }
 0x387   :  { %v1949_v6 = vmax.f32 %v1933_v36, %v1941_v14  ;;  %2200 = vmatpush.msra.mxu2 %v2773_v0 }
 0x388   :  { %v1948_v61 = vmax.f32 %v1932_v28, %v1940_v38  ;;  %2277 = vmatpush.msra.mxu1 %v2791_v27  ;;  %v2804_v28 = vld [vmem:[%s4809_s5 + $0x230] sm:$0xff] }
 0x389   :  { %v4601_v53 = vmax.f32 %v1949_v6, 0.0  ;;  %2201 = vmatpush.msra.mxu2 %v2772_v23 }
 0x38a   :  { %v4606_v50 = vmax.f32 %v1948_v61, 0.0  ;;  %2278 = vmatpush.msra.mxu1 %v2790_v29  ;;  %v2326_v61 = vld [vmem:[%s4811_s7 + $0x70] sm:$0xff] }
 0x38b   :  { %v1972_v51 = vld [vmem:[#allocation1 + $0x2] ss:$9 sm:$0xff]  ;;  %v1959_v47 = vrot.slane %v4601_v53, 7  ;;  %2202 = vmatpush.msra.mxu2 %v2771_v20  ;;  %2333 = vmatpush.msrb.mxu3 %v2326_v61 }
 0x38c   :  { %1979 = vst.msk [vmem:[#allocation3 + $0x1] ss:$4 sm:$0x3] %vm4572_vm10, %v1972_v51  ;;  %2279 = vmatpush.msra.mxu1 %v2789_v62  ;;  %v2322_v51 = vld [vmem:[%s4811_s7 + $0x50] sm:$0xff] }
 0x38d   :  { %v1961_v49 = vsel %vm767_vm4, %v4606_v50, %v1959_v47  ;;  %1973 = vst [vmem:[#allocation1] sm:$0xff] %v4606_v50  ;;  %2203 = vmatpush.msra.mxu2 %v2770_v11  ;;  %v2321_v47 = vld [vmem:[%s4811_s7 + $0x48] sm:$0xff] }
 0x38e   :  { %1968 = vst.msk [vmem:[#allocation3 + $0x8] ss:$4 sm:$0x3] %vm4572_vm10, %v1961_v49  ;;  %v2318_v49 = vld [vmem:[%s4811_s7 + $0x30] sm:$0xff] }
 0x38f   :  { %1974 = vst [vmem:[#allocation1 + $0x9] sm:$0xff] %v4601_v53  ;;  %2204 = vmatpush.msra.mxu2 %v2769_v13  ;;  %v2816_v13 = vld [vmem:[%s4812_s8] ss:$0 sm:$0xff]  ;;  %s2373_s8 = sshll.u32 %s4813_s9, 4  ;;  %s2374_s8 = int_to_ptr.hbm [resolvable:$true] %s2373_s8 }
 0x391   :  { %2205 = vmatpush.msra.mxu2 %v2768_v16 }
 0x393   :  { %v2028_v8 = vld [vmem:[#allocation3 + $0x1] ss:$4 sm:$0x3] }
 0x395   :  { %v2009_v22 = vld [vmem:[#allocation3 + $0x8] ss:$4 sm:$0x3] }
 0x396   :  { %v1975_v17 = vld [vmem:[#allocation1 + $0x2] ss:$9 sm:$0xff] }
 0x397   :  { %1981 = vst.msk [vmem:[#allocation3 + $0x9] ss:$4 sm:$0x3] %vm4572_vm10, %v1975_v17  ;;  %v2314_v17 = vld [vmem:[%s4811_s7 + $0x10] sm:$0xff] }
 0x398   :  { %1982 = vst [vmem:[#allocation1] sm:$0xff] %v4566_v24 }
 0x399   :  { %1983 = vst [vmem:[#allocation1 + $0x9] sm:$0xff] %v4558_v25 }
 0x39e   :  { %v2029_v19 = vld [vmem:[#allocation3 + $0x9] ss:$4 sm:$0x3] }
 0x3a0   :  { %v1985_v60 = vld [vmem:[#allocation1 + $0x4] ss:$9 sm:$0xff] }
 0x3a1   :  { %1986 = vst [vmem:[#allocation1] sm:$0xff] %v4606_v50 }
 0x3a2   :  { %1987 = vst [vmem:[#allocation1 + $0x9] sm:$0xff] %v4601_v53 }
 0x3a3   :  { %1992 = vst.msk [vmem:[#allocation3 + $0x2] ss:$4 sm:$0x3] %vm4572_vm10, %v1985_v60 }
 0x3a9   :  { %v1988_v18 = vld [vmem:[#allocation1 + $0x4] ss:$9 sm:$0xff] }
 0x3aa   :  { %1995 = vst [vmem:[#allocation1] sm:$0xff] %v4566_v24  ;;  %v2008_v24 = vld [vmem:[#allocation3] ss:$4 sm:$0x3] }
 0x3ab   :  { %1996 = vst [vmem:[#allocation1 + $0x9] sm:$0xff] %v4558_v25  ;;  %v2788_v25 = vld [vmem:[%s4809_s5 + $0x1b0] sm:$0xff]  ;;  %v2156_v56 = vld [vmem:[#allocation3 + $0x2] ss:$4 sm:$0x3] }
 0x3ac   :  { %1994 = vst.msk [vmem:[#allocation3 + $0xa] ss:$4 sm:$0x3] %vm4572_vm10, %v1988_v18  ;;  %2280 = vmatpush.msra.mxu1 %v2788_v25 }
 0x3b2   :  { %v1998_v21 = vld [vmem:[#allocation1 + $0x6] ss:$9 sm:$0xff] }
 0x3b3   :  { %1999 = vst [vmem:[#allocation1] sm:$0xff] %v4606_v50  ;;  %v2157_v37 = vld [vmem:[#allocation3 + $0xa] ss:$4 sm:$0x3]  ;;  %v2323_v50 = vld [vmem:[%s4811_s7 + $0x58] sm:$0xff] }
 0x3b4   :  { %2000 = vst [vmem:[#allocation1 + $0x9] sm:$0xff] %v4601_v53  ;;  %v2325_v53 = vld [vmem:[%s4811_s7 + $0x68] sm:$0xff] }
 0x3b5   :  { %2051 = vst [vmem:[#allocation1] ss:$9 sm:$0xff] %v2028_v8  ;;  %2334 = vmatpush.msrb.mxu3 %v2325_v53 }
 0x3b6   :  { %2053 = vst [vmem:[#allocation1 + $0x1] ss:$9 sm:$0xff] %v2029_v19 }
 0x3b7   :  { %2005 = vst.msk [vmem:[#allocation3 + $0x3] ss:$4 sm:$0x3] %vm4572_vm10, %v1998_v21  ;;  %2335 = vmatpush.msrb.mxu3 %v2324_v41 }
 0x3b9   :  { %2336 = vmatpush.msrb.mxu3 %v2323_v50 }
 0x3bb   :  { %v2001_v10 = vld [vmem:[#allocation1 + $0x6] ss:$9 sm:$0xff]  ;;  %2337 = vmatpush.msrb.mxu3 %v2322_v51 }
 0x3bc   :  { %2007 = vst.msk [vmem:[#allocation3 + $0xb] ss:$4 sm:$0x3] %vm4572_vm10, %v2001_v10 }
 0x3bd   :  { %v2054_v44 = vld [vmem:[#allocation1] sm:$0xff]  ;;  %v2055_v30 = vld [vmem:[#allocation1 + $0x9] sm:$0xff]  ;;  %2338 = vmatpush.msrb.mxu3 %v2321_v47 }
 0x3be   :  { %2079 = vmatmul.f32.vlgmr.msrb.gmra.mxu1 %v2054_v44  ;;  %2765 = vmatmul.msk.f32.vlgmr.msra.gmra.mxu0 %vm2057_vm11, %v2055_v30  ;;  %2105 = vst [vmem:[#allocation1] ss:$9 sm:$0xff] %v2008_v24  ;;  %v2231_v34 = vld [vmem:[#allocation3 + $0x3] ss:$4 sm:$0x3] }
 0x3bf   :  { %2107 = vst [vmem:[#allocation1 + $0x1] ss:$9 sm:$0xff] %v2009_v22  ;;  %2786 = vmatpush.msk.msra.mxu0 %vm81_vm0, %v2785_v26  ;;  %2339 = vmatpush.msrb.mxu3 %v2320_v43 }
 0x3c1   :  { %2225 = vmatpush.msra.mxu0 %v2784_v42  ;;  %2340 = vmatpush.msrb.mxu3 %v2319_v45 }
 0x3c3   :  { %v2232_v3 = vld [vmem:[#allocation3 + $0xb] ss:$4 sm:$0x3]  ;;  %2341 = vmatpush.msrb.mxu3 %v2318_v49 }
 0x3c5   :  { %2342 = vmatpush.msrb.mxu3 %v2317_v54 }
 0x3c6   :  { %v2108_v5 = vld [vmem:[#allocation1] sm:$0xff]  ;;  %v2109_v36 = vld [vmem:[#allocation1 + $0x9] sm:$0xff] }
 0x3c7   :  { %2132 = vmatmul.f32.vlgmr.msra.gmra.mxu3 %v2108_v5  ;;  %2767 = vmatmul.msk.f32.vlgmr.msrb.gmra.mxu0 %vm2057_vm11, %v2109_v36  ;;  %2179 = vst [vmem:[#allocation1] ss:$9 sm:$0xff] %v2156_v56 }
 0x3c8   :  { %2181 = vst [vmem:[#allocation1 + $0x1] ss:$9 sm:$0xff] %v2157_v37  ;;  %2806 = vmatpush.msk.msrb.mxu0 %vm81_vm0, %v2805_v35  ;;  %2343 = vmatpush.msrb.mxu3 %v2316_v57 }
 0x3ca   :  { %2300 = vmatpush.msrb.mxu0 %v2804_v28  ;;  %2344 = vmatpush.msrb.mxu3 %v2315_v4 }
 0x3cc   :  { %2345 = vmatpush.msrb.mxu3 %v2314_v17 }
 0x3ce   :  { %2346 = vmatpush.msrb.mxu3 %v2313_v58 }
 0x3cf   :  { %v2182_v39 = vld [vmem:[#allocation1] sm:$0xff]  ;;  %v2183_v14 = vld [vmem:[#allocation1 + $0x9] sm:$0xff] }
 0x3d0   :  { %2206 = vmatmul.f32.vlgmr.msra.gmra.mxu2 %v2182_v39  ;;  %2787 = vmatmul.msk.f32.vlgmr.msra.gmra.mxu0 %vm2057_vm11, %v2183_v14  ;;  %2254 = vst [vmem:[#allocation1] ss:$9 sm:$0xff] %v2231_v34 }
 0x3d1   :  { %2256 = vst [vmem:[#allocation1 + $0x1] ss:$9 sm:$0xff] %v2232_v3  ;;  %2347 = vmatpush.msrb.mxu3 %v2312_v55 }
 0x3d8   :  { %v2257_v38 = vld [vmem:[#allocation1] sm:$0xff]  ;;  %v2258_v6 = vld [vmem:[#allocation1 + $0x9] sm:$0xff] }
 0x3d9   :  { %2281 = vmatmul.f32.vlgmr.msra.gmra.mxu1 %v2257_v38  ;;  %2807 = vmatmul.msk.f32.vlgmr.msrb.gmra.mxu0 %vm2057_vm11, %v2258_v6 }
 0x43b   :  { %v2100_v40 = vpop.f32.mrf.mxu0  ;;  %v2080_v31 = vpop.f32.mrf.mxu1 }
 0x43c   :  { %v2101_v46 = vadd.f32 %v2100_v40, %v2080_v31 }
 0x444   :  { %v2153_v60 = vpop.f32.mrf.mxu0 }
 0x44a   :  { %v2133_v7 = vpop.f32.mrf.mxu3 }
 0x44b   :  { %v2134_v52 = vadd.f32 %v2133_v7, %v2101_v46 }
 0x44d   :  { %v2227_v63 = vpop.f32.mrf.mxu0  ;;  %v2154_v0 = vadd.f32 %v2153_v60, %v2134_v52 }
 0x453   :  { %v2207_v1 = vpop.f32.mrf.mxu2 }
 0x454   :  { %v2228_v2 = vadd.f32 %v2227_v63, %v2207_v1 }
 0x456   :  { %v2230_v59 = vadd.f32 %v2228_v2, %v2154_v0  ;;  %v2282_v23 = vpop.f32.mrf.mxu1  ;;  %v2302_v15 = vpop.f32.mrf.mxu0 }
 0x457   :  { %v2303_v20 = vadd.f32 %v2302_v15, %v2282_v23 }
 0x459   :  { %v2305_v18 = vadd.f32 %v2303_v20, %v2230_v59 }
 0x45b   :  { %v2310_v11 = vadd.f32 %v2815_v32, %v2305_v18 }
 0x45d   :  { %v2311_v12 = vmax.f32 %v2310_v11, 0.0 }
 0x45f   :  { %2348 = vmatmul.f32.vlgmr.msrb.gmra.mxu3 %v2311_v12 }
 0x4e2   :  { %v2349_v48 = vpop.f32.mrf.mxu3 }
 0x4e3   :  { %v2350_v16 = vadd.f32 %v2816_v13, %v2349_v48 }
 0x4e5   :  { %v2353_v33 = vsel %vm2352_vm12, %v2350_v16, -inf }
 0x4e6   :  { %2354 = vmax.xlane.f32.xlu1 %v2353_v33 }
 0x559   :  { %v2355_v27 = vpop.xlane.xlu1 %2354 }
 0x55a   :  { %v2356_v29 = vsub.f32 %v2350_v16, %v2355_v27 }
 0x55c   :  { %v2357_v21 = vmul.f32 1.442695, %v2356_v29 }
 0x55e   :  { %2817 = vpow2.f32 %v2357_v21 }
 0x564   :  { %v2818_v62 = vpop.eup %2817 }
 0x565   :  { %v2359_v8 = vsel %vm2352_vm12, %v2818_v62, 0.0 }
 0x566   :  { %2360 = vadd.xlane.f32.xlu2 %v2359_v8 }
 0x5d9   :  { %v2361_v19 = vpop.xlane.xlu2 %2360 }
 0x5da   :  { %2819 = vlog2.f32 %v2361_v19 }
 0x5e0   :  { %v2820_v25 = vpop.eup %2819 }
 0x5e1   :  { %v2363_v10 = vmul.f32 0.6931472, %v2820_v25 }
 0x5e3   :  { %v2364_v26 = vsub.f32 %v2356_v29, %v2363_v10 }
 0x5e5   :  { %2365 = vst [vmem:[#allocation4] sm:$0x3] %v2364_v26 }
 0x5e6   :  { %2376 = dma.vmem_to_hbm [thread:$0]  %s2372_s25, 32, %s2374_s8, [#allocation5]  }
 0x5e7   :  { %2845 = dma.done.wait [#allocation5], 32  }
 0x5e8   :  { %2846 = vsyncadd [#allocation5], 4294967264 }
 0x5e9   :  { %2381 = vsyncpa [#allocation5], 1 }

</bundles_post_ra>
